<compile_context>
chip_gen: v6e
topology: v6e:2x2x1
jax: 0.10.0
libtpu: 0.0.40
codegen_flags: <defaults>
</compile_context>

<pallas_src>
import functools

import jax
import jax.numpy as jnp
from jax.experimental import pallas as pl
from jax.experimental.pallas import tpu as pltpu


def _sigmoid(v):
    # exp -> EUP; the approx reciprocal also lands on the EUP slot instead of
    # the VALU divide.  Exact 1/(1+exp(-v)) can be restored if bit-accuracy
    # matters (tolerance below is loosened to 5e-3 because of this).
    return pl.reciprocal(1.0 + jnp.exp(-v), approx=True)


def cbam_kernel(x_ref, w1t_ref, w2t_ref, wsp_ref, o_ref, *, B, C, H, W, K):
    """One grid step processes B batch elements.

    x_ref  : (B, C, H*W)      lane-dense activation block (VMEM)
    w1t_ref: (C, HIDP)        shared-MLP conv #1, transposed, HID zero-padded
    w2t_ref: (HIDP, C)        shared-MLP conv #2, transposed, HID zero-padded
    wsp_ref: (2*K*K,)         7x7 spatial conv taps, flat [c, ky, kx] (SMEM)
    o_ref  : (B, C, H*W)      output block (written exactly once)
    """
    P = K // 2
    HW = H * W
    f32 = jnp.float32

    x = x_ref[...].astype(f32)                                    # (B, C, HW)

    # ---------------- channel attention (MXU, lane-dense) ----------------
    # Global avg / max pool over the lane (H*W) axis -> (B, C) with C on the
    # lane axis, which is exactly the MXU LHS layout for the shared MLP.
    avg_c = jnp.mean(x, axis=2)                                   # (B, C)
    max_c = jnp.max(x, axis=2)                                    # (B, C)

    w1t = w1t_ref[...].astype(f32)                                # (C, HIDP)
    w2t = w2t_ref[...].astype(f32)                                # (HIDP, C)
    # MLP(avg) + MLP(max): the second 1x1 conv is linear, so the relu'd
    # hidden activations can be summed before the second dot.
    h = (jnp.maximum(jnp.dot(avg_c, w1t, preferred_element_type=f32), 0.0)
         + jnp.maximum(jnp.dot(max_c, w1t, preferred_element_type=f32), 0.0))
    z = jnp.dot(h, w2t, preferred_element_type=f32)               # (B, C)
    ca = _sigmoid(z)                                              # (B, C)

    # Single in-register channel scaling (no park-and-reload through o_ref).
    xs = x * ca[:, :, None]                                       # (B, C, HW)

    # ---------------- spatial attention (flat lane-dense 7x7 conv) --------
    avg_sp = jnp.mean(xs, axis=1)                                 # (B, HW)
    max_sp = jnp.max(xs, axis=1)                                  # (B, HW)

    # Column index of every flat position; used to mask row-wrapping taps.
    col = jax.lax.broadcasted_iota(jnp.int32, (1, HW), 1) % W     # (1, HW)

    def zshift(a, s):
        # Zero-fill lane shift: out[..., i] = a[..., i+s] if 0<=i+s<HW else 0.
        if s == 0:
            return a
        pad = jnp.zeros(a.shape[:-1] + (abs(s),), a.dtype)
        if s > 0:
            return jnp.concatenate([a[..., s:], pad], axis=-1)
        return jnp.concatenate([pad, a[..., :s]], axis=-1)

    # kx-shifted, column-masked maps for both pooled channels, computed once
    # and shared by all 7 kernel rows (the ky shift is a multiple of W, so it
    # commutes with the column mask).
    tmp_a, tmp_m = [], []
    for kx in range(K):
        s = kx - P
        c_src = col + s
        cmask = ((c_src >= 0) & (c_src < W)).astype(f32)          # (1, HW)
        tmp_a.append(zshift(avg_sp, s) * cmask)
        tmp_m.append(zshift(max_sp, s) * cmask)

    # 7x7 conv (2 -> 1 channels), statically unrolled, fully lane-dense.
    acc = jnp.zeros((B, HW), f32)
    for ky in range(K):
        inner = jnp.zeros((B, HW), f32)
        for kx in range(K):
            w_a = wsp_ref[0 * K * K + ky * K + kx]                # SMEM scalar
            w_m = wsp_ref[1 * K * K + ky * K + kx]
            inner = inner + w_a * tmp_a[kx] + w_m * tmp_m[kx]
        acc = acc + zshift(inner, (ky - P) * W)                   # row shift
    sa = _sigmoid(acc)                                            # (B, HW)

    o_ref[...] = (xs * sa[:, None, :]).astype(o_ref.dtype)


def _pick_block_batch(n, c, hw, itemsize):
    """Largest B (<= 8) dividing N whose double-buffered in+out block
    footprint fits comfortably in VMEM on every generation (v7x: 64 MiB/TC,
    v5e/v6e: 128 MiB).  On single-TC chips a single large grid step is
    preferred; when the grid has >= 2 steps the 'parallel' axis still lets
    v7x's two TensorCores split the work."""
    try:
        info = pltpu.get_tpu_info()
        vmem_cap = int(getattr(info, "vmem_capacity_bytes", 64 << 20))
    except Exception:
        vmem_cap = 64 << 20
    budget = min(vmem_cap // 4, 24 << 20)
    per_b = 2 * 2 * c * hw * itemsize        # (in + out) x double-buffer
    best = 1
    for cand in range(1, min(n, 8) + 1):
        if n % cand == 0 and cand * per_b <= budget:
            best = cand
    return best


def cbam(x, w1, w2, w_sp, *, block_batch=None):
    N, C, H, W = x.shape
    K = w_sp.shape[-1]
    hidden = w1.shape[0]
    HW = H * W
    B = (_pick_block_batch(N, C, HW, jnp.dtype(x.dtype).itemsize)
         if block_batch is None else block_batch)
    assert N % B == 0, (N, B)

    # Lane-dense HBM layout: (N, C, H*W) so the minor dim fills 128-lane
    # vregs and all HBM-facing loads/stores are unmasked.
    x_flat = x.reshape(N, C, HW)

    # Shared-MLP weights, transposed for the in-kernel dots; the hidden dim is
    # zero-padded to a multiple of 8 (>= 8) so the tiny tiles are layout
    # friendly.  Zero columns/rows contribute nothing (relu(0) = 0).
    hid_pad = max(8, ((hidden + 7) // 8) * 8)
    w1t = jnp.zeros((C, hid_pad), jnp.float32)
    w1t = w1t.at[:, :hidden].set(jnp.asarray(w1, jnp.float32).T)
    w2t = jnp.zeros((hid_pad, C), jnp.float32)
    w2t = w2t.at[:hidden, :].set(jnp.asarray(w2, jnp.float32).T)
    wsp_flat = w_sp.reshape(-1).astype(jnp.float32)               # (2*K*K,)

    kernel = functools.partial(cbam_kernel, B=B, C=C, H=H, W=W, K=K)
    out_flat = pl.pallas_call(
        kernel,
        out_shape=jax.ShapeDtypeStruct((N, C, HW), x.dtype),
        grid_spec=pltpu.PrefetchScalarGridSpec(
            num_scalar_prefetch=0,
            grid=(N // B,),
            in_specs=[
                pl.BlockSpec((B, C, HW), lambda n: (n, 0, 0)),
                pl.BlockSpec((C, hid_pad), lambda n: (0, 0)),
                pl.BlockSpec((hid_pad, C), lambda n: (0, 0)),
                pl.BlockSpec(memory_space=pltpu.MemorySpace.SMEM),
            ],
            out_specs=pl.BlockSpec((B, C, HW), lambda n: (n, 0, 0)),
        ),
        compiler_params=pltpu.CompilerParams(
            dimension_semantics=("parallel",),
            # Block picker keeps the footprint <= 24 MiB; 32 MiB is below the
            # physical VMEM of every generation (v7x: 64 MiB) and above the
            # v5e 16 MiB scoped default.
            vmem_limit_bytes=32 * 1024 * 1024),
    )(x_flat, w1t, w2t, wsp_flat)
    return out_flat.reshape(N, C, H, W)


def cbam_ref(x, w1, w2, w_sp):
    """Pure-JAX reference mirroring the PyTorch module."""
    avg = x.mean(axis=(2, 3))                                     # (N, C)
    mx = x.max(axis=(2, 3))                                       # (N, C)

    def mlp(v):
        return jnp.maximum(v @ w1.T, 0.0) @ w2.T

    ca = jax.nn.sigmoid(mlp(avg) + mlp(mx))                       # (N, C)
    x = x * ca[:, :, None, None]
    avg_sp = x.mean(axis=1, keepdims=True)
    max_sp = x.max(axis=1, keepdims=True)
    feat = jnp.concatenate([avg_sp, max_sp], axis=1)              # (N, 2, H, W)
    conv = jax.lax.conv_general_dilated(
        feat, w_sp, window_strides=(1, 1),
        padding=[(w_sp.shape[-1] // 2,) * 2] * 2,
        dimension_numbers=("NCHW", "OIHW", "NCHW"))
    sa = jax.nn.sigmoid(conv)                                     # (N, 1, H, W)
    return x * sa


if __name__ == "__main__":
    N, C, H, W = 2, 32, 16, 16
    ratio, K = 16, 7
    hidden = C // ratio

    key = jax.random.PRNGKey(0)
    k1, k2, k3, k4 = jax.random.split(key, 4)
    x = jax.random.normal(k1, (N, C, H, W), jnp.float32)
    w1 = jax.random.normal(k2, (hidden, C), jnp.float32) * 0.2
    w2 = jax.random.normal(k3, (C, hidden), jnp.float32) * 0.2
    w_sp = jax.random.normal(k4, (1, 2, K, K), jnp.float32) * 0.1

    out = jax.block_until_ready(cbam(x, w1, w2, w_sp))
    ref = cbam_ref(x, w1, w2, w_sp)
    assert out.shape == (N, C, H, W) and out.dtype == jnp.float32
    # Tolerance is slightly looser than machine-eps because the sigmoids use
    # the EUP approximate reciprocal (pl.reciprocal(approx=True)).
    assert jnp.allclose(out, ref, atol=5e-3, rtol=5e-3), (
        float(jnp.max(jnp.abs(out - ref))))

    # Also exercise a larger block-batch path (more batch elements per step).
    xb = jax.random.normal(k1, (8, C, H, W), jnp.float32)
    outb = jax.block_until_ready(cbam(xb, w1, w2, w_sp))
    refb = cbam_ref(xb, w1, w2, w_sp)
    assert jnp.allclose(outb, refb, atol=5e-3, rtol=5e-3), (
        float(jnp.max(jnp.abs(outb - refb))))

    print("KERNEL_OK")
</pallas_src>

<mosaic_0001>
module attributes {stable_mosaic.version = 11 : i64} {
  func.func @cbam_kernel(%arg0: i32, %arg1: memref<2x32x256xf32, #tpu.memory_space<vmem>>, %arg2: memref<32x8xf32, #tpu.memory_space<vmem>>, %arg3: memref<8x32xf32, #tpu.memory_space<vmem>>, %arg4: memref<98xf32, #tpu.memory_space<smem>>, %arg5: memref<2x32x256xf32, #tpu.memory_space<vmem>>) attributes {dimension_semantics = [#tpu.dimension_semantics<parallel>], iteration_bounds = array<i64: 1>, scalar_prefetch = 0 : i64, scratch_operands = 0 : i64, tpu.core_type = #tpu.core_type<tc>, window_params = [{transform_indices = @transform_0, window_bounds = array<i64: 2, 32, 256>}, {pipeline_mode = #tpu.pipeline_mode<synchronous>, transform_indices = @transform_1, window_bounds = array<i64: 32, 8>}, {pipeline_mode = #tpu.pipeline_mode<synchronous>, transform_indices = @transform_2, window_bounds = array<i64: 8, 32>}, {transform_indices = @transform_3, window_bounds = array<i64: 98>}, {transform_indices = @transform_4, window_bounds = array<i64: 2, 32, 256>}]} {
    %c0 = arith.constant 0 : index
    %c0_0 = arith.constant 0 : index
    %c0_1 = arith.constant 0 : index
    %0 = vector.load %arg1[%c0, %c0_0, %c0_1] : memref<2x32x256xf32, #tpu.memory_space<vmem>>, vector<2x32x256xf32>
    %cst = arith.constant dense<0.000000e+00> : vector<2x32xf32>
    %1 = vector.multi_reduction <add>, %0, %cst [2] : vector<2x32x256xf32> to vector<2x32xf32>
    %cst_2 = arith.constant 2.560000e+02 : f32
    %2 = vector.broadcast %cst_2 : f32 to vector<2x32xf32>
    %3 = arith.divf %1, %2 : vector<2x32xf32>
    %cst_3 = arith.constant dense<0xFF800000> : vector<2x32xf32>
    %4 = vector.multi_reduction <maximumf>, %0, %cst_3 [2] : vector<2x32x256xf32> to vector<2x32xf32>
    %c0_4 = arith.constant 0 : index
    %c0_5 = arith.constant 0 : index
    %5 = vector.load %arg2[%c0_4, %c0_5] : memref<32x8xf32, #tpu.memory_space<vmem>>, vector<32x8xf32>
    %c0_6 = arith.constant 0 : index
    %c0_7 = arith.constant 0 : index
    %6 = vector.load %arg3[%c0_6, %c0_7] : memref<8x32xf32, #tpu.memory_space<vmem>>, vector<8x32xf32>
    %cst_8 = arith.constant dense<0.000000e+00> : vector<2x8xf32>
    %7 = tpu.matmul %3, %5, %cst_8 {dimension_numbers = #tpu.dot_dimension_numbers<[1], [0], [0], [1], [0, 0, 1, 1], [], []>} : vector<2x32xf32>, vector<32x8xf32>, vector<2x8xf32> -> vector<2x8xf32>
    %cst_9 = arith.constant 0.000000e+00 : f32
    %8 = vector.broadcast %cst_9 : f32 to vector<2x8xf32>
    %9 = arith.maximumf %7, %8 : vector<2x8xf32>
    %cst_10 = arith.constant dense<0.000000e+00> : vector<2x8xf32>
    %10 = tpu.matmul %4, %5, %cst_10 {dimension_numbers = #tpu.dot_dimension_numbers<[1], [0], [0], [1], [0, 0, 1, 1], [], []>} : vector<2x32xf32>, vector<32x8xf32>, vector<2x8xf32> -> vector<2x8xf32>
    %cst_11 = arith.constant 0.000000e+00 : f32
    %11 = vector.broadcast %cst_11 : f32 to vector<2x8xf32>
    %12 = arith.maximumf %10, %11 : vector<2x8xf32>
    %13 = arith.addf %9, %12 : vector<2x8xf32>
    %cst_12 = arith.constant dense<0.000000e+00> : vector<2x32xf32>
    %14 = tpu.matmul %13, %6, %cst_12 {dimension_numbers = #tpu.dot_dimension_numbers<[1], [0], [0], [1], [0, 0, 1, 1], [], []>} : vector<2x8xf32>, vector<8x32xf32>, vector<2x32xf32> -> vector<2x32xf32>
    %cst_13 = arith.constant 0.000000e+00 : f32
    %15 = vector.broadcast %cst_13 : f32 to vector<2x32xf32>
    %16 = arith.subf %15, %14 : vector<2x32xf32>
    %17 = math.exp %16 : vector<2x32xf32>
    %cst_14 = arith.constant 1.000000e+00 : f32
    %18 = vector.broadcast %cst_14 : f32 to vector<2x32xf32>
    %19 = arith.addf %18, %17 : vector<2x32xf32>
    %20 = tpu.reciprocal %19 {approx = true} : vector<2x32xf32> -> vector<2x32xf32>
    %21 = vector.shape_cast %20 : vector<2x32xf32> to vector<2x32x1xf32>
    %22 = vector.broadcast %21 : vector<2x32x1xf32> to vector<2x32x256xf32>
    %23 = arith.mulf %0, %22 : vector<2x32x256xf32>
    %cst_15 = arith.constant dense<0.000000e+00> : vector<2x256xf32>
    %24 = vector.multi_reduction <add>, %23, %cst_15 [1] : vector<2x32x256xf32> to vector<2x256xf32>
    %cst_16 = arith.constant 3.200000e+01 : f32
    %25 = vector.broadcast %cst_16 : f32 to vector<2x256xf32>
    %26 = arith.divf %24, %25 : vector<2x256xf32>
    %cst_17 = arith.constant dense<0xFF800000> : vector<2x256xf32>
    %27 = vector.multi_reduction <maximumf>, %23, %cst_17 [1] : vector<2x32x256xf32> to vector<2x256xf32>
    %28 = tpu.iota {dimensions = array<i32: 1>} : vector<1x256xi32>
    %c16_i32 = arith.constant 16 : i32
    %c0_i32 = arith.constant 0 : i32
    %29 = arith.cmpi eq, %c16_i32, %c0_i32 : i32
    %c1_i32 = arith.constant 1 : i32
    %30 = arith.select %29, %c1_i32, %c16_i32 : i32
    %31 = vector.broadcast %30 : i32 to vector<1x256xi32>
    %32 = arith.remsi %28, %31 : vector<1x256xi32>
    %c0_i32_18 = arith.constant 0 : i32
    %33 = vector.broadcast %c0_i32_18 : i32 to vector<1x256xi32>
    %34 = arith.cmpi ne, %32, %33 : vector<1x256xi32>
    %c0_i32_19 = arith.constant 0 : i32
    %35 = vector.broadcast %c0_i32_19 : i32 to vector<1x256xi32>
    %36 = arith.cmpi slt, %32, %35 : vector<1x256xi32>
    %c0_i32_20 = arith.constant 0 : i32
    %37 = arith.cmpi slt, %30, %c0_i32_20 : i32
    %38 = vector.broadcast %37 : i1 to vector<1x256xi1>
    %39 = vector.broadcast %38 : vector<1x256xi1> to vector<1x256xi1>
    %40 = arith.xori %36, %39 : vector<1x256xi1>
    %41 = arith.andi %40, %34 : vector<1x256xi1>
    %42 = vector.broadcast %30 : i32 to vector<1x256xi32>
    %43 = arith.addi %32, %42 : vector<1x256xi32>
    %44 = arith.select %41, %43, %32 : vector<1x256xi1>, vector<1x256xi32>
    %c-3_i32 = arith.constant -3 : i32
    %45 = vector.broadcast %c-3_i32 : i32 to vector<1x256xi32>
    %46 = arith.addi %44, %45 : vector<1x256xi32>
    %c0_i32_21 = arith.constant 0 : i32
    %47 = vector.broadcast %c0_i32_21 : i32 to vector<1x256xi32>
    %48 = arith.cmpi sge, %46, %47 : vector<1x256xi32>
    %c16_i32_22 = arith.constant 16 : i32
    %49 = vector.broadcast %c16_i32_22 : i32 to vector<1x256xi32>
    %50 = arith.cmpi slt, %46, %49 : vector<1x256xi32>
    %51 = arith.andi %48, %50 : vector<1x256xi1>
    %52 = arith.extui %51 : vector<1x256xi1> to vector<1x256xi32>
    %53 = arith.sitofp %52 : vector<1x256xi32> to vector<1x256xf32>
    %cst_23 = arith.constant 0.000000e+00 : f32
    %54 = vector.broadcast %cst_23 : f32 to vector<2x3xf32>
    %55 = vector.extract_strided_slice %26 {offsets = [0, 0], sizes = [2, 253], strides = [1, 1]} : vector<2x256xf32> to vector<2x253xf32>
    %56 = tpu.concatenate %54, %55 in 1 : vector<2x3xf32>, vector<2x253xf32> -> vector<2x256xf32>
    %57 = vector.broadcast %53 : vector<1x256xf32> to vector<2x256xf32>
    %58 = arith.mulf %56, %57 : vector<2x256xf32>
    %cst_24 = arith.constant 0.000000e+00 : f32
    %59 = vector.broadcast %cst_24 : f32 to vector<2x3xf32>
    %60 = vector.extract_strided_slice %27 {offsets = [0, 0], sizes = [2, 253], strides = [1, 1]} : vector<2x256xf32> to vector<2x253xf32>
    %61 = tpu.concatenate %59, %60 in 1 : vector<2x3xf32>, vector<2x253xf32> -> vector<2x256xf32>
    %62 = vector.broadcast %53 : vector<1x256xf32> to vector<2x256xf32>
    %63 = arith.mulf %61, %62 : vector<2x256xf32>
    %c-2_i32 = arith.constant -2 : i32
    %64 = vector.broadcast %c-2_i32 : i32 to vector<1x256xi32>
    %65 = arith.addi %44, %64 : vector<1x256xi32>
    %c0_i32_25 = arith.constant 0 : i32
    %66 = vector.broadcast %c0_i32_25 : i32 to vector<1x256xi32>
    %67 = arith.cmpi sge, %65, %66 : vector<1x256xi32>
    %c16_i32_26 = arith.constant 16 : i32
    %68 = vector.broadcast %c16_i32_26 : i32 to vector<1x256xi32>
    %69 = arith.cmpi slt, %65, %68 : vector<1x256xi32>
    %70 = arith.andi %67, %69 : vector<1x256xi1>
    %71 = arith.extui %70 : vector<1x256xi1> to vector<1x256xi32>
    %72 = arith.sitofp %71 : vector<1x256xi32> to vector<1x256xf32>
    %cst_27 = arith.constant 0.000000e+00 : f32
    %73 = vector.broadcast %cst_27 : f32 to vector<2x2xf32>
    %74 = vector.extract_strided_slice %26 {offsets = [0, 0], sizes = [2, 254], strides = [1, 1]} : vector<2x256xf32> to vector<2x254xf32>
    %75 = tpu.concatenate %73, %74 in 1 : vector<2x2xf32>, vector<2x254xf32> -> vector<2x256xf32>
    %76 = vector.broadcast %72 : vector<1x256xf32> to vector<2x256xf32>
    %77 = arith.mulf %75, %76 : vector<2x256xf32>
    %cst_28 = arith.constant 0.000000e+00 : f32
    %78 = vector.broadcast %cst_28 : f32 to vector<2x2xf32>
    %79 = vector.extract_strided_slice %27 {offsets = [0, 0], sizes = [2, 254], strides = [1, 1]} : vector<2x256xf32> to vector<2x254xf32>
    %80 = tpu.concatenate %78, %79 in 1 : vector<2x2xf32>, vector<2x254xf32> -> vector<2x256xf32>
    %81 = vector.broadcast %72 : vector<1x256xf32> to vector<2x256xf32>
    %82 = arith.mulf %80, %81 : vector<2x256xf32>
    %c-1_i32 = arith.constant -1 : i32
    %83 = vector.broadcast %c-1_i32 : i32 to vector<1x256xi32>
    %84 = arith.addi %44, %83 : vector<1x256xi32>
    %c0_i32_29 = arith.constant 0 : i32
    %85 = vector.broadcast %c0_i32_29 : i32 to vector<1x256xi32>
    %86 = arith.cmpi sge, %84, %85 : vector<1x256xi32>
    %c16_i32_30 = arith.constant 16 : i32
    %87 = vector.broadcast %c16_i32_30 : i32 to vector<1x256xi32>
    %88 = arith.cmpi slt, %84, %87 : vector<1x256xi32>
    %89 = arith.andi %86, %88 : vector<1x256xi1>
    %90 = arith.extui %89 : vector<1x256xi1> to vector<1x256xi32>
    %91 = arith.sitofp %90 : vector<1x256xi32> to vector<1x256xf32>
    %cst_31 = arith.constant 0.000000e+00 : f32
    %92 = vector.broadcast %cst_31 : f32 to vector<2x1xf32>
    %93 = vector.extract_strided_slice %26 {offsets = [0, 0], sizes = [2, 255], strides = [1, 1]} : vector<2x256xf32> to vector<2x255xf32>
    %94 = tpu.concatenate %92, %93 in 1 : vector<2x1xf32>, vector<2x255xf32> -> vector<2x256xf32>
    %95 = vector.broadcast %91 : vector<1x256xf32> to vector<2x256xf32>
    %96 = arith.mulf %94, %95 : vector<2x256xf32>
    %cst_32 = arith.constant 0.000000e+00 : f32
    %97 = vector.broadcast %cst_32 : f32 to vector<2x1xf32>
    %98 = vector.extract_strided_slice %27 {offsets = [0, 0], sizes = [2, 255], strides = [1, 1]} : vector<2x256xf32> to vector<2x255xf32>
    %99 = tpu.concatenate %97, %98 in 1 : vector<2x1xf32>, vector<2x255xf32> -> vector<2x256xf32>
    %100 = vector.broadcast %91 : vector<1x256xf32> to vector<2x256xf32>
    %101 = arith.mulf %99, %100 : vector<2x256xf32>
    %c0_i32_33 = arith.constant 0 : i32
    %102 = vector.broadcast %c0_i32_33 : i32 to vector<1x256xi32>
    %103 = arith.addi %44, %102 : vector<1x256xi32>
    %c0_i32_34 = arith.constant 0 : i32
    %104 = vector.broadcast %c0_i32_34 : i32 to vector<1x256xi32>
    %105 = arith.cmpi sge, %103, %104 : vector<1x256xi32>
    %c16_i32_35 = arith.constant 16 : i32
    %106 = vector.broadcast %c16_i32_35 : i32 to vector<1x256xi32>
    %107 = arith.cmpi slt, %103, %106 : vector<1x256xi32>
    %108 = arith.andi %105, %107 : vector<1x256xi1>
    %109 = arith.extui %108 : vector<1x256xi1> to vector<1x256xi32>
    %110 = arith.sitofp %109 : vector<1x256xi32> to vector<1x256xf32>
    %111 = vector.broadcast %110 : vector<1x256xf32> to vector<2x256xf32>
    %112 = arith.mulf %26, %111 : vector<2x256xf32>
    %113 = vector.broadcast %110 : vector<1x256xf32> to vector<2x256xf32>
    %114 = arith.mulf %27, %113 : vector<2x256xf32>
    %c1_i32_36 = arith.constant 1 : i32
    %115 = vector.broadcast %c1_i32_36 : i32 to vector<1x256xi32>
    %116 = arith.addi %44, %115 : vector<1x256xi32>
    %c0_i32_37 = arith.constant 0 : i32
    %117 = vector.broadcast %c0_i32_37 : i32 to vector<1x256xi32>
    %118 = arith.cmpi sge, %116, %117 : vector<1x256xi32>
    %c16_i32_38 = arith.constant 16 : i32
    %119 = vector.broadcast %c16_i32_38 : i32 to vector<1x256xi32>
    %120 = arith.cmpi slt, %116, %119 : vector<1x256xi32>
    %121 = arith.andi %118, %120 : vector<1x256xi1>
    %122 = arith.extui %121 : vector<1x256xi1> to vector<1x256xi32>
    %123 = arith.sitofp %122 : vector<1x256xi32> to vector<1x256xf32>
    %cst_39 = arith.constant 0.000000e+00 : f32
    %124 = vector.broadcast %cst_39 : f32 to vector<2x1xf32>
    %125 = vector.extract_strided_slice %26 {offsets = [0, 1], sizes = [2, 255], strides = [1, 1]} : vector<2x256xf32> to vector<2x255xf32>
    %126 = tpu.concatenate %125, %124 in 1 : vector<2x255xf32>, vector<2x1xf32> -> vector<2x256xf32>
    %127 = vector.broadcast %123 : vector<1x256xf32> to vector<2x256xf32>
    %128 = arith.mulf %126, %127 : vector<2x256xf32>
    %cst_40 = arith.constant 0.000000e+00 : f32
    %129 = vector.broadcast %cst_40 : f32 to vector<2x1xf32>
    %130 = vector.extract_strided_slice %27 {offsets = [0, 1], sizes = [2, 255], strides = [1, 1]} : vector<2x256xf32> to vector<2x255xf32>
    %131 = tpu.concatenate %130, %129 in 1 : vector<2x255xf32>, vector<2x1xf32> -> vector<2x256xf32>
    %132 = vector.broadcast %123 : vector<1x256xf32> to vector<2x256xf32>
    %133 = arith.mulf %131, %132 : vector<2x256xf32>
    %c2_i32 = arith.constant 2 : i32
    %134 = vector.broadcast %c2_i32 : i32 to vector<1x256xi32>
    %135 = arith.addi %44, %134 : vector<1x256xi32>
    %c0_i32_41 = arith.constant 0 : i32
    %136 = vector.broadcast %c0_i32_41 : i32 to vector<1x256xi32>
    %137 = arith.cmpi sge, %135, %136 : vector<1x256xi32>
    %c16_i32_42 = arith.constant 16 : i32
    %138 = vector.broadcast %c16_i32_42 : i32 to vector<1x256xi32>
    %139 = arith.cmpi slt, %135, %138 : vector<1x256xi32>
    %140 = arith.andi %137, %139 : vector<1x256xi1>
    %141 = arith.extui %140 : vector<1x256xi1> to vector<1x256xi32>
    %142 = arith.sitofp %141 : vector<1x256xi32> to vector<1x256xf32>
    %cst_43 = arith.constant 0.000000e+00 : f32
    %143 = vector.broadcast %cst_43 : f32 to vector<2x2xf32>
    %144 = vector.extract_strided_slice %26 {offsets = [0, 2], sizes = [2, 254], strides = [1, 1]} : vector<2x256xf32> to vector<2x254xf32>
    %145 = tpu.concatenate %144, %143 in 1 : vector<2x254xf32>, vector<2x2xf32> -> vector<2x256xf32>
    %146 = vector.broadcast %142 : vector<1x256xf32> to vector<2x256xf32>
    %147 = arith.mulf %145, %146 : vector<2x256xf32>
    %cst_44 = arith.constant 0.000000e+00 : f32
    %148 = vector.broadcast %cst_44 : f32 to vector<2x2xf32>
    %149 = vector.extract_strided_slice %27 {offsets = [0, 2], sizes = [2, 254], strides = [1, 1]} : vector<2x256xf32> to vector<2x254xf32>
    %150 = tpu.concatenate %149, %148 in 1 : vector<2x254xf32>, vector<2x2xf32> -> vector<2x256xf32>
    %151 = vector.broadcast %142 : vector<1x256xf32> to vector<2x256xf32>
    %152 = arith.mulf %150, %151 : vector<2x256xf32>
    %c3_i32 = arith.constant 3 : i32
    %153 = vector.broadcast %c3_i32 : i32 to vector<1x256xi32>
    %154 = arith.addi %44, %153 : vector<1x256xi32>
    %c0_i32_45 = arith.constant 0 : i32
    %155 = vector.broadcast %c0_i32_45 : i32 to vector<1x256xi32>
    %156 = arith.cmpi sge, %154, %155 : vector<1x256xi32>
    %c16_i32_46 = arith.constant 16 : i32
    %157 = vector.broadcast %c16_i32_46 : i32 to vector<1x256xi32>
    %158 = arith.cmpi slt, %154, %157 : vector<1x256xi32>
    %159 = arith.andi %156, %158 : vector<1x256xi1>
    %160 = arith.extui %159 : vector<1x256xi1> to vector<1x256xi32>
    %161 = arith.sitofp %160 : vector<1x256xi32> to vector<1x256xf32>
    %cst_47 = arith.constant 0.000000e+00 : f32
    %162 = vector.broadcast %cst_47 : f32 to vector<2x3xf32>
    %163 = vector.extract_strided_slice %26 {offsets = [0, 3], sizes = [2, 253], strides = [1, 1]} : vector<2x256xf32> to vector<2x253xf32>
    %164 = tpu.concatenate %163, %162 in 1 : vector<2x253xf32>, vector<2x3xf32> -> vector<2x256xf32>
    %165 = vector.broadcast %161 : vector<1x256xf32> to vector<2x256xf32>
    %166 = arith.mulf %164, %165 : vector<2x256xf32>
    %cst_48 = arith.constant 0.000000e+00 : f32
    %167 = vector.broadcast %cst_48 : f32 to vector<2x3xf32>
    %168 = vector.extract_strided_slice %27 {offsets = [0, 3], sizes = [2, 253], strides = [1, 1]} : vector<2x256xf32> to vector<2x253xf32>
    %169 = tpu.concatenate %168, %167 in 1 : vector<2x253xf32>, vector<2x3xf32> -> vector<2x256xf32>
    %170 = vector.broadcast %161 : vector<1x256xf32> to vector<2x256xf32>
    %171 = arith.mulf %169, %170 : vector<2x256xf32>
    %cst_49 = arith.constant 0.000000e+00 : f32
    %172 = vector.broadcast %cst_49 : f32 to vector<2x256xf32>
    %cst_50 = arith.constant 0.000000e+00 : f32
    %173 = vector.broadcast %cst_50 : f32 to vector<2x256xf32>
    %c0_51 = arith.constant 0 : index
    %174 = memref.load %arg4[%c0_51] : memref<98xf32, #tpu.memory_space<smem>>
    %c49 = arith.constant 49 : index
    %175 = memref.load %arg4[%c49] : memref<98xf32, #tpu.memory_space<smem>>
    %176 = vector.broadcast %174 : f32 to vector<2x256xf32>
    %177 = arith.mulf %176, %58 : vector<2x256xf32>
    %178 = arith.addf %173, %177 : vector<2x256xf32>
    %179 = vector.broadcast %175 : f32 to vector<2x256xf32>
    %180 = arith.mulf %179, %63 : vector<2x256xf32>
    %181 = arith.addf %178, %180 : vector<2x256xf32>
    %c1 = arith.constant 1 : index
    %182 = memref.load %arg4[%c1] : memref<98xf32, #tpu.memory_space<smem>>
    %c50 = arith.constant 50 : index
    %183 = memref.load %arg4[%c50] : memref<98xf32, #tpu.memory_space<smem>>
    %184 = vector.broadcast %182 : f32 to vector<2x256xf32>
    %185 = arith.mulf %184, %77 : vector<2x256xf32>
    %186 = arith.addf %181, %185 : vector<2x256xf32>
    %187 = vector.broadcast %183 : f32 to vector<2x256xf32>
    %188 = arith.mulf %187, %82 : vector<2x256xf32>
    %189 = arith.addf %186, %188 : vector<2x256xf32>
    %c2 = arith.constant 2 : index
    %190 = memref.load %arg4[%c2] : memref<98xf32, #tpu.memory_space<smem>>
    %c51 = arith.constant 51 : index
    %191 = memref.load %arg4[%c51] : memref<98xf32, #tpu.memory_space<smem>>
    %192 = vector.broadcast %190 : f32 to vector<2x256xf32>
    %193 = arith.mulf %192, %96 : vector<2x256xf32>
    %194 = arith.addf %189, %193 : vector<2x256xf32>
    %195 = vector.broadcast %191 : f32 to vector<2x256xf32>
    %196 = arith.mulf %195, %101 : vector<2x256xf32>
    %197 = arith.addf %194, %196 : vector<2x256xf32>
    %c3 = arith.constant 3 : index
    %198 = memref.load %arg4[%c3] : memref<98xf32, #tpu.memory_space<smem>>
    %c52 = arith.constant 52 : index
    %199 = memref.load %arg4[%c52] : memref<98xf32, #tpu.memory_space<smem>>
    %200 = vector.broadcast %198 : f32 to vector<2x256xf32>
    %201 = arith.mulf %200, %112 : vector<2x256xf32>
    %202 = arith.addf %197, %201 : vector<2x256xf32>
    %203 = vector.broadcast %199 : f32 to vector<2x256xf32>
    %204 = arith.mulf %203, %114 : vector<2x256xf32>
    %205 = arith.addf %202, %204 : vector<2x256xf32>
    %c4 = arith.constant 4 : index
    %206 = memref.load %arg4[%c4] : memref<98xf32, #tpu.memory_space<smem>>
    %c53 = arith.constant 53 : index
    %207 = memref.load %arg4[%c53] : memref<98xf32, #tpu.memory_space<smem>>
    %208 = vector.broadcast %206 : f32 to vector<2x256xf32>
    %209 = arith.mulf %208, %128 : vector<2x256xf32>
    %210 = arith.addf %205, %209 : vector<2x256xf32>
    %211 = vector.broadcast %207 : f32 to vector<2x256xf32>
    %212 = arith.mulf %211, %133 : vector<2x256xf32>
    %213 = arith.addf %210, %212 : vector<2x256xf32>
    %c5 = arith.constant 5 : index
    %214 = memref.load %arg4[%c5] : memref<98xf32, #tpu.memory_space<smem>>
    %c54 = arith.constant 54 : index
    %215 = memref.load %arg4[%c54] : memref<98xf32, #tpu.memory_space<smem>>
    %216 = vector.broadcast %214 : f32 to vector<2x256xf32>
    %217 = arith.mulf %216, %147 : vector<2x256xf32>
    %218 = arith.addf %213, %217 : vector<2x256xf32>
    %219 = vector.broadcast %215 : f32 to vector<2x256xf32>
    %220 = arith.mulf %219, %152 : vector<2x256xf32>
    %221 = arith.addf %218, %220 : vector<2x256xf32>
    %c6 = arith.constant 6 : index
    %222 = memref.load %arg4[%c6] : memref<98xf32, #tpu.memory_space<smem>>
    %c55 = arith.constant 55 : index
    %223 = memref.load %arg4[%c55] : memref<98xf32, #tpu.memory_space<smem>>
    %224 = vector.broadcast %222 : f32 to vector<2x256xf32>
    %225 = arith.mulf %224, %166 : vector<2x256xf32>
    %226 = arith.addf %221, %225 : vector<2x256xf32>
    %227 = vector.broadcast %223 : f32 to vector<2x256xf32>
    %228 = arith.mulf %227, %171 : vector<2x256xf32>
    %229 = arith.addf %226, %228 : vector<2x256xf32>
    %cst_52 = arith.constant 0.000000e+00 : f32
    %230 = vector.broadcast %cst_52 : f32 to vector<2x48xf32>
    %231 = vector.extract_strided_slice %229 {offsets = [0, 0], sizes = [2, 208], strides = [1, 1]} : vector<2x256xf32> to vector<2x208xf32>
    %232 = tpu.concatenate %230, %231 in 1 : vector<2x48xf32>, vector<2x208xf32> -> vector<2x256xf32>
    %233 = arith.addf %172, %232 : vector<2x256xf32>
    %cst_53 = arith.constant 0.000000e+00 : f32
    %234 = vector.broadcast %cst_53 : f32 to vector<2x256xf32>
    %c7 = arith.constant 7 : index
    %235 = memref.load %arg4[%c7] : memref<98xf32, #tpu.memory_space<smem>>
    %c56 = arith.constant 56 : index
    %236 = memref.load %arg4[%c56] : memref<98xf32, #tpu.memory_space<smem>>
    %237 = vector.broadcast %235 : f32 to vector<2x256xf32>
    %238 = arith.mulf %237, %58 : vector<2x256xf32>
    %239 = arith.addf %234, %238 : vector<2x256xf32>
    %240 = vector.broadcast %236 : f32 to vector<2x256xf32>
    %241 = arith.mulf %240, %63 : vector<2x256xf32>
    %242 = arith.addf %239, %241 : vector<2x256xf32>
    %c8 = arith.constant 8 : index
    %243 = memref.load %arg4[%c8] : memref<98xf32, #tpu.memory_space<smem>>
    %c57 = arith.constant 57 : index
    %244 = memref.load %arg4[%c57] : memref<98xf32, #tpu.memory_space<smem>>
    %245 = vector.broadcast %243 : f32 to vector<2x256xf32>
    %246 = arith.mulf %245, %77 : vector<2x256xf32>
    %247 = arith.addf %242, %246 : vector<2x256xf32>
    %248 = vector.broadcast %244 : f32 to vector<2x256xf32>
    %249 = arith.mulf %248, %82 : vector<2x256xf32>
    %250 = arith.addf %247, %249 : vector<2x256xf32>
    %c9 = arith.constant 9 : index
    %251 = memref.load %arg4[%c9] : memref<98xf32, #tpu.memory_space<smem>>
    %c58 = arith.constant 58 : index
    %252 = memref.load %arg4[%c58] : memref<98xf32, #tpu.memory_space<smem>>
    %253 = vector.broadcast %251 : f32 to vector<2x256xf32>
    %254 = arith.mulf %253, %96 : vector<2x256xf32>
    %255 = arith.addf %250, %254 : vector<2x256xf32>
    %256 = vector.broadcast %252 : f32 to vector<2x256xf32>
    %257 = arith.mulf %256, %101 : vector<2x256xf32>
    %258 = arith.addf %255, %257 : vector<2x256xf32>
    %c10 = arith.constant 10 : index
    %259 = memref.load %arg4[%c10] : memref<98xf32, #tpu.memory_space<smem>>
    %c59 = arith.constant 59 : index
    %260 = memref.load %arg4[%c59] : memref<98xf32, #tpu.memory_space<smem>>
    %261 = vector.broadcast %259 : f32 to vector<2x256xf32>
    %262 = arith.mulf %261, %112 : vector<2x256xf32>
    %263 = arith.addf %258, %262 : vector<2x256xf32>
    %264 = vector.broadcast %260 : f32 to vector<2x256xf32>
    %265 = arith.mulf %264, %114 : vector<2x256xf32>
    %266 = arith.addf %263, %265 : vector<2x256xf32>
    %c11 = arith.constant 11 : index
    %267 = memref.load %arg4[%c11] : memref<98xf32, #tpu.memory_space<smem>>
    %c60 = arith.constant 60 : index
    %268 = memref.load %arg4[%c60] : memref<98xf32, #tpu.memory_space<smem>>
    %269 = vector.broadcast %267 : f32 to vector<2x256xf32>
    %270 = arith.mulf %269, %128 : vector<2x256xf32>
    %271 = arith.addf %266, %270 : vector<2x256xf32>
    %272 = vector.broadcast %268 : f32 to vector<2x256xf32>
    %273 = arith.mulf %272, %133 : vector<2x256xf32>
    %274 = arith.addf %271, %273 : vector<2x256xf32>
    %c12 = arith.constant 12 : index
    %275 = memref.load %arg4[%c12] : memref<98xf32, #tpu.memory_space<smem>>
    %c61 = arith.constant 61 : index
    %276 = memref.load %arg4[%c61] : memref<98xf32, #tpu.memory_space<smem>>
    %277 = vector.broadcast %275 : f32 to vector<2x256xf32>
    %278 = arith.mulf %277, %147 : vector<2x256xf32>
    %279 = arith.addf %274, %278 : vector<2x256xf32>
    %280 = vector.broadcast %276 : f32 to vector<2x256xf32>
    %281 = arith.mulf %280, %152 : vector<2x256xf32>
    %282 = arith.addf %279, %281 : vector<2x256xf32>
    %c13 = arith.constant 13 : index
    %283 = memref.load %arg4[%c13] : memref<98xf32, #tpu.memory_space<smem>>
    %c62 = arith.constant 62 : index
    %284 = memref.load %arg4[%c62] : memref<98xf32, #tpu.memory_space<smem>>
    %285 = vector.broadcast %283 : f32 to vector<2x256xf32>
    %286 = arith.mulf %285, %166 : vector<2x256xf32>
    %287 = arith.addf %282, %286 : vector<2x256xf32>
    %288 = vector.broadcast %284 : f32 to vector<2x256xf32>
    %289 = arith.mulf %288, %171 : vector<2x256xf32>
    %290 = arith.addf %287, %289 : vector<2x256xf32>
    %cst_54 = arith.constant 0.000000e+00 : f32
    %291 = vector.broadcast %cst_54 : f32 to vector<2x32xf32>
    %292 = vector.extract_strided_slice %290 {offsets = [0, 0], sizes = [2, 224], strides = [1, 1]} : vector<2x256xf32> to vector<2x224xf32>
    %293 = tpu.concatenate %291, %292 in 1 : vector<2x32xf32>, vector<2x224xf32> -> vector<2x256xf32>
    %294 = arith.addf %233, %293 : vector<2x256xf32>
    %cst_55 = arith.constant 0.000000e+00 : f32
    %295 = vector.broadcast %cst_55 : f32 to vector<2x256xf32>
    %c14 = arith.constant 14 : index
    %296 = memref.load %arg4[%c14] : memref<98xf32, #tpu.memory_space<smem>>
    %c63 = arith.constant 63 : index
    %297 = memref.load %arg4[%c63] : memref<98xf32, #tpu.memory_space<smem>>
    %298 = vector.broadcast %296 : f32 to vector<2x256xf32>
    %299 = arith.mulf %298, %58 : vector<2x256xf32>
    %300 = arith.addf %295, %299 : vector<2x256xf32>
    %301 = vector.broadcast %297 : f32 to vector<2x256xf32>
    %302 = arith.mulf %301, %63 : vector<2x256xf32>
    %303 = arith.addf %300, %302 : vector<2x256xf32>
    %c15 = arith.constant 15 : index
    %304 = memref.load %arg4[%c15] : memref<98xf32, #tpu.memory_space<smem>>
    %c64 = arith.constant 64 : index
    %305 = memref.load %arg4[%c64] : memref<98xf32, #tpu.memory_space<smem>>
    %306 = vector.broadcast %304 : f32 to vector<2x256xf32>
    %307 = arith.mulf %306, %77 : vector<2x256xf32>
    %308 = arith.addf %303, %307 : vector<2x256xf32>
    %309 = vector.broadcast %305 : f32 to vector<2x256xf32>
    %310 = arith.mulf %309, %82 : vector<2x256xf32>
    %311 = arith.addf %308, %310 : vector<2x256xf32>
    %c16 = arith.constant 16 : index
    %312 = memref.load %arg4[%c16] : memref<98xf32, #tpu.memory_space<smem>>
    %c65 = arith.constant 65 : index
    %313 = memref.load %arg4[%c65] : memref<98xf32, #tpu.memory_space<smem>>
    %314 = vector.broadcast %312 : f32 to vector<2x256xf32>
    %315 = arith.mulf %314, %96 : vector<2x256xf32>
    %316 = arith.addf %311, %315 : vector<2x256xf32>
    %317 = vector.broadcast %313 : f32 to vector<2x256xf32>
    %318 = arith.mulf %317, %101 : vector<2x256xf32>
    %319 = arith.addf %316, %318 : vector<2x256xf32>
    %c17 = arith.constant 17 : index
    %320 = memref.load %arg4[%c17] : memref<98xf32, #tpu.memory_space<smem>>
    %c66 = arith.constant 66 : index
    %321 = memref.load %arg4[%c66] : memref<98xf32, #tpu.memory_space<smem>>
    %322 = vector.broadcast %320 : f32 to vector<2x256xf32>
    %323 = arith.mulf %322, %112 : vector<2x256xf32>
    %324 = arith.addf %319, %323 : vector<2x256xf32>
    %325 = vector.broadcast %321 : f32 to vector<2x256xf32>
    %326 = arith.mulf %325, %114 : vector<2x256xf32>
    %327 = arith.addf %324, %326 : vector<2x256xf32>
    %c18 = arith.constant 18 : index
    %328 = memref.load %arg4[%c18] : memref<98xf32, #tpu.memory_space<smem>>
    %c67 = arith.constant 67 : index
    %329 = memref.load %arg4[%c67] : memref<98xf32, #tpu.memory_space<smem>>
    %330 = vector.broadcast %328 : f32 to vector<2x256xf32>
    %331 = arith.mulf %330, %128 : vector<2x256xf32>
    %332 = arith.addf %327, %331 : vector<2x256xf32>
    %333 = vector.broadcast %329 : f32 to vector<2x256xf32>
    %334 = arith.mulf %333, %133 : vector<2x256xf32>
    %335 = arith.addf %332, %334 : vector<2x256xf32>
    %c19 = arith.constant 19 : index
    %336 = memref.load %arg4[%c19] : memref<98xf32, #tpu.memory_space<smem>>
    %c68 = arith.constant 68 : index
    %337 = memref.load %arg4[%c68] : memref<98xf32, #tpu.memory_space<smem>>
    %338 = vector.broadcast %336 : f32 to vector<2x256xf32>
    %339 = arith.mulf %338, %147 : vector<2x256xf32>
    %340 = arith.addf %335, %339 : vector<2x256xf32>
    %341 = vector.broadcast %337 : f32 to vector<2x256xf32>
    %342 = arith.mulf %341, %152 : vector<2x256xf32>
    %343 = arith.addf %340, %342 : vector<2x256xf32>
    %c20 = arith.constant 20 : index
    %344 = memref.load %arg4[%c20] : memref<98xf32, #tpu.memory_space<smem>>
    %c69 = arith.constant 69 : index
    %345 = memref.load %arg4[%c69] : memref<98xf32, #tpu.memory_space<smem>>
    %346 = vector.broadcast %344 : f32 to vector<2x256xf32>
    %347 = arith.mulf %346, %166 : vector<2x256xf32>
    %348 = arith.addf %343, %347 : vector<2x256xf32>
    %349 = vector.broadcast %345 : f32 to vector<2x256xf32>
    %350 = arith.mulf %349, %171 : vector<2x256xf32>
    %351 = arith.addf %348, %350 : vector<2x256xf32>
    %cst_56 = arith.constant 0.000000e+00 : f32
    %352 = vector.broadcast %cst_56 : f32 to vector<2x16xf32>
    %353 = vector.extract_strided_slice %351 {offsets = [0, 0], sizes = [2, 240], strides = [1, 1]} : vector<2x256xf32> to vector<2x240xf32>
    %354 = tpu.concatenate %352, %353 in 1 : vector<2x16xf32>, vector<2x240xf32> -> vector<2x256xf32>
    %355 = arith.addf %294, %354 : vector<2x256xf32>
    %cst_57 = arith.constant 0.000000e+00 : f32
    %356 = vector.broadcast %cst_57 : f32 to vector<2x256xf32>
    %c21 = arith.constant 21 : index
    %357 = memref.load %arg4[%c21] : memref<98xf32, #tpu.memory_space<smem>>
    %c70 = arith.constant 70 : index
    %358 = memref.load %arg4[%c70] : memref<98xf32, #tpu.memory_space<smem>>
    %359 = vector.broadcast %357 : f32 to vector<2x256xf32>
    %360 = arith.mulf %359, %58 : vector<2x256xf32>
    %361 = arith.addf %356, %360 : vector<2x256xf32>
    %362 = vector.broadcast %358 : f32 to vector<2x256xf32>
    %363 = arith.mulf %362, %63 : vector<2x256xf32>
    %364 = arith.addf %361, %363 : vector<2x256xf32>
    %c22 = arith.constant 22 : index
    %365 = memref.load %arg4[%c22] : memref<98xf32, #tpu.memory_space<smem>>
    %c71 = arith.constant 71 : index
    %366 = memref.load %arg4[%c71] : memref<98xf32, #tpu.memory_space<smem>>
    %367 = vector.broadcast %365 : f32 to vector<2x256xf32>
    %368 = arith.mulf %367, %77 : vector<2x256xf32>
    %369 = arith.addf %364, %368 : vector<2x256xf32>
    %370 = vector.broadcast %366 : f32 to vector<2x256xf32>
    %371 = arith.mulf %370, %82 : vector<2x256xf32>
    %372 = arith.addf %369, %371 : vector<2x256xf32>
    %c23 = arith.constant 23 : index
    %373 = memref.load %arg4[%c23] : memref<98xf32, #tpu.memory_space<smem>>
    %c72 = arith.constant 72 : index
    %374 = memref.load %arg4[%c72] : memref<98xf32, #tpu.memory_space<smem>>
    %375 = vector.broadcast %373 : f32 to vector<2x256xf32>
    %376 = arith.mulf %375, %96 : vector<2x256xf32>
    %377 = arith.addf %372, %376 : vector<2x256xf32>
    %378 = vector.broadcast %374 : f32 to vector<2x256xf32>
    %379 = arith.mulf %378, %101 : vector<2x256xf32>
    %380 = arith.addf %377, %379 : vector<2x256xf32>
    %c24 = arith.constant 24 : index
    %381 = memref.load %arg4[%c24] : memref<98xf32, #tpu.memory_space<smem>>
    %c73 = arith.constant 73 : index
    %382 = memref.load %arg4[%c73] : memref<98xf32, #tpu.memory_space<smem>>
    %383 = vector.broadcast %381 : f32 to vector<2x256xf32>
    %384 = arith.mulf %383, %112 : vector<2x256xf32>
    %385 = arith.addf %380, %384 : vector<2x256xf32>
    %386 = vector.broadcast %382 : f32 to vector<2x256xf32>
    %387 = arith.mulf %386, %114 : vector<2x256xf32>
    %388 = arith.addf %385, %387 : vector<2x256xf32>
    %c25 = arith.constant 25 : index
    %389 = memref.load %arg4[%c25] : memref<98xf32, #tpu.memory_space<smem>>
    %c74 = arith.constant 74 : index
    %390 = memref.load %arg4[%c74] : memref<98xf32, #tpu.memory_space<smem>>
    %391 = vector.broadcast %389 : f32 to vector<2x256xf32>
    %392 = arith.mulf %391, %128 : vector<2x256xf32>
    %393 = arith.addf %388, %392 : vector<2x256xf32>
    %394 = vector.broadcast %390 : f32 to vector<2x256xf32>
    %395 = arith.mulf %394, %133 : vector<2x256xf32>
    %396 = arith.addf %393, %395 : vector<2x256xf32>
    %c26 = arith.constant 26 : index
    %397 = memref.load %arg4[%c26] : memref<98xf32, #tpu.memory_space<smem>>
    %c75 = arith.constant 75 : index
    %398 = memref.load %arg4[%c75] : memref<98xf32, #tpu.memory_space<smem>>
    %399 = vector.broadcast %397 : f32 to vector<2x256xf32>
    %400 = arith.mulf %399, %147 : vector<2x256xf32>
    %401 = arith.addf %396, %400 : vector<2x256xf32>
    %402 = vector.broadcast %398 : f32 to vector<2x256xf32>
    %403 = arith.mulf %402, %152 : vector<2x256xf32>
    %404 = arith.addf %401, %403 : vector<2x256xf32>
    %c27 = arith.constant 27 : index
    %405 = memref.load %arg4[%c27] : memref<98xf32, #tpu.memory_space<smem>>
    %c76 = arith.constant 76 : index
    %406 = memref.load %arg4[%c76] : memref<98xf32, #tpu.memory_space<smem>>
    %407 = vector.broadcast %405 : f32 to vector<2x256xf32>
    %408 = arith.mulf %407, %166 : vector<2x256xf32>
    %409 = arith.addf %404, %408 : vector<2x256xf32>
    %410 = vector.broadcast %406 : f32 to vector<2x256xf32>
    %411 = arith.mulf %410, %171 : vector<2x256xf32>
    %412 = arith.addf %409, %411 : vector<2x256xf32>
    %413 = arith.addf %355, %412 : vector<2x256xf32>
    %cst_58 = arith.constant 0.000000e+00 : f32
    %414 = vector.broadcast %cst_58 : f32 to vector<2x256xf32>
    %c28 = arith.constant 28 : index
    %415 = memref.load %arg4[%c28] : memref<98xf32, #tpu.memory_space<smem>>
    %c77 = arith.constant 77 : index
    %416 = memref.load %arg4[%c77] : memref<98xf32, #tpu.memory_space<smem>>
    %417 = vector.broadcast %415 : f32 to vector<2x256xf32>
    %418 = arith.mulf %417, %58 : vector<2x256xf32>
    %419 = arith.addf %414, %418 : vector<2x256xf32>
    %420 = vector.broadcast %416 : f32 to vector<2x256xf32>
    %421 = arith.mulf %420, %63 : vector<2x256xf32>
    %422 = arith.addf %419, %421 : vector<2x256xf32>
    %c29 = arith.constant 29 : index
    %423 = memref.load %arg4[%c29] : memref<98xf32, #tpu.memory_space<smem>>
    %c78 = arith.constant 78 : index
    %424 = memref.load %arg4[%c78] : memref<98xf32, #tpu.memory_space<smem>>
    %425 = vector.broadcast %423 : f32 to vector<2x256xf32>
    %426 = arith.mulf %425, %77 : vector<2x256xf32>
    %427 = arith.addf %422, %426 : vector<2x256xf32>
    %428 = vector.broadcast %424 : f32 to vector<2x256xf32>
    %429 = arith.mulf %428, %82 : vector<2x256xf32>
    %430 = arith.addf %427, %429 : vector<2x256xf32>
    %c30 = arith.constant 30 : index
    %431 = memref.load %arg4[%c30] : memref<98xf32, #tpu.memory_space<smem>>
    %c79 = arith.constant 79 : index
    %432 = memref.load %arg4[%c79] : memref<98xf32, #tpu.memory_space<smem>>
    %433 = vector.broadcast %431 : f32 to vector<2x256xf32>
    %434 = arith.mulf %433, %96 : vector<2x256xf32>
    %435 = arith.addf %430, %434 : vector<2x256xf32>
    %436 = vector.broadcast %432 : f32 to vector<2x256xf32>
    %437 = arith.mulf %436, %101 : vector<2x256xf32>
    %438 = arith.addf %435, %437 : vector<2x256xf32>
    %c31 = arith.constant 31 : index
    %439 = memref.load %arg4[%c31] : memref<98xf32, #tpu.memory_space<smem>>
    %c80 = arith.constant 80 : index
    %440 = memref.load %arg4[%c80] : memref<98xf32, #tpu.memory_space<smem>>
    %441 = vector.broadcast %439 : f32 to vector<2x256xf32>
    %442 = arith.mulf %441, %112 : vector<2x256xf32>
    %443 = arith.addf %438, %442 : vector<2x256xf32>
    %444 = vector.broadcast %440 : f32 to vector<2x256xf32>
    %445 = arith.mulf %444, %114 : vector<2x256xf32>
    %446 = arith.addf %443, %445 : vector<2x256xf32>
    %c32 = arith.constant 32 : index
    %447 = memref.load %arg4[%c32] : memref<98xf32, #tpu.memory_space<smem>>
    %c81 = arith.constant 81 : index
    %448 = memref.load %arg4[%c81] : memref<98xf32, #tpu.memory_space<smem>>
    %449 = vector.broadcast %447 : f32 to vector<2x256xf32>
    %450 = arith.mulf %449, %128 : vector<2x256xf32>
    %451 = arith.addf %446, %450 : vector<2x256xf32>
    %452 = vector.broadcast %448 : f32 to vector<2x256xf32>
    %453 = arith.mulf %452, %133 : vector<2x256xf32>
    %454 = arith.addf %451, %453 : vector<2x256xf32>
    %c33 = arith.constant 33 : index
    %455 = memref.load %arg4[%c33] : memref<98xf32, #tpu.memory_space<smem>>
    %c82 = arith.constant 82 : index
    %456 = memref.load %arg4[%c82] : memref<98xf32, #tpu.memory_space<smem>>
    %457 = vector.broadcast %455 : f32 to vector<2x256xf32>
    %458 = arith.mulf %457, %147 : vector<2x256xf32>
    %459 = arith.addf %454, %458 : vector<2x256xf32>
    %460 = vector.broadcast %456 : f32 to vector<2x256xf32>
    %461 = arith.mulf %460, %152 : vector<2x256xf32>
    %462 = arith.addf %459, %461 : vector<2x256xf32>
    %c34 = arith.constant 34 : index
    %463 = memref.load %arg4[%c34] : memref<98xf32, #tpu.memory_space<smem>>
    %c83 = arith.constant 83 : index
    %464 = memref.load %arg4[%c83] : memref<98xf32, #tpu.memory_space<smem>>
    %465 = vector.broadcast %463 : f32 to vector<2x256xf32>
    %466 = arith.mulf %465, %166 : vector<2x256xf32>
    %467 = arith.addf %462, %466 : vector<2x256xf32>
    %468 = vector.broadcast %464 : f32 to vector<2x256xf32>
    %469 = arith.mulf %468, %171 : vector<2x256xf32>
    %470 = arith.addf %467, %469 : vector<2x256xf32>
    %cst_59 = arith.constant 0.000000e+00 : f32
    %471 = vector.broadcast %cst_59 : f32 to vector<2x16xf32>
    %472 = vector.extract_strided_slice %470 {offsets = [0, 16], sizes = [2, 240], strides = [1, 1]} : vector<2x256xf32> to vector<2x240xf32>
    %473 = tpu.concatenate %472, %471 in 1 : vector<2x240xf32>, vector<2x16xf32> -> vector<2x256xf32>
    %474 = arith.addf %413, %473 : vector<2x256xf32>
    %cst_60 = arith.constant 0.000000e+00 : f32
    %475 = vector.broadcast %cst_60 : f32 to vector<2x256xf32>
    %c35 = arith.constant 35 : index
    %476 = memref.load %arg4[%c35] : memref<98xf32, #tpu.memory_space<smem>>
    %c84 = arith.constant 84 : index
    %477 = memref.load %arg4[%c84] : memref<98xf32, #tpu.memory_space<smem>>
    %478 = vector.broadcast %476 : f32 to vector<2x256xf32>
    %479 = arith.mulf %478, %58 : vector<2x256xf32>
    %480 = arith.addf %475, %479 : vector<2x256xf32>
    %481 = vector.broadcast %477 : f32 to vector<2x256xf32>
    %482 = arith.mulf %481, %63 : vector<2x256xf32>
    %483 = arith.addf %480, %482 : vector<2x256xf32>
    %c36 = arith.constant 36 : index
    %484 = memref.load %arg4[%c36] : memref<98xf32, #tpu.memory_space<smem>>
    %c85 = arith.constant 85 : index
    %485 = memref.load %arg4[%c85] : memref<98xf32, #tpu.memory_space<smem>>
    %486 = vector.broadcast %484 : f32 to vector<2x256xf32>
    %487 = arith.mulf %486, %77 : vector<2x256xf32>
    %488 = arith.addf %483, %487 : vector<2x256xf32>
    %489 = vector.broadcast %485 : f32 to vector<2x256xf32>
    %490 = arith.mulf %489, %82 : vector<2x256xf32>
    %491 = arith.addf %488, %490 : vector<2x256xf32>
    %c37 = arith.constant 37 : index
    %492 = memref.load %arg4[%c37] : memref<98xf32, #tpu.memory_space<smem>>
    %c86 = arith.constant 86 : index
    %493 = memref.load %arg4[%c86] : memref<98xf32, #tpu.memory_space<smem>>
    %494 = vector.broadcast %492 : f32 to vector<2x256xf32>
    %495 = arith.mulf %494, %96 : vector<2x256xf32>
    %496 = arith.addf %491, %495 : vector<2x256xf32>
    %497 = vector.broadcast %493 : f32 to vector<2x256xf32>
    %498 = arith.mulf %497, %101 : vector<2x256xf32>
    %499 = arith.addf %496, %498 : vector<2x256xf32>
    %c38 = arith.constant 38 : index
    %500 = memref.load %arg4[%c38] : memref<98xf32, #tpu.memory_space<smem>>
    %c87 = arith.constant 87 : index
    %501 = memref.load %arg4[%c87] : memref<98xf32, #tpu.memory_space<smem>>
    %502 = vector.broadcast %500 : f32 to vector<2x256xf32>
    %503 = arith.mulf %502, %112 : vector<2x256xf32>
    %504 = arith.addf %499, %503 : vector<2x256xf32>
    %505 = vector.broadcast %501 : f32 to vector<2x256xf32>
    %506 = arith.mulf %505, %114 : vector<2x256xf32>
    %507 = arith.addf %504, %506 : vector<2x256xf32>
    %c39 = arith.constant 39 : index
    %508 = memref.load %arg4[%c39] : memref<98xf32, #tpu.memory_space<smem>>
    %c88 = arith.constant 88 : index
    %509 = memref.load %arg4[%c88] : memref<98xf32, #tpu.memory_space<smem>>
    %510 = vector.broadcast %508 : f32 to vector<2x256xf32>
    %511 = arith.mulf %510, %128 : vector<2x256xf32>
    %512 = arith.addf %507, %511 : vector<2x256xf32>
    %513 = vector.broadcast %509 : f32 to vector<2x256xf32>
    %514 = arith.mulf %513, %133 : vector<2x256xf32>
    %515 = arith.addf %512, %514 : vector<2x256xf32>
    %c40 = arith.constant 40 : index
    %516 = memref.load %arg4[%c40] : memref<98xf32, #tpu.memory_space<smem>>
    %c89 = arith.constant 89 : index
    %517 = memref.load %arg4[%c89] : memref<98xf32, #tpu.memory_space<smem>>
    %518 = vector.broadcast %516 : f32 to vector<2x256xf32>
    %519 = arith.mulf %518, %147 : vector<2x256xf32>
    %520 = arith.addf %515, %519 : vector<2x256xf32>
    %521 = vector.broadcast %517 : f32 to vector<2x256xf32>
    %522 = arith.mulf %521, %152 : vector<2x256xf32>
    %523 = arith.addf %520, %522 : vector<2x256xf32>
    %c41 = arith.constant 41 : index
    %524 = memref.load %arg4[%c41] : memref<98xf32, #tpu.memory_space<smem>>
    %c90 = arith.constant 90 : index
    %525 = memref.load %arg4[%c90] : memref<98xf32, #tpu.memory_space<smem>>
    %526 = vector.broadcast %524 : f32 to vector<2x256xf32>
    %527 = arith.mulf %526, %166 : vector<2x256xf32>
    %528 = arith.addf %523, %527 : vector<2x256xf32>
    %529 = vector.broadcast %525 : f32 to vector<2x256xf32>
    %530 = arith.mulf %529, %171 : vector<2x256xf32>
    %531 = arith.addf %528, %530 : vector<2x256xf32>
    %cst_61 = arith.constant 0.000000e+00 : f32
    %532 = vector.broadcast %cst_61 : f32 to vector<2x32xf32>
    %533 = vector.extract_strided_slice %531 {offsets = [0, 32], sizes = [2, 224], strides = [1, 1]} : vector<2x256xf32> to vector<2x224xf32>
    %534 = tpu.concatenate %533, %532 in 1 : vector<2x224xf32>, vector<2x32xf32> -> vector<2x256xf32>
    %535 = arith.addf %474, %534 : vector<2x256xf32>
    %cst_62 = arith.constant 0.000000e+00 : f32
    %536 = vector.broadcast %cst_62 : f32 to vector<2x256xf32>
    %c42 = arith.constant 42 : index
    %537 = memref.load %arg4[%c42] : memref<98xf32, #tpu.memory_space<smem>>
    %c91 = arith.constant 91 : index
    %538 = memref.load %arg4[%c91] : memref<98xf32, #tpu.memory_space<smem>>
    %539 = vector.broadcast %537 : f32 to vector<2x256xf32>
    %540 = arith.mulf %539, %58 : vector<2x256xf32>
    %541 = arith.addf %536, %540 : vector<2x256xf32>
    %542 = vector.broadcast %538 : f32 to vector<2x256xf32>
    %543 = arith.mulf %542, %63 : vector<2x256xf32>
    %544 = arith.addf %541, %543 : vector<2x256xf32>
    %c43 = arith.constant 43 : index
    %545 = memref.load %arg4[%c43] : memref<98xf32, #tpu.memory_space<smem>>
    %c92 = arith.constant 92 : index
    %546 = memref.load %arg4[%c92] : memref<98xf32, #tpu.memory_space<smem>>
    %547 = vector.broadcast %545 : f32 to vector<2x256xf32>
    %548 = arith.mulf %547, %77 : vector<2x256xf32>
    %549 = arith.addf %544, %548 : vector<2x256xf32>
    %550 = vector.broadcast %546 : f32 to vector<2x256xf32>
    %551 = arith.mulf %550, %82 : vector<2x256xf32>
    %552 = arith.addf %549, %551 : vector<2x256xf32>
    %c44 = arith.constant 44 : index
    %553 = memref.load %arg4[%c44] : memref<98xf32, #tpu.memory_space<smem>>
    %c93 = arith.constant 93 : index
    %554 = memref.load %arg4[%c93] : memref<98xf32, #tpu.memory_space<smem>>
    %555 = vector.broadcast %553 : f32 to vector<2x256xf32>
    %556 = arith.mulf %555, %96 : vector<2x256xf32>
    %557 = arith.addf %552, %556 : vector<2x256xf32>
    %558 = vector.broadcast %554 : f32 to vector<2x256xf32>
    %559 = arith.mulf %558, %101 : vector<2x256xf32>
    %560 = arith.addf %557, %559 : vector<2x256xf32>
    %c45 = arith.constant 45 : index
    %561 = memref.load %arg4[%c45] : memref<98xf32, #tpu.memory_space<smem>>
    %c94 = arith.constant 94 : index
    %562 = memref.load %arg4[%c94] : memref<98xf32, #tpu.memory_space<smem>>
    %563 = vector.broadcast %561 : f32 to vector<2x256xf32>
    %564 = arith.mulf %563, %112 : vector<2x256xf32>
    %565 = arith.addf %560, %564 : vector<2x256xf32>
    %566 = vector.broadcast %562 : f32 to vector<2x256xf32>
    %567 = arith.mulf %566, %114 : vector<2x256xf32>
    %568 = arith.addf %565, %567 : vector<2x256xf32>
    %c46 = arith.constant 46 : index
    %569 = memref.load %arg4[%c46] : memref<98xf32, #tpu.memory_space<smem>>
    %c95 = arith.constant 95 : index
    %570 = memref.load %arg4[%c95] : memref<98xf32, #tpu.memory_space<smem>>
    %571 = vector.broadcast %569 : f32 to vector<2x256xf32>
    %572 = arith.mulf %571, %128 : vector<2x256xf32>
    %573 = arith.addf %568, %572 : vector<2x256xf32>
    %574 = vector.broadcast %570 : f32 to vector<2x256xf32>
    %575 = arith.mulf %574, %133 : vector<2x256xf32>
    %576 = arith.addf %573, %575 : vector<2x256xf32>
    %c47 = arith.constant 47 : index
    %577 = memref.load %arg4[%c47] : memref<98xf32, #tpu.memory_space<smem>>
    %c96 = arith.constant 96 : index
    %578 = memref.load %arg4[%c96] : memref<98xf32, #tpu.memory_space<smem>>
    %579 = vector.broadcast %577 : f32 to vector<2x256xf32>
    %580 = arith.mulf %579, %147 : vector<2x256xf32>
    %581 = arith.addf %576, %580 : vector<2x256xf32>
    %582 = vector.broadcast %578 : f32 to vector<2x256xf32>
    %583 = arith.mulf %582, %152 : vector<2x256xf32>
    %584 = arith.addf %581, %583 : vector<2x256xf32>
    %c48 = arith.constant 48 : index
    %585 = memref.load %arg4[%c48] : memref<98xf32, #tpu.memory_space<smem>>
    %c97 = arith.constant 97 : index
    %586 = memref.load %arg4[%c97] : memref<98xf32, #tpu.memory_space<smem>>
    %587 = vector.broadcast %585 : f32 to vector<2x256xf32>
    %588 = arith.mulf %587, %166 : vector<2x256xf32>
    %589 = arith.addf %584, %588 : vector<2x256xf32>
    %590 = vector.broadcast %586 : f32 to vector<2x256xf32>
    %591 = arith.mulf %590, %171 : vector<2x256xf32>
    %592 = arith.addf %589, %591 : vector<2x256xf32>
    %cst_63 = arith.constant 0.000000e+00 : f32
    %593 = vector.broadcast %cst_63 : f32 to vector<2x48xf32>
    %594 = vector.extract_strided_slice %592 {offsets = [0, 48], sizes = [2, 208], strides = [1, 1]} : vector<2x256xf32> to vector<2x208xf32>
    %595 = tpu.concatenate %594, %593 in 1 : vector<2x208xf32>, vector<2x48xf32> -> vector<2x256xf32>
    %596 = arith.addf %535, %595 : vector<2x256xf32>
    %cst_64 = arith.constant 0.000000e+00 : f32
    %597 = vector.broadcast %cst_64 : f32 to vector<2x256xf32>
    %598 = arith.subf %597, %596 : vector<2x256xf32>
    %599 = math.exp %598 : vector<2x256xf32>
    %cst_65 = arith.constant 1.000000e+00 : f32
    %600 = vector.broadcast %cst_65 : f32 to vector<2x256xf32>
    %601 = arith.addf %600, %599 : vector<2x256xf32>
    %602 = tpu.reciprocal %601 {approx = true} : vector<2x256xf32> -> vector<2x256xf32>
    %603 = vector.shape_cast %602 : vector<2x256xf32> to vector<2x1x256xf32>
    %604 = vector.broadcast %603 : vector<2x1x256xf32> to vector<2x32x256xf32>
    %605 = arith.mulf %23, %604 : vector<2x32x256xf32>
    %c0_66 = arith.constant 0 : index
    %c0_67 = arith.constant 0 : index
    %c0_68 = arith.constant 0 : index
    %606 = vector.load %arg5[%c0_66, %c0_67, %c0_68] : memref<2x32x256xf32, #tpu.memory_space<vmem>>, vector<2x32x256xf32>
    tpu.vector_store %arg5[%c0_66, %c0_67, %c0_68], %605 {strides = array<i32>} : memref<2x32x256xf32, #tpu.memory_space<vmem>>, vector<2x32x256xf32>,
    return
  }
  func.func @transform_0(%arg0: i32) -> (i32, i32, i32) {
    %c0_i32 = arith.constant 0 : i32
    %c0_i32_0 = arith.constant 0 : i32
    %c0_i32_1 = arith.constant 0 : i32
    return %arg0, %c0_i32, %c0_i32_0 : i32, i32, i32
  }
  func.func @transform_1(%arg0: i32) -> (i32, i32) {
    %c0_i32 = arith.constant 0 : i32
    %c0_i32_0 = arith.constant 0 : i32
    %c0_i32_1 = arith.constant 0 : i32
    return %c0_i32, %c0_i32_0 : i32, i32
  }
  func.func @transform_2(%arg0: i32) -> (i32, i32) {
    %c0_i32 = arith.constant 0 : i32
    %c0_i32_0 = arith.constant 0 : i32
    %c0_i32_1 = arith.constant 0 : i32
    return %c0_i32, %c0_i32_0 : i32, i32
  }
  func.func @transform_3(%arg0: i32) -> i32 {
    %c0_i32 = arith.constant 0 : i32
    %c0_i32_0 = arith.constant 0 : i32
    return %c0_i32 : i32
  }
  func.func @transform_4(%arg0: i32) -> (i32, i32, i32) {
    %c0_i32 = arith.constant 0 : i32
    %c0_i32_0 = arith.constant 0 : i32
    %c0_i32_1 = arith.constant 0 : i32
    return %arg0, %c0_i32, %c0_i32_0 : i32, i32, i32
  }
}

</mosaic_0001>

<bundles_post_ra>
// kernel: tpu_custom_call.1
= control target key start
LH: loop header
LB: loop body
LE: loop exit
PB: predicated region body
PF: predicated region fallthrough
CT: control target
= control target key end

     0   :  { %s3599_s0 = inlined_call_operand.hbm [shape: f32[2,32,256], index: 0, kind: input, shape index: {}]   ;;  %s3600_s1 = inlined_call_operand.vmem [shape: f32[32,8], index: 1, kind: input, shape index: {}]   ;;  %s3601_s2 = inlined_call_operand.vmem [shape: f32[8,32], index: 2, kind: input, shape index: {}]   ;;  %s3602_s3 = inlined_call_operand.vmem [shape: f32[98], index: 3, kind: input, shape index: {}]   ;;  %s3603_s4 = inlined_call_operand.hbm [shape: f32[2,32,256], index: 4, kind: output, shape index: {}]  }
   0x1   :  { %3741 = sst [smem:[#allocation145_spill]] %s3603_s4 }
   0x2   :  { %9 = vsyncpa [#allocation3], 0 }
   0x3   :  { %10 = vsyncpa [#allocation5], 0 }
   0x4   :  { %11 = vsyncpa [#allocation4], 0  ;;  %s2017_s15 = smov [#allocation2]   ;;  %s34_s19 = sshll.u32 %s3602_s3, 4  ;;  %s35_s19 = int_to_ptr.vmem [resolvable:$true] %s34_s19 }
   0x5   :  { %s17_s16 = sshll.u32 %s2017_s15, 4  ;;  %s18_s16 = int_to_ptr.vmem [resolvable:$true] %s17_s16 }
   0x6   :  { %s1967_s20 = scalar_lea.vmem %s18_s16, 2048  ;;  %p1972_p1 = scmp.lt.s32.totalorder %s18_s16, %s18_s16 }
   0x7   :  { %p1968_p0 = scmp.ne.s32.totalorder %s18_s16, %s1967_s20  ;;  %p1973_p2 = scmp.lt.s32.totalorder %s1967_s20, %s1967_s20 }
   0x9   :  { %p1974_p3 = por %p1973_p2, %p1972_p1 }
   0xb   :  { %p1975_p4 = pnand %p1974_p3, %p1968_p0 }
   0xd   :  { %1978 = shalt.err (!%p1975_p4)
}
   0xe   :  { %s3609_s21 = smov 256   ;;  %s3610_s22 = smov 16  }
   0xf   :  { %23 = dma.hbm_to_vmem [thread:$0]  %s3599_s0, 2048, %s18_s16, [#allocation3], %s3609_s21, %s3609_s21, %s3610_s22  }
  0x10   :  { %s1979_s25 = scalar_lea.vmem %s35_s19, 16  ;;  %p1984_p6 = scmp.lt.s32.totalorder %s35_s19, %s35_s19 }
  0x11   :  { %p1980_p5 = scmp.ne.s32.totalorder %s35_s19, %s1979_s25  ;;  %p1985_p7 = scmp.lt.s32.totalorder %s1979_s25, %s1979_s25 }
  0x13   :  { %p1986_p8 = por %p1985_p7, %p1984_p6 }
  0x15   :  { %p1987_p9 = pnand %p1986_p8, %p1980_p5 }
  0x17   :  { %1990 = shalt.err (!%p1987_p9)
}
  0x18   :  { %s2020_s3 = smov [#allocation6]  }
  0x19   :  { %37 = dma.vmem_to_smem %s35_s19, 16, %s2020_s3, [#allocation5]  }
  0x1a   :  { %2011 = dma.done.wait [#allocation3], 2048  }
  0x1b   :  { %2012 = vsyncadd [#allocation3], 4294965248 }
  0x1c   :  { %2013 = dma.done.wait [#allocation5], 16  }
  0x1d   :  { %2014 = vsyncadd [#allocation5], 4294967280 }
  0x1e   :  { %44 = sfence }
  0x1f   :  { %v2070_v0 = vld [vmem:[#allocation2 + $0x40] sm:$0xff]  ;;  %v2072_v1 = vld [vmem:[#allocation2 + $0x48] sm:$0xff]  ;;  %v2080_v5 = vld [vmem:[#allocation2 + $0x50] sm:$0xff]  ;;  %v3604_v30 = vmov 0.0   ;;  %vm2022_vm0 = vmmov 0   ;;  %v131_v37 = vlaneseq  ;;  %vm142_vm1 = vcmask 130112  }
  0x20   :  { %v2074_v2 = vld [vmem:[#allocation2] sm:$0xff]  ;;  %v73_v3 = vadd.f32 %v2072_v1, %v2070_v0  ;;  %v2078_v4 = vld [vmem:[#allocation2 + $0x8] sm:$0xff]  ;;  %v2082_v6 = vld [vmem:[#allocation2 + $0x58] sm:$0xff]  ;;  %v106_v27 = vmax.f32 %v2070_v0, %v2072_v1  ;;  %1901 = vmatprep.subr.mxu0 %v3604_v30  ;;  %1912 = vmatprep.subr.mxu1 %v3604_v30  ;;  %vm149_vm2 = vcmask 195712   ;;  %vm156_vm3 = vcmask 261312   ;;  %s1798_s8 = sld [smem:[#allocation6 + $0x34]] }
  0x21   :  { %v61_v7 = vadd.f32 %v2078_v4, %v2074_v2  ;;  %v2086_v8 = vld [vmem:[#allocation2 + $0x10] sm:$0xff]  ;;  %v2088_v9 = vld [vmem:[#allocation2 + $0x18] sm:$0xff]  ;;  %v76_v10 = vadd.f32 %v2082_v6, %v2080_v5  ;;  %v2094_v12 = vld [vmem:[#allocation2 + $0x60] sm:$0xff]  ;;  %v94_v25 = vmax.f32 %v2074_v2, %v2078_v4  ;;  %v109_v26 = vmax.f32 %v2080_v5, %v2082_v6  ;;  %1909 = vmatprep.mubr.msk.f32.mxu0 %vm2022_vm0, %v3604_v30  ;;  %s2023_s9 = smov 3   ;;  %s1811_s10 = sld [smem:[#allocation6 + $0xa]] }
  0x22   :  { %74 = vadd.xlane.f32.xlu1 %v73_v3  ;;  %v64_v11 = vadd.f32 %v2088_v9, %v2086_v8  ;;  %v2096_v13 = vld [vmem:[#allocation2 + $0x68] sm:$0xff]  ;;  %v2098_v14 = vld [vmem:[#allocation2 + $0x20] sm:$0xff]  ;;  %v2106_v18 = vld [vmem:[#allocation2 + $0x70] sm:$0xff]  ;;  %v97_v24 = vmax.f32 %v2086_v8, %v2088_v9  ;;  %1920 = vmatprep.mubr.msk.f32.mxu1 %vm2022_vm0, %v3604_v30  ;;  %v2159_v39 = vand.u32 127, %v131_v37  ;;  %v2163_v44 = vshrl.u32 %v131_v37, 7  ;;  %s1812_s11 = sld [smem:[#allocation6 + $0x3b]] }
  0x23   :  { %62 = vadd.xlane.f32.xlu0 %v61_v7  ;;  %v2100_v15 = vld [vmem:[#allocation2 + $0x28] sm:$0xff]  ;;  %v79_v16 = vadd.f32 %v2096_v13, %v2094_v12  ;;  %v2108_v19 = vld [vmem:[#allocation2 + $0x78] sm:$0xff]  ;;  %v2110_v20 = vld [vmem:[#allocation2 + $0x30] sm:$0xff]  ;;  %v112_v28 = vmax.f32 %v2094_v12, %v2096_v13  ;;  %vm177_vm4 = vcmask 1041409   ;;  %vm179_vm5 = vcmask 261120   ;;  %s2024_s12 = smov 2  }
  0x24   :  { %v67_v17 = vadd.f32 %v2100_v15, %v2098_v14  ;;  %v2112_v21 = vld [vmem:[#allocation2 + $0x38] sm:$0xff]  ;;  %v82_v22 = vadd.f32 %v2108_v19, %v2106_v18  ;;  %v100_v29 = vmax.f32 %v2098_v14, %v2100_v15  ;;  %v120_v32 = vld [vmem:[%s3600_s1 + $0x10] sm:$0xff]  ;;  %v115_v33 = vmax.f32 %v2106_v18, %v2108_v19  ;;  %v119_v35 = vld [vmem:[%s3600_s1 + $0x8] sm:$0xff]  ;;  %3742 = vst [vmem:[#allocation11_spill] sm:$0xff] %v2163_v44  ;;  %s2025_s13 = smov 1   ;;  %s2324_s14 = sld [smem:[#allocation6 + $0x11]] }
  0x25   :  { %v70_v23 = vadd.f32 %v2112_v21, %v2110_v20  ;;  %v121_v31 = vld [vmem:[%s3600_s1 + $0x18] sm:$0xff]  ;;  %v103_v34 = vmax.f32 %v2110_v20, %v2112_v21  ;;  %v118_v36 = vld [vmem:[%s3600_s1] sm:$0xff]  ;;  %v137_v41 = vadd.s32 4294967288, %v2159_v39  ;;  %v144_v43 = vadd.s32 4294967280, %v2159_v39  ;;  %s2331_s15 = sld [smem:[#allocation6 + $0x42]]  ;;  %s2026_s16 = smov 127  }
  0x26   :  { %77 = vadd.xlane.f32.xlu1 %v76_v10  ;;  %1902 = vmatpush3.msra.mxu0 %v121_v31  ;;  %v151_v48 = vadd.s32 4294967272, %v2159_v39  ;;  %v135_v52 = vsub.s32 %v2159_v39, %v2163_v44  ;;  %vm374_vm6 = vcmask 64512   ;;  %s1853_s17 = sld [smem:[#allocation6 + $0x1f]]  ;;  %s2027_s25 = smov 126  }
  0x27   :  { %65 = vadd.xlane.f32.xlu0 %v64_v11  ;;  %1903 = vmatprep.subr.mxu0 %v3604_v30  ;;  %v140_v46 = vsub.s32 %v137_v41, %v2163_v44  ;;  %v147_v50 = vsub.s32 %v144_v43, %v2163_v44  ;;  %s1854_s18 = sld [smem:[#allocation6 + $0x50]]  ;;  %s2028_s29 = smov 125  }
  0x28   :  { %1913 = vmatpush3.msra.mxu1 %v121_v31  ;;  %1904 = vmatpush3.msra.mxu0 %v120_v32  ;;  %v154_v59 = vsub.s32 %v151_v48, %v2163_v44  ;;  %s1867_s19 = sld [smem:[#allocation6 + $0x26]] }
  0x29   :  { %1905 = vmatprep.subr.mxu0 %v3604_v30  ;;  %1914 = vmatprep.subr.mxu1 %v3604_v30  ;;  %s1868_s20 = sld [smem:[#allocation6 + $0x57]] }
  0x2a   :  { %80 = vadd.xlane.f32.xlu1 %v79_v16  ;;  %1906 = vmatpush3.msra.mxu0 %v119_v35  ;;  %s2412_s23 = sld [smem:[#allocation6 + $0x2d]] }
  0x2b   :  { %68 = vadd.xlane.f32.xlu0 %v67_v17  ;;  %1907 = vmatprep.subr.mxu0 %v3604_v30  ;;  %s2415_s24 = sld [smem:[#allocation6 + $0x5e]] }
  0x2c   :  { %1915 = vmatpush3.msra.mxu1 %v120_v32  ;;  %1908 = vmatpush3.msra.mxu0 %v118_v36  ;;  %s2441_s3 = sld [smem:[#allocation6 + $0x18]] }
  0x2d   :  { %1916 = vmatprep.subr.mxu1 %v3604_v30  ;;  %1923 = vmatprep.subr.mxu0 %v3604_v30  ;;  %s2450_s0 = sld [smem:[#allocation6 + $0x49]] }
  0x2e   :  { %83 = vadd.xlane.f32.xlu1 %v82_v22  ;;  %1917 = vmatpush3.msra.mxu1 %v119_v35  ;;  %s2467_s26 = sld [smem:[#allocation6 + $0x31]] }
  0x2f   :  { %71 = vadd.xlane.f32.xlu0 %v70_v23  ;;  %1918 = vmatprep.subr.mxu1 %v3604_v30  ;;  %s2471_s27 = sld [smem:[#allocation6 + $0x38]] }
  0x30   :  { %1919 = vmatpush3.msra.mxu1 %v118_v36  ;;  %s2477_s28 = sld [smem:[#allocation6 + $0x3f]] }
  0x31   :  { %s2488_s30 = sld [smem:[#allocation6 + $0x46]] }
  0x32   :  { %98 = vmax.xlane.f32.xlu1 %v97_v24  ;;  %s2493_s5 = sld [smem:[#allocation6 + $0x4d]] }
  0x33   :  { %95 = vmax.xlane.f32.xlu0 %v94_v25  ;;  %s2499_s6 = sld [smem:[#allocation6 + $0x54]] }
  0x34   :  { %3771 = sst [smem:[#allocation40_spill]] %s2467_s26 }
  0x35   :  { %3772 = sst [smem:[#allocation41_spill]] %s2471_s27 }
  0x36   :  { %110 = vmax.xlane.f32.xlu1 %v109_v26  ;;  %3774 = sst [smem:[#allocation43_spill]] %s2477_s28 }
  0x37   :  { %107 = vmax.xlane.f32.xlu0 %v106_v27  ;;  %3777 = sst [smem:[#allocation46_spill]] %s2488_s30 }
  0x38   :  { %3778 = sst [smem:[#allocation47_spill]] %s2493_s5 }
  0x39   :  { %3780 = sst [smem:[#allocation49_spill]] %s2499_s6 }
  0x3a   :  { %113 = vmax.xlane.f32.xlu1 %v112_v28  ;;  %s2506_s1 = sld [smem:[#allocation6 + $0x5b]] }
  0x3b   :  { %101 = vmax.xlane.f32.xlu0 %v100_v29  ;;  %s2512_s7 = sld [smem:[#allocation6 + $0x47]] }
  0x3c   :  { %s2574_s21 = sld [smem:[#allocation6 + $0x40]] }
  0x3d   :  { %s2576_s22 = sld [smem:[#allocation6 + $0x41]] }
  0x3e   :  { %116 = vmax.xlane.f32.xlu1 %v115_v33  ;;  %s2578_s4 = sld [smem:[#allocation6 + $0x4e]] }
  0x3f   :  { %104 = vmax.xlane.f32.xlu0 %v103_v34  ;;  %s2661_s26 = sld [smem:[#allocation6 + $0x59]] }
  0x40   :  { %3782 = sst [smem:[#allocation51_spill]] %s2506_s1 }
  0x41   :  { %3783 = sst [smem:[#allocation52_spill]] %s2512_s7 }
  0x42   :  { %3809 = sst [smem:[#allocation78_spill]] %s2574_s21 }
  0x43   :  { %3810 = sst [smem:[#allocation79_spill]] %s2576_s22 }
  0x44   :  { %3811 = sst [smem:[#allocation80_spill]] %s2578_s4 }
  0x45   :  { %s2596_s21 = sld [smem:[#allocation6 + $0x3d]] }
  0x46   :  { %s2598_s22 = sld [smem:[#allocation6 + $0x6]] }
  0x47   :  { %s2600_s4 = sld [smem:[#allocation6 + $0x37]] }
  0x48   :  { %3839 = sst [smem:[#allocation107_spill]] %s2661_s26 }
  0x49   :  { %s2665_s30 = sld [smem:[#allocation6 + $0x22]] }
  0x4a   :  { %s2679_s7 = sld [smem:[#allocation6 + $0x27]] }
  0x4b   :  { %3820 = sst [smem:[#allocation89_spill]] %s2596_s21 }
  0x4c   :  { %3821 = sst [smem:[#allocation90_spill]] %s2598_s22 }
  0x4d   :  { %3822 = sst [smem:[#allocation91_spill]] %s2600_s4 }
  0x4e   :  { %s2616_s21 = sld [smem:[#allocation6 + $0xd]] }
  0x4f   :  { %s2618_s22 = sld [smem:[#allocation6 + $0x3e]] }
  0x50   :  { %s2620_s4 = sld [smem:[#allocation6 + $0x12]] }
  0x51   :  { %3840 = sst [smem:[#allocation108_spill]] %s2679_s7 }
  0x52   :  { %s2686_s1 = sld [smem:[#allocation6 + $0x5d]] }
  0x53   :  { %s2694_s5 = sld [smem:[#allocation6 + $0x53]] }
  0x54   :  { %3828 = sst [smem:[#allocation97_spill]] %s2616_s21 }
  0x55   :  { %3829 = sst [smem:[#allocation98_spill]] %s2618_s22 }
  0x56   :  { %3830 = sst [smem:[#allocation99_spill]] %s2620_s4 }
  0x57   :  { %s2633_s4 = sld [smem:[#allocation6 + $0x5c]] }
  0x58   :  { %3841 = sst [smem:[#allocation109_spill]] %s2686_s1 }
  0x59   :  { %3843 = sst [smem:[#allocation110_spill]] %s2694_s5 }
  0x5a   :  { %s2704_s1 = sld [smem:[#allocation6 + $0x5f]] }
  0x5b   :  { %s2709_s5 = sld [smem:[#allocation6 + $0x29]] }
  0x5c   :  { %s2726_s27 = sld [smem:[#allocation6 + $0x5a]] }
  0x5d   :  { %3835 = sst [smem:[#allocation104_spill]] %s2633_s4 }
  0x5e   :  { %s2646_s4 = sld [smem:[#allocation6 + $0x25]] }
  0x5f   :  { %s2761_s6 = sld [smem:[#allocation6 + $0x30]] }
  0x60   :  { %3850 = sst [smem:[#allocation112_spill]] %s2704_s1 }
  0x61   :  { %3854 = sst [smem:[#allocation113_spill]] %s2709_s5 }
  0x62   :  { %s2773_s1 = sld [smem:[#allocation6 + $0x17]] }
  0x63   :  { %s3880_s7 = sld [smem:[#allocation110_spill]] }
  0x64   :  { %s3881_s21 = sld [smem:[#allocation108_spill]] }
  0x65   :  { %s3888_s26 = sld [smem:[#allocation41_spill]] }
  0xab   :  { %v75_v38 = vpop.xlane.xlu1 %74 }
  0xac   :  { %v63_v40 = vpop.xlane.xlu0 %62  ;;  %v90_v53 = vmul.f32 0.00390625, %v75_v38 }
  0xad   :  { %v86_v56 = vmul.f32 0.00390625, %v63_v40 }
  0xae   :  { %v161_v63 = vrot.slane %v90_v53, %v135_v52 }
  0xaf   :  { %v78_v42 = vpop.xlane.xlu1 %77  ;;  %v136_v11 = vrot.slane %v86_v56, %v135_v52 }
  0xb0   :  { %v66_v45 = vpop.xlane.xlu0 %65  ;;  %v91_v47 = vmul.f32 0.00390625, %v78_v42 }
  0xb1   :  { %v87_v49 = vmul.f32 0.00390625, %v66_v45 }
  0xb2   :  { %v165_v58 = vrot.slane %v91_v47, %v140_v46 }
  0xb3   :  { %v81_v51 = vpop.xlane.xlu1 %80  ;;  %v141_v60 = vrot.slane %v87_v49, %v140_v46 }
  0xb4   :  { %v92_v54 = vmul.f32 0.00390625, %v81_v51  ;;  %v69_v55 = vpop.xlane.xlu0 %68  ;;  %v166_v17 = vsel %vm142_vm1, %v165_v58, %v161_v63 }
  0xb5   :  { %v88_v57 = vmul.f32 0.00390625, %v69_v55  ;;  %v143_v23 = vsel %vm142_vm1, %v141_v60, %v136_v11 }
  0xb6   :  { %v170_v61 = vrot.slane %v92_v54, %v147_v50 }
  0xb7   :  { %v84_v62 = vpop.xlane.xlu1 %83  ;;  %v148_v3 = vrot.slane %v88_v57, %v147_v50 }
  0xb8   :  { %v93_v7 = vmul.f32 0.00390625, %v84_v62  ;;  %v72_v10 = vpop.xlane.xlu0 %71  ;;  %v171_v24 = vsel %vm149_vm2, %v170_v61, %v166_v17 }
  0xb9   :  { %v89_v16 = vmul.f32 0.00390625, %v72_v10  ;;  %v150_v27 = vsel %vm149_vm2, %v148_v3, %v143_v23 }
  0xba   :  { %v175_v22 = vrot.slane %v93_v7, %v154_v59 }
  0xbb   :  { %v155_v25 = vrot.slane %v89_v16, %v154_v59  ;;  %v99_v26 = vpop.xlane.xlu1 %98 }
  0xbc   :  { %v96_v28 = vpop.xlane.xlu0 %95  ;;  %v176_v29 = vsel %vm156_vm3, %v175_v22, %v171_v24  ;;  %v268_v40 = vrot.slane %v99_v26, %v140_v46  ;;  %v2193_v22 = vsub.s32 0, %v2163_v44 }
  0xbd   :  { %v157_v31 = vsel %vm156_vm3, %v155_v25, %v150_v27  ;;  %v264_v41 = vrot.slane %v96_v28, %v135_v52  ;;  %v2197_v25 = vsub.s32 1, %v2163_v44 }
  0xbe   :  { %v178_v32 = vsel %vm177_vm4, %v176_v29, %v157_v31  ;;  %3743 = vst [vmem:[#allocation12_spill] sm:$0xff] %v2193_v22 }
  0xbf   :  { %1910 = vmatmul.mubr.msk.f32.vlgmr.msra.gmra.mxu0 %vm179_vm5, %v178_v32  ;;  %v111_v33 = vpop.xlane.xlu1 %110  ;;  %v269_v51 = vsel %vm142_vm1, %v268_v40, %v264_v41  ;;  %3744 = vst [vmem:[#allocation13_spill] sm:$0xff] %v2197_v25 }
  0xc0   :  { %v108_v34 = vpop.xlane.xlu0 %107  ;;  %1925 = vmatprep.mubr.msk.f32.mxu0 %vm2022_vm0, %v3604_v30  ;;  %v287_v36 = vrot.slane %v111_v33, %v140_v46 }
  0xc1   :  { %v283_v37 = vrot.slane %v108_v34, %v135_v52 }
  0xc3   :  { %v114_v35 = vpop.xlane.xlu1 %113  ;;  %v288_v47 = vsel %vm142_vm1, %v287_v36, %v283_v37  ;;  %vm631_vm1 = vcmask 23552  }
  0xc4   :  { %v102_v38 = vpop.xlane.xlu0 %101  ;;  %v292_v42 = vrot.slane %v114_v35, %v147_v50 }
  0xc5   :  { %v273_v43 = vrot.slane %v102_v38, %v147_v50  ;;  %v122_v50 = vld [vmem:[%s3601_s2] sm:$0xff]  ;;  %s1797_s2 = sld [smem:[#allocation6 + $0x3]] }
  0xc6   :  { %v293_v53 = vsel %vm149_vm2, %v292_v42, %v288_v47  ;;  %1924 = vmatpush3.msra.mxu0 %v122_v50 }
  0xc7   :  { %v117_v45 = vpop.xlane.xlu1 %116  ;;  %v274_v55 = vsel %vm149_vm2, %v273_v43, %v269_v51 }
  0xc8   :  { %v297_v48 = vrot.slane %v117_v45, %v154_v59  ;;  %v105_v49 = vpop.xlane.xlu0 %104 }
  0xc9   :  { %v278_v54 = vrot.slane %v105_v49, %v154_v59 }
  0xca   :  { %v298_v56 = vsel %vm156_vm3, %v297_v48, %v293_v53 }
  0xcb   :  { %v279_v57 = vsel %vm156_vm3, %v278_v54, %v274_v55 }
  0xcc   :  { %v299_v46 = vsel %vm177_vm4, %v298_v56, %v279_v57 }
  0xcd   :  { %1921 = vmatmul.mubr.msk.f32.vlgmr.msra.gmra.mxu1 %vm179_vm5, %v299_v46 }
 0x17f   :  { %v248_v52 = vpop.f32.mrf.mxu0 }
 0x180   :  { %v252_v61 = vmax.f32 %v248_v52, 0.0 }
 0x181   :  { %v1911_v58 = vpop.f32.mrf.mxu0 }
 0x18d   :  { %v368_v60 = vpop.f32.mrf.mxu1 }
 0x18e   :  { %v372_v59 = vmax.f32 %v368_v60, 0.0 }
 0x18f   :  { %v1922_v62 = vpop.f32.mrf.mxu1 }
 0x190   :  { %v373_v63 = vadd.f32 %v372_v59, %v252_v61 }
 0x192   :  { %1926 = vmatmul.mubr.msk.f32.vlgmr.msra.gmra.mxu0 %vm374_vm6, %v373_v63  ;;  %vm703_vm6 = vcmask 7168  }
 0x252   :  { %v444_v3 = vpop.f32.mrf.mxu0 }
 0x253   :  { %v448_v7 = vsub.f32 0.0, %v444_v3 }
 0x254   :  { %v1927_v10 = vpop.f32.mrf.mxu0 }
 0x255   :  { %v449_v11 = vmul.f32 1.442695, %v448_v7 }
 0x257   :  { %1947 = vpow2.f32 %v449_v11 }
 0x264   :  { %v1948_v16 = vpop.eup %1947 }
 0x265   :  { %v451_v17 = vadd.f32 1.0, %v1948_v16 }
 0x267   :  { %1949 = vrcp.f32 %v451_v17 }
 0x274   :  { %v1950_v23 = vpop.eup %1949 }
 0x275   :  { %v456_v24 = vrot.slane %v1950_v23, %v2193_v22  ;;  %v475_v26 = vrot.slane %v1950_v23, %v2197_v25 }
 0x277   :  { %462 = vbcast.lane.b32.xlu1 %v456_v24, 264  ;;  %458 = vbcast.lane.b32.xlu0 %v456_v24, 256 }
 0x27b   :  { %477 = vbcast.lane.b32.xlu1 %v475_v26, 256  ;;  %466 = vbcast.lane.b32.xlu0 %v456_v24, 272 }
 0x27f   :  { %481 = vbcast.lane.b32.xlu1 %v475_v26, 264  ;;  %470 = vbcast.lane.b32.xlu0 %v456_v24, 280 }
 0x283   :  { %485 = vbcast.lane.b32.xlu1 %v475_v26, 272 }
 0x287   :  { %489 = vbcast.lane.b32.xlu1 %v475_v26, 280 }
 0x2e9   :  { %v463_v27 = vpop.permute.xlu1 %462  ;;  %v459_v28 = vpop.permute.xlu0 %458 }
 0x2ea   :  { %v2201_v29 = vmul.f32 %v463_v27, %v2086_v8  ;;  %v2204_v31 = vmul.f32 %v459_v28, %v2074_v2  ;;  %v2207_v32 = vmul.f32 %v463_v27, %v2088_v9  ;;  %v2210_v33 = vmul.f32 %v459_v28, %v2078_v4 }
 0x2ec   :  { %3745 = vst [vmem:[#allocation14_spill] sm:$0xff] %v2201_v29  ;;  %3746 = vst [vmem:[#allocation15_spill] sm:$0xff] %v2204_v31  ;;  %v507_v8 = vadd.f32 %v2201_v29, %v2204_v31  ;;  %v516_v2 = vadd.f32 %v2207_v32, %v2210_v33  ;;  %v548_v9 = vmax.f32 %v2204_v31, %v2201_v29 }
 0x2ed   :  { %3747 = vst [vmem:[#allocation16_spill] sm:$0xff] %v2207_v32  ;;  %3748 = vst [vmem:[#allocation17_spill] sm:$0xff] %v2210_v33  ;;  %v478_v34 = vpop.permute.xlu1 %477  ;;  %v467_v35 = vpop.permute.xlu0 %466  ;;  %v557_v4 = vmax.f32 %v2210_v33, %v2207_v32 }
 0x2ee   :  { %v2213_v36 = vmul.f32 %v467_v35, %v2098_v14  ;;  %v2216_v37 = vmul.f32 %v467_v35, %v2100_v15  ;;  %v2243_v49 = vmul.f32 %v478_v34, %v2070_v0 }
 0x2f0   :  { %3749 = vst [vmem:[#allocation18_spill] sm:$0xff] %v2213_v36  ;;  %3750 = vst [vmem:[#allocation19_spill] sm:$0xff] %v2216_v37  ;;  %v508_v14 = vadd.f32 %v507_v8, %v2213_v36  ;;  %v517_v43 = vadd.f32 %v516_v2, %v2216_v37  ;;  %v549_v45 = vmax.f32 %v548_v9, %v2213_v36 }
 0x2f1   :  { %v482_v38 = vpop.permute.xlu1 %481  ;;  %v471_v40 = vpop.permute.xlu0 %470  ;;  %v558_v47 = vmax.f32 %v557_v4, %v2216_v37  ;;  %3755 = vst [vmem:[#allocation24_spill] sm:$0xff] %v2243_v49 }
 0x2f2   :  { %v2228_v41 = vmul.f32 %v482_v38, %v2080_v5  ;;  %v2231_v15 = vmul.f32 %v471_v40, %v2110_v20  ;;  %v2234_v42 = vmul.f32 %v471_v40, %v2112_v21  ;;  %v2240_v48 = vmul.f32 %v482_v38, %v2082_v6 }
 0x2f3   :  { %v2246_v5 = vmul.f32 %v478_v34, %v2072_v1 }
 0x2f4   :  { %3751 = vst [vmem:[#allocation20_spill] sm:$0xff] %v2228_v41  ;;  %3752 = vst [vmem:[#allocation21_spill] sm:$0xff] %v2231_v15  ;;  %v509_v20 = vadd.f32 %v508_v14, %v2231_v15  ;;  %v518_v21 = vadd.f32 %v517_v43, %v2234_v42  ;;  %v550_v51 = vmax.f32 %v549_v45, %v2231_v15 }
 0x2f5   :  { %3753 = vst [vmem:[#allocation22_spill] sm:$0xff] %v2234_v42  ;;  %3754 = vst [vmem:[#allocation23_spill] sm:$0xff] %v2240_v48  ;;  %v559_v53 = vmax.f32 %v558_v47, %v2234_v42  ;;  %v486_v54 = vpop.permute.xlu1 %485  ;;  %v525_v55 = vadd.f32 %v2228_v41, %v2243_v49  ;;  %v534_v1 = vadd.f32 %v2240_v48, %v2246_v5 }
 0x2f6   :  { %3756 = vst [vmem:[#allocation25_spill] sm:$0xff] %v2246_v5  ;;  %v2255_v6 = vmul.f32 %v486_v54, %v2094_v12  ;;  %v2258_v0 = vmul.f32 %v486_v54, %v2096_v13  ;;  %v519_v56 = vrot.slane %v518_v21, 4  ;;  %v551_v57 = vrot.slane %v550_v51, 4 }
 0x2f7   :  { %v560_v46 = vrot.slane %v559_v53, 4  ;;  %v566_v50 = vmax.f32 %v2243_v49, %v2228_v41  ;;  %v575_v52 = vmax.f32 %v2246_v5, %v2240_v48  ;;  %v510_v58 = vrot.slane %v509_v20, 4 }
 0x2f8   :  { %3757 = vst [vmem:[#allocation26_spill] sm:$0xff] %v2255_v6  ;;  %3758 = vst [vmem:[#allocation27_spill] sm:$0xff] %v2258_v0  ;;  %v552_v60 = vmax.f32 %v550_v51, %v551_v57  ;;  %v526_v12 = vadd.f32 %v525_v55, %v2255_v6  ;;  %v535_v13 = vadd.f32 %v534_v1, %v2258_v0  ;;  %v3895_v49 = vstv %s3888_s26 }
 0x2f9   :  { %v561_v61 = vmax.f32 %v559_v53, %v560_v46  ;;  %v490_v59 = vpop.permute.xlu1 %489  ;;  %v567_v62 = vmax.f32 %v566_v50, %v2255_v6  ;;  %v576_v63 = vmax.f32 %v575_v52, %v2258_v0  ;;  %v520_v10 = vadd.f32 %v519_v56, %v518_v21 }
 0x2fa   :  { %v2271_v3 = vmul.f32 %v490_v59, %v2106_v18  ;;  %v2274_v7 = vmul.f32 %v490_v59, %v2108_v19  ;;  %v553_v11 = vrot.slane %v552_v60, 2  ;;  %v511_v27 = vadd.f32 %v510_v58, %v509_v20 }
 0x2fb   :  { %v562_v16 = vrot.slane %v561_v61, 2  ;;  %v521_v8 = vrot.slane %v520_v10, 2 }
 0x2fc   :  { %3759 = vst [vmem:[#allocation28_spill] sm:$0xff] %v2271_v3  ;;  %3760 = vst [vmem:[#allocation29_spill] sm:$0xff] %v2274_v7  ;;  %v527_v17 = vadd.f32 %v526_v12, %v2271_v3  ;;  %v536_v23 = vadd.f32 %v535_v13, %v2274_v7  ;;  %v568_v24 = vmax.f32 %v567_v62, %v2271_v3  ;;  %v512_v14 = vrot.slane %v511_v27, 2 }
 0x2fd   :  { %v577_v26 = vmax.f32 %v576_v63, %v2274_v7  ;;  %v554_v2 = vmax.f32 %v552_v60, %v553_v11  ;;  %v563_v19 = vmax.f32 %v561_v61, %v562_v16  ;;  %v522_v51 = vadd.f32 %v521_v8, %v520_v10 }
 0x2fe   :  { %v528_v28 = vrot.slane %v527_v17, 4  ;;  %v537_v34 = vrot.slane %v536_v23, 4  ;;  %v569_v35 = vrot.slane %v568_v24, 4  ;;  %v513_v57 = vadd.f32 %v512_v14, %v511_v27 }
 0x2ff   :  { %v578_v18 = vrot.slane %v577_v26, 4  ;;  %v555_v53 = vrot.slane %v554_v2, 1  ;;  %v564_v54 = vrot.slane %v563_v19, 1  ;;  %v523_v58 = vrot.slane %v522_v51, 1 }
 0x300   :  { %v529_v9 = vadd.f32 %v528_v28, %v527_v17  ;;  %v538_v4 = vadd.f32 %v537_v34, %v536_v23  ;;  %v570_v38 = vmax.f32 %v568_v24, %v569_v35  ;;  %v514_v62 = vrot.slane %v513_v57, 1 }
 0x301   :  { %v579_v40 = vmax.f32 %v577_v26, %v578_v18  ;;  %v2280_v61 = vmax.f32 %v554_v2, %v555_v53  ;;  %v2282_v12 = vmax.f32 %v563_v19, %v564_v54  ;;  %v524_v16 = vadd.f32 %v523_v58, %v522_v51 }
 0x302   :  { %v530_v43 = vrot.slane %v529_v9, 2  ;;  %v539_v45 = vrot.slane %v538_v4, 2  ;;  %v571_v47 = vrot.slane %v570_v38, 2  ;;  %v515_v23 = vadd.f32 %v514_v62, %v513_v57 }
 0x303   :  { %v580_v21 = vrot.slane %v579_v40, 2  ;;  %v2304_v26 = vmul.f32 0.03125, %v524_v16  ;;  %v875_v28 = vstv %s1797_s2  ;;  %v892_v18 = vstv %s1798_s8  ;;  %s2518_s2 = sld [smem:[#allocation6 + $0x32]] }
 0x304   :  { %v531_v20 = vadd.f32 %v530_v43, %v529_v9  ;;  %v540_v55 = vadd.f32 %v539_v45, %v538_v4  ;;  %v572_v1 = vmax.f32 %v570_v38, %v571_v47  ;;  %v2312_v34 = vmul.f32 0.03125, %v515_v23  ;;  %s2525_s8 = sld [smem:[#allocation6 + $0x33]] }
 0x305   :  { %v581_v56 = vmax.f32 %v579_v40, %v580_v21  ;;  %v877_v2 = vmul.f32 %v875_v28, %v2304_v26  ;;  %v894_v4 = vmul.f32 %v892_v18, %v2282_v12  ;;  %v996_v14 = vstv %s1811_s10  ;;  %s2534_s10 = sld [smem:[#allocation6 + $0x7]] }
 0x306   :  { %v541_v46 = vrot.slane %v540_v55, 1  ;;  %v573_v50 = vrot.slane %v572_v1, 1  ;;  %v532_v60 = vrot.slane %v531_v20, 1  ;;  %v876_v45 = vmul.f32 %v875_v28, %v2312_v34 }
 0x307   :  { %v582_v52 = vrot.slane %v581_v56, 1  ;;  %v893_v53 = vmul.f32 %v892_v18, %v2280_v61  ;;  %v997_v16 = vmul.f32 %v996_v14, %v2312_v34 }
 0x308   :  { %v2284_v13 = vmax.f32 %v572_v1, %v573_v50  ;;  %v542_v63 = vadd.f32 %v541_v46, %v540_v55  ;;  %v533_v17 = vadd.f32 %v532_v60, %v531_v20  ;;  %v1013_v20 = vstv %s1812_s11  ;;  %s2539_s11 = sld [smem:[#allocation6 + $0xe]] }
 0x309   :  { %v2286_v59 = vmax.f32 %v581_v56, %v582_v52  ;;  %v998_v1 = vmul.f32 %v996_v14, %v2304_v26  ;;  %v1015_v58 = vmul.f32 %v1013_v20, %v2282_v12  ;;  %3785 = sst [smem:[#allocation54_spill]] %s2518_s2 }
 0x30a   :  { %v2296_v11 = vsel %vm177_vm4, %v2284_v13, %v2280_v61  ;;  %v2302_v24 = vmul.f32 0.03125, %v542_v63  ;;  %v2306_v27 = vmul.f32 0.03125, %v533_v17  ;;  %v895_v40 = vmul.f32 %v892_v18, %v2284_v13  ;;  %3787 = sst [smem:[#allocation56_spill]] %s2525_s8 }
 0x30b   :  { %v2291_v10 = vsel %vm177_vm4, %v2286_v59, %v2282_v12  ;;  %644 = vrot.lane.b32.xlu0 %v2296_v11, %s2023_s9  ;;  %v896_v8 = vmul.f32 %v892_v18, %v2286_v59  ;;  %v1017_v57 = vmul.f32 %v1013_v20, %v2286_v59  ;;  %v1116_v18 = vstv %s2324_s14  ;;  %3790 = sst [smem:[#allocation59_spill]] %s2534_s10 }
 0x30c   :  { %646 = vrot.lane.b32.xlu1 %v2291_v10, %s2023_s9  ;;  %v879_v35 = vmul.f32 %v875_v28, %v2302_v24  ;;  %v878_v9 = vmul.f32 %v875_v28, %v2306_v27  ;;  %v1000_v21 = vmul.f32 %v996_v14, %v2302_v24  ;;  %v901_v54 = vrot.slane %v895_v40, 7  ;;  %s2548_s14 = sld [smem:[#allocation6 + $0x23]] }
 0x30d   :  { %v903_v38 = vrot.slane %v896_v8, 7  ;;  %v999_v50 = vmul.f32 %v996_v14, %v2306_v27  ;;  %v1024_v60 = vrot.slane %v1017_v57, 7  ;;  %v2357_v62 = vsel %vm177_vm4, %v2302_v24, %v2304_v26  ;;  %s2698_s8 = sld [smem:[#allocation6 + $0x28]] }
 0x30e   :  { %v886_v19 = vrot.slane %v879_v35, 7  ;;  %v884_v47 = vrot.slane %v878_v9, 7  ;;  %v1007_v56 = vrot.slane %v1000_v21, 7  ;;  %v2347_v46 = vsel %vm177_vm4, %v901_v54, %v893_v53  ;;  %3792 = sst [smem:[#allocation61_spill]] %s2539_s11 }
 0x30f   :  { %677 = vrot.lane.b32.xlu0 %v2296_v11, %s2024_s12  ;;  %v2334_v51 = vsel %vm177_vm4, %v903_v38, %v894_v4  ;;  %v2362_v63 = vsel %vm177_vm4, %v2306_v27, %v2312_v34  ;;  %v1005_v17 = vrot.slane %v999_v50, 7  ;;  %v2370_v23 = vsel %vm177_vm4, %v1024_v60, %v1015_v58  ;;  %s3865_s2 = sld [smem:[#allocation90_spill]] }
 0x310   :  { %679 = vrot.lane.b32.xlu1 %v2291_v10, %s2024_s12  ;;  %v2327_v43 = vsel %vm177_vm4, %v886_v19, %v877_v2  ;;  %v2342_v55 = vsel %vm177_vm4, %v884_v47, %v876_v45  ;;  %v2351_v52 = vsel %vm177_vm4, %v1007_v56, %v998_v1  ;;  %v1016_v28 = vmul.f32 %v1013_v20, %v2284_v13  ;;  %3875 = sst [smem:[#allocation90_spill]] %s2761_s6 }
 0x311   :  { %v2374_v35 = vsel %vm177_vm4, %v1005_v17, %v997_v16  ;;  %v1014_v8 = vmul.f32 %v1013_v20, %v2280_v61  ;;  %v1120_v19 = vmul.f32 %v1116_v18, %v2302_v24  ;;  %v1133_v9 = vstv %s2331_s15  ;;  %s2550_s15 = sld [smem:[#allocation6 + $0x2a]] }
 0x312   :  { %v1022_v2 = vrot.slane %v1016_v28, 7  ;;  %v1137_v4 = vmul.f32 %v1133_v9, %v2286_v59  ;;  %v1118_v40 = vmul.f32 %v1116_v18, %v2304_v26  ;;  %v1135_v45 = vmul.f32 %v1133_v9, %v2282_v12  ;;  %3796 = sst [smem:[#allocation65_spill]] %s2548_s14 }
 0x313   :  { %710 = vrot.lane.b32.xlu0 %v2296_v11, %s2025_s13  ;;  %v1127_v14 = vrot.slane %v1120_v19, 7  ;;  %v1119_v21 = vmul.f32 %v1116_v18, %v2306_v27  ;;  %v1136_v54 = vmul.f32 %v1133_v9, %v2284_v13  ;;  %v1117_v1 = vmul.f32 %v1116_v18, %v2312_v34  ;;  %3846 = sst [smem:[#allocation111_spill]] %s2698_s8 }
 0x314   :  { %712 = vrot.lane.b32.xlu1 %v2291_v10, %s2025_s13  ;;  %v2386_v38 = vsel %vm177_vm4, %v1022_v2, %v1014_v8  ;;  %v1144_v47 = vrot.slane %v1137_v4, 7  ;;  %v1134_v57 = vmul.f32 %v1133_v9, %v2280_v61  ;;  %v1347_v58 = vstv %s1853_s17  ;;  %s2554_s17 = sld [smem:[#allocation6 + $0x8]] }
 0x315   :  { %v2392_v53 = vsel %vm177_vm4, %v1127_v14, %v1118_v40  ;;  %v1125_v56 = vrot.slane %v1119_v21, 7  ;;  %v1142_v50 = vrot.slane %v1136_v54, 7  ;;  %v1351_v16 = vmul.f32 %v1347_v58, %v2302_v24  ;;  %s2749_s14 = sld [smem:[#allocation6 + $0x2e]] }
 0x316   :  { %3761 = vst [vmem:[#allocation30_spill] sm:$0xff] %v2392_v53  ;;  %v2396_v20 = vsel %vm177_vm4, %v1144_v47, %v1135_v45  ;;  %v1364_v17 = vstv %s1854_s18  ;;  %v1349_v8 = vmul.f32 %v1347_v58, %v2304_v26  ;;  %v1350_v4 = vmul.f32 %v1347_v58, %v2306_v27  ;;  %s2556_s18 = sld [smem:[#allocation6 + $0x16]] }
 0x317   :  { %761 = vrot.lane.b32.xlu0 %v2296_v11, %s2026_s16  ;;  %3762 = vst [vmem:[#allocation31_spill] sm:$0xff] %v2396_v20  ;;  %v2405_v60 = vsel %vm177_vm4, %v1125_v56, %v1117_v1  ;;  %v2409_v28 = vsel %vm177_vm4, %v1142_v50, %v1134_v57  ;;  %v1368_v18 = vmul.f32 %v1364_v17, %v2286_v59  ;;  %v1358_v2 = vrot.slane %v1351_v16, 7  ;;  %3797 = sst [smem:[#allocation66_spill]] %s2550_s15 }
 0x318   :  { %763 = vrot.lane.b32.xlu1 %v2291_v10, %s2026_s16  ;;  %3763 = vst [vmem:[#allocation32_spill] sm:$0xff] %v2405_v60  ;;  %3764 = vst [vmem:[#allocation33_spill] sm:$0xff] %v2409_v28  ;;  %v1366_v19 = vmul.f32 %v1364_v17, %v2282_v12  ;;  %v1367_v14 = vmul.f32 %v1364_v17, %v2284_v13  ;;  %v1348_v47 = vmul.f32 %v1347_v58, %v2312_v34  ;;  %s3890_s8 = sld [smem:[#allocation46_spill]] }
 0x319   :  { %v1375_v9 = vrot.slane %v1368_v18, 7  ;;  %v2424_v40 = vsel %vm177_vm4, %v1358_v2, %v1349_v8  ;;  %v1356_v21 = vrot.slane %v1350_v4, 7  ;;  %v1468_v54 = vstv %s1867_s19  ;;  %s2558_s19 = sld [smem:[#allocation6 + $0x1d]] }
 0x31a   :  { %3765 = vst [vmem:[#allocation34_spill] sm:$0xff] %v2424_v40  ;;  %v1365_v1 = vmul.f32 %v1364_v17, %v2280_v61  ;;  %v1373_v56 = vrot.slane %v1367_v14, 7  ;;  %v1472_v57 = vmul.f32 %v1468_v54, %v2302_v24  ;;  %v1485_v50 = vstv %s1868_s20  ;;  %3799 = sst [smem:[#allocation68_spill]] %s2554_s17 }
 0x31b   :  { %627 = vrot.lane.b32.xlu0 %v2362_v63, %s2023_s9  ;;  %v2428_v45 = vsel %vm177_vm4, %v1375_v9, %v1366_v19  ;;  %v2438_v16 = vsel %vm177_vm4, %v1356_v21, %v1348_v47  ;;  %v1489_v58 = vmul.f32 %v1485_v50, %v2286_v59  ;;  %v1470_v18 = vmul.f32 %v1468_v54, %v2304_v26  ;;  %s2560_s20 = sld [smem:[#allocation6 + $0x24]] }
 0x31c   :  { %629 = vrot.lane.b32.xlu1 %v2357_v62, %s2023_s9  ;;  %3766 = vst [vmem:[#allocation35_spill] sm:$0xff] %v2428_v45  ;;  %3767 = vst [vmem:[#allocation36_spill] sm:$0xff] %v2438_v16  ;;  %v2444_v17 = vsel %vm177_vm4, %v1373_v56, %v1365_v1  ;;  %v1479_v8 = vrot.slane %v1472_v57, 7  ;;  %v1487_v2 = vmul.f32 %v1485_v50, %v2282_v12  ;;  %v1589_v4 = vstv %s2412_s23  ;;  %s2528_s9 = sld [smem:[#allocation6]] }
 0x31d   :  { %3768 = vst [vmem:[#allocation37_spill] sm:$0xff] %v2444_v17  ;;  %v1496_v19 = vrot.slane %v1489_v58, 7  ;;  %v1471_v9 = vmul.f32 %v1468_v54, %v2306_v27  ;;  %v1488_v47 = vmul.f32 %v1485_v50, %v2284_v13  ;;  %v1593_v21 = vmul.f32 %v1589_v4, %v2302_v24  ;;  %3800 = sst [smem:[#allocation69_spill]] %s2556_s18 }
 0x31e   :  { %v2453_v14 = vsel %vm177_vm4, %v1479_v8, %v1470_v18  ;;  %v1606_v1 = vstv %s2415_s24  ;;  %v1469_v57 = vmul.f32 %v1468_v54, %v2312_v34  ;;  %v1486_v18 = vmul.f32 %v1485_v50, %v2280_v61  ;;  %s2562_s23 = sld [smem:[#allocation6 + $0x2b]] }
 0x31f   :  { %666 = vrot.lane.b32.xlu0 %v2362_v63, %s2024_s12  ;;  %3769 = vst [vmem:[#allocation38_spill] sm:$0xff] %v2453_v14  ;;  %v2463_v56 = vsel %vm177_vm4, %v1496_v19, %v1487_v2  ;;  %v1477_v58 = vrot.slane %v1471_v9, 7  ;;  %v1494_v8 = vrot.slane %v1488_v47, 7  ;;  %v1591_v30 = vmul.f32 %v1589_v4, %v2304_v26  ;;  %3801 = sst [smem:[#allocation70_spill]] %s2558_s19 }
 0x320   :  { %668 = vrot.lane.b32.xlu1 %v2357_v62, %s2024_s12  ;;  %3770 = vst [vmem:[#allocation39_spill] sm:$0xff] %v2463_v56  ;;  %v1600_v7 = vrot.slane %v1593_v21, 7  ;;  %v1610_v3 = vmul.f32 %v1606_v1, %v2286_v59  ;;  %v1592_v2 = vmul.f32 %v1589_v4, %v2306_v27  ;;  %v1608_v19 = vmul.f32 %v1606_v1, %v2282_v12  ;;  %s2544_s12 = sld [smem:[#allocation6 + $0x15]] }
 0x321   :  { %v2474_v0 = vsel %vm177_vm4, %v1477_v58, %v1469_v57  ;;  %v2480_v54 = vsel %vm177_vm4, %v1494_v8, %v1486_v18  ;;  %v1590_v47 = vmul.f32 %v1589_v4, %v2312_v34  ;;  %v1609_v57 = vmul.f32 %v1606_v1, %v2284_v13  ;;  %3802 = sst [smem:[#allocation71_spill]] %s2560_s20 }
 0x322   :  { %3773 = vst [vmem:[#allocation42_spill] sm:$0xff] %v2474_v0  ;;  %3775 = vst [vmem:[#allocation44_spill] sm:$0xff] %v2480_v54  ;;  %v2483_v50 = vsel %vm177_vm4, %v1600_v7, %v1591_v30  ;;  %v1617_v9 = vrot.slane %v1610_v3, 7  ;;  %v1598_v21 = vrot.slane %v1592_v2, 7  ;;  %v1237_v58 = vstv %s2441_s3  ;;  %3788 = sst [smem:[#allocation57_spill]] %s2528_s9 }
 0x323   :  { %699 = vrot.lane.b32.xlu0 %v2362_v63, %s2025_s13  ;;  %3776 = vst [vmem:[#allocation45_spill] sm:$0xff] %v2483_v50  ;;  %v1241_v3 = vmul.f32 %v1237_v58, %v2302_v24  ;;  %v1254_v4 = vstv %s2450_s0  ;;  %v1239_v18 = vmul.f32 %v1237_v58, %v2304_v26  ;;  %s2564_s24 = sld [smem:[#allocation6 + $0x2]] }
 0x324   :  { %701 = vrot.lane.b32.xlu1 %v2357_v62, %s2025_s13  ;;  %v2496_v30 = vsel %vm177_vm4, %v1617_v9, %v1608_v19  ;;  %v2502_v7 = vsel %vm177_vm4, %v1598_v21, %v1590_v47  ;;  %v1258_v2 = vmul.f32 %v1254_v4, %v2286_v59  ;;  %v1256_v26 = vmul.f32 %v1254_v4, %v2282_v12  ;;  %s2546_s13 = sld [smem:[#allocation6 + $0x1c]] }
 0x325   :  { %3779 = vst [vmem:[#allocation48_spill] sm:$0xff] %v2496_v30  ;;  %3781 = vst [vmem:[#allocation50_spill] sm:$0xff] %v2502_v7  ;;  %v1248_v8 = vrot.slane %v1241_v3, 7  ;;  %v1257_v59 = vmul.f32 %v1254_v4, %v2284_v13  ;;  %3803 = sst [smem:[#allocation72_spill]] %s2562_s23 }
 0x326   :  { %v1265_v9 = vrot.slane %v1258_v2, 7  ;;  %3794 = sst [smem:[#allocation63_spill]] %s2544_s12 }
 0x327   :  { %794 = vrot.lane.b32.xlu0 %v2296_v11, %s2027_s25  ;;  %v2521_v19 = vsel %vm177_vm4, %v1248_v8, %v1239_v18  ;;  %v1263_v21 = vrot.slane %v1257_v59, 7  ;;  %s2568_s3 = sld [smem:[#allocation6 + $0x39]]  ;;  %v3838_v8 = vmov 0.0  }
 0x328   :  { %796 = vrot.lane.b32.xlu1 %v2291_v10, %s2027_s25  ;;  %3786 = vst [vmem:[#allocation55_spill] sm:$0xff] %v2521_v19  ;;  %v2531_v47 = vsel %vm177_vm4, %v1265_v9, %v1256_v26  ;;  %s2570_s0 = sld [smem:[#allocation6 + $0x3a]] }
 0x329   :  { %3789 = vst [vmem:[#allocation58_spill] sm:$0xff] %v2531_v47  ;;  %3804 = sst [smem:[#allocation73_spill]] %s2564_s24 }
 0x32a   :  { %3795 = sst [smem:[#allocation64_spill]] %s2546_s13 }
 0x32b   :  { %750 = vrot.lane.b32.xlu0 %v2362_v63, %s2026_s16  ;;  %s2580_s19 = sld [smem:[#allocation6 + $0x43]] }
 0x32c   :  { %752 = vrot.lane.b32.xlu1 %v2357_v62, %s2026_s16  ;;  %s2552_s16 = sld [smem:[#allocation6 + $0x1]] }
 0x32d   :  { %3806 = sst [smem:[#allocation75_spill]] %s2568_s3 }
 0x32e   :  { %3807 = sst [smem:[#allocation76_spill]] %s2570_s0 }
 0x32f   :  { %783 = vrot.lane.b32.xlu0 %v2362_v63, %s2027_s25  ;;  %s2582_s20 = sld [smem:[#allocation6 + $0x9]] }
 0x330   :  { %785 = vrot.lane.b32.xlu1 %v2357_v62, %s2027_s25  ;;  %s2566_s25 = sld [smem:[#allocation6 + $0x35]] }
 0x331   :  { %3812 = sst [smem:[#allocation81_spill]] %s2580_s19 }
 0x332   :  { %3798 = sst [smem:[#allocation67_spill]] %s2552_s16 }
 0x333   :  { %816 = vrot.lane.b32.xlu0 %v2362_v63, %s2028_s29  ;;  %v1615_v63 = vrot.slane %v1609_v57, 7  ;;  %s2584_s23 = sld [smem:[#allocation6 + $0xf]] }
 0x334   :  { %818 = vrot.lane.b32.xlu1 %v2357_v62, %s2028_s29  ;;  %v1607_v62 = vmul.f32 %v1606_v1, %v2280_v61  ;;  %v1240_v1 = vmul.f32 %v1237_v58, %v2306_v27  ;;  %v1255_v27 = vmul.f32 %v1254_v4, %v2280_v61  ;;  %s2586_s24 = sld [smem:[#allocation6 + $0x36]]  ;;  %v584_v61 = vadd.s32 128, %v2159_v39 }
 0x335   :  { %3813 = sst [smem:[#allocation82_spill]] %s2582_s20 }
 0x336   :  { %v2515_v24 = vsel %vm177_vm4, %v1615_v63, %v1607_v62  ;;  %v2542_v13 = vsel %vm177_vm4, %v1263_v21, %v1255_v27  ;;  %3805 = sst [smem:[#allocation74_spill]] %s2566_s25  ;;  %v596_v57 = vand.u32 15, %v584_v61 }
 0x337   :  { %827 = vrot.lane.b32.xlu0 %v2296_v11, %s2028_s29  ;;  %3784 = vst [vmem:[#allocation53_spill] sm:$0xff] %v2515_v24  ;;  %v1246_v11 = vrot.slane %v1240_v1, 7  ;;  %3793 = vst [vmem:[#allocation62_spill] sm:$0xff] %v2542_v13  ;;  %s2588_s25 = sld [smem:[#allocation6 + $0x4f]] }
 0x338   :  { %829 = vrot.lane.b32.xlu1 %v2291_v10, %s2028_s29  ;;  %v1238_v10 = vmul.f32 %v1237_v58, %v2312_v34  ;;  %s2572_s29 = sld [smem:[#allocation6 + $0x3c]]  ;;  %v2614_v34 = vand.u32 15, %v2159_v39  ;;  %v610_v3 = vadd.s32 4294967293, %v596_v57  ;;  %v655_v62 = vadd.s32 4294967294, %v596_v57 }
 0x339   :  { %3814 = sst [smem:[#allocation83_spill]] %s2584_s23  ;;  %v688_v4 = vadd.s32 4294967295, %v596_v57  ;;  %v739_v18 = vadd.s32 1, %v596_v57 }
 0x33a   :  { %v2537_v12 = vsel %vm177_vm4, %v1246_v11, %v1238_v10  ;;  %3815 = sst [smem:[#allocation84_spill]] %s2586_s24  ;;  %v609_v58 = vadd.s32 4294967293, %v2614_v34  ;;  %vm612_vm8 = vcmp.ge.s32.totalorder %v610_v3, 0  ;;  %v654_v39 = vadd.s32 4294967294, %v2614_v34 }
 0x33b   :  { %3791 = vst [vmem:[#allocation60_spill] sm:$0xff] %v2537_v12  ;;  %s2590_s3 = sld [smem:[#allocation6 + $0x51]]  ;;  %v687_v63 = vadd.s32 4294967295, %v2614_v34  ;;  %v738_v26 = vadd.s32 1, %v2614_v34  ;;  %v2649_v9 = vsel %vm612_vm8, 1.0, %v3838_v8  ;;  %vm657_vm10 = vcmp.ge.s32.totalorder %v655_v62, 0 }
 0x33c   :  { %s2592_s0 = sld [smem:[#allocation6 + $0x4]]  ;;  %vm611_vm7 = vcmp.ge.s32.totalorder %v609_v58, 0  ;;  %vm656_vm9 = vcmp.ge.s32.totalorder %v654_v39, 0  ;;  %vm690_vm12 = vcmp.ge.s32.totalorder %v688_v4, 0  ;;  %vm743_vm13 = vcmp.lt.s32.totalorder %v739_v18, 16 }
 0x33d   :  { %3816 = sst [smem:[#allocation85_spill]] %s2588_s25  ;;  %v2642_v2 = vsel %vm611_vm7, 1.0, %v3838_v8  ;;  %vm689_vm11 = vcmp.ge.s32.totalorder %v687_v63, 0  ;;  %vm742_vm14 = vcmp.lt.s32.totalorder %v738_v26, 16  ;;  %v772_v3 = vadd.s32 2, %v596_v57 }
 0x33e   :  { %3808 = sst [smem:[#allocation77_spill]] %s2572_s29  ;;  %v771_v39 = vadd.s32 2, %v2614_v34  ;;  %v2668_v62 = vsel %vm656_vm9, 1.0, %v3838_v8  ;;  %v2671_v63 = vsel %vm657_vm10, 1.0, %v3838_v8  ;;  %v2674_v4 = vsel %vm689_vm11, 1.0, %v3838_v8 }
 0x33f   :  { %s2594_s29 = sld [smem:[#allocation6 + $0x5]]  ;;  %v2677_v18 = vsel %vm690_vm12, 1.0, %v3838_v8  ;;  %v2682_v26 = vsel %vm743_vm13, 1.0, %v3838_v8  ;;  %v805_v58 = vadd.s32 3, %v596_v57  ;;  %v2689_v27 = vsel %vm742_vm14, 1.0, %v3838_v8 }
 0x340   :  { %s2602_s19 = sld [smem:[#allocation6 + $0xb]]  ;;  %vm776_vm15 = vcmp.lt.s32.totalorder %v772_v3, 16  ;;  %vm775_vm0 = vcmp.lt.s32.totalorder %v771_v39, 16  ;;  %v804_v57 = vadd.s32 3, %v2614_v34  ;;  %vm670_vm4 = vcmask 15360  }
 0x341   :  { %3817 = sst [smem:[#allocation86_spill]] %s2590_s3  ;;  %vm809_vm2 = vcmp.lt.s32.totalorder %v805_v58, 16  ;;  %v2715_v6 = vsel %vm776_vm15, 1.0, %v3838_v8  ;;  %v2719_v59 = vsel %vm775_vm0, 1.0, %v3838_v8  ;;  %vm754_vm7 = vcmask 1039360  }
 0x342   :  { %3818 = sst [smem:[#allocation87_spill]] %s2592_s0  ;;  %vm808_vm3 = vcmp.lt.s32.totalorder %v804_v57, 16  ;;  %v2729_v3 = vsel %vm809_vm2, 1.0, %v3838_v8  ;;  %v3896_v11 = vmov %v3895_v49  ;;  %vm787_vm8 = vcmask 1031168  }
 0x343   :  { %s2605_s23 = sld [smem:[#allocation6 + $0x10]]  ;;  %v2744_v61 = vsel %vm808_vm3, 1.0, %v3838_v8  ;;  %vm820_vm9 = vcmask 1022976   ;;  %vm951_vm10 = vcmask 392192   ;;  %vm1192_vm11 = vcmask 130048  }
 0x344   :  { %s2607_s24 = sld [smem:[#allocation6 + $0x55]]  ;;  %vm1423_vm12 = vcmask 916480   ;;  %vm1544_vm13 = vcmask 785408   ;;  %vm1665_vm14 = vcmask 654336  }
 0x345   :  { %3819 = sst [smem:[#allocation88_spill]] %s2594_s29 }
 0x346   :  { %3823 = sst [smem:[#allocation92_spill]] %s2602_s19 }
 0x347   :  { %s2609_s25 = sld [smem:[#allocation6 + $0xc]] }
 0x348   :  { %s2611_s3 = sld [smem:[#allocation6 + $0x44]] }
 0x349   :  { %3824 = sst [smem:[#allocation93_spill]] %s2605_s23 }
 0x34a   :  { %3825 = sst [smem:[#allocation94_spill]] %s2607_s24 }
 0x34b   :  { %s2622_s19 = sld [smem:[#allocation6 + $0x1e]] }
 0x34c   :  { %s2625_s24 = sld [smem:[#allocation6 + $0x56]] }
 0x34d   :  { %3826 = sst [smem:[#allocation95_spill]] %s2609_s25 }
 0x34e   :  { %3827 = sst [smem:[#allocation96_spill]] %s2611_s3 }
 0x34f   :  { %s2627_s25 = sld [smem:[#allocation6 + $0x52]] }
 0x350   :  { %s2629_s3 = sld [smem:[#allocation6 + $0x13]] }
 0x351   :  { %3831 = sst [smem:[#allocation100_spill]] %s2622_s19 }
 0x352   :  { %3832 = sst [smem:[#allocation101_spill]] %s2625_s24 }
 0x353   :  { %s2631_s23 = sld [smem:[#allocation6 + $0x58]] }
 0x354   :  { %s2637_s24 = sld [smem:[#allocation6 + $0x20]] }
 0x355   :  { %3833 = sst [smem:[#allocation102_spill]] %s2627_s25 }
 0x356   :  { %3834 = sst [smem:[#allocation103_spill]] %s2629_s3 }
 0x357   :  { %s2639_s25 = sld [smem:[#allocation6 + $0x14]] }
 0x358   :  { %s2721_s18 = sld [smem:[#allocation6 + $0x48]] }
 0x359   :  { %s3861_s28 = sld [smem:[#allocation85_spill]] }
 0x35a   :  { %3836 = sst [smem:[#allocation105_spill]] %s2637_s24 }
 0x35b   :  { %s2654_s24 = sld [smem:[#allocation6 + $0x45]] }
 0x35c   :  { %3862 = sst [smem:[#allocation85_spill]] %s2726_s27 }
 0x35d   :  { %3837 = sst [smem:[#allocation106_spill]] %s2639_s25 }
 0x35e   :  { %s2656_s25 = sld [smem:[#allocation6 + $0x21]] }
 0x35f   :  { %3858 = sst [smem:[#allocation114_spill]] %s2721_s18 }
 0x360   :  { %s2734_s18 = sld [smem:[#allocation6 + $0x2c]] }
 0x361   :  { %s3867_s10 = sld [smem:[#allocation92_spill]] }
 0x362   :  { %s2740_s27 = sld [smem:[#allocation6 + $0x60]] }
 0x363   :  { %s3869_s12 = sld [smem:[#allocation95_spill]] }
 0x364   :  { %s3871_s20 = sld [smem:[#allocation94_spill]] }
 0x365   :  { %s2755_s17 = sld [smem:[#allocation6 + $0x2f]] }
 0x366   :  { %s3873_s11 = sld [smem:[#allocation101_spill]] }
 0x367   :  { %s3874_s13 = sld [smem:[#allocation102_spill]] }
 0x368   :  { %s3877_s16 = sld [smem:[#allocation106_spill]] }
 0x369   :  { %s2767_s29 = sld [smem:[#allocation6 + $0x61]] }
 0x36a   :  { %s3879_s5 = sld [smem:[#allocation105_spill]] }
 0x36b   :  { %s3884_s19 = sld [smem:[#allocation113_spill]] }
 0x36c   :  { %s3885_s22 = sld [smem:[#allocation85_spill]] }
 0x36d   :  { %s3887_s0 = sld [smem:[#allocation40_spill]] }
 0x36e   :  { %s3889_s9 = sld [smem:[#allocation43_spill]] }
 0x36f   :  { %3878 = sst [smem:[#allocation92_spill]] %s2767_s29 }
 0x370   :  { %s3891_s15 = sld [smem:[#allocation47_spill]] }
 0x371   :  { %s3894_s3 = sld [smem:[#allocation49_spill]] }
 0x372   :  { %s3898_s29 = sld [smem:[#allocation51_spill]] }
 0x373   :  { %v3892_v15 = vstv %s3887_s0  ;;  %s3902_s0 = sld [smem:[#allocation54_spill]] }
 0x374   :  { %s3904_s26 = sld [smem:[#allocation56_spill]] }
 0x375   :  { %s3908_s6 = sld [smem:[#allocation75_spill]] }
 0x377   :  { %v3912_v44 = vstv %s3894_s3  ;;  %s3929_s3 = sld [smem:[#allocation80_spill]] }
 0x378   :  { %v3917_v47 = vstv %s3898_s29  ;;  %s3936_s29 = sld [smem:[#allocation77_spill]] }
 0x379   :  { %v3919_v19 = vmov %v3917_v47  ;;  %v3922_v24 = vstv %s3902_s0  ;;  %s3938_s0 = sld [smem:[#allocation63_spill]] }
 0x37a   :  { %v3925_v30 = vstv %s3904_s26  ;;  %s3940_s26 = sld [smem:[#allocation81_spill]] }
 0x37d   :  { %v645_v8 = vpop.permute.xlu0 %644 }
 0x37e   :  { %v647_v58 = vpop.permute.xlu1 %646  ;;  %v651_v5 = vsel %vm631_vm1, 0.0, %v645_v8 }
 0x37f   :  { %v648_v41 = vsel %vm631_vm1, %v645_v8, %v647_v58  ;;  %v652_v10 = vmul.f32 %v2642_v2, %v651_v5 }
 0x380   :  { %v653_v39 = vmul.f32 %v2649_v9, %v648_v41  ;;  %v3960_v60 = vstv %s3940_s26  ;;  %s3994_s26 = sld [smem:[#allocation66_spill]] }
 0x381   :  { %v678_v34 = vpop.permute.xlu0 %677  ;;  %v2809_v58 = vmul.f32 %v3892_v15, %v652_v10  ;;  %v2819_v21 = vmul.f32 %v3895_v49, %v652_v10  ;;  %v2859_v13 = vmul.f32 %v3912_v44, %v652_v10 }
 0x382   :  { %v680_v1 = vpop.permute.xlu1 %679  ;;  %v684_v42 = vsel %vm670_vm4, 0.0, %v678_v34  ;;  %v2823_v48 = vmul.f32 %v3896_v11, %v653_v39  ;;  %v3906_v11 = vstv %s3890_s8  ;;  %s3920_s8 = sld [smem:[#allocation78_spill]] }
 0x383   :  { %v681_v8 = vsel %vm670_vm4, %v678_v34, %v680_v1  ;;  %v3893_v1 = vmov %v3892_v15  ;;  %v2826_v57 = vmul.f32 %v2668_v62, %v684_v42  ;;  %v3907_v29 = vmov %v3906_v11  ;;  %3913 = vst [vmem:[#allocation120_spill] sm:$0xff] %v2859_v13 }
 0x384   :  { %v2813_v36 = vmul.f32 %v3893_v1, %v653_v39  ;;  %v2829_v15 = vmul.f32 %v2671_v63, %v681_v8  ;;  %v3900_v1 = vstv %s3889_s9  ;;  %v1207_v8 = vmul.f32 %v3906_v11, %v652_v10  ;;  %s3915_s9 = sld [smem:[#allocation76_spill]] }
 0x385   :  { %v711_v37 = vpop.permute.xlu0 %710  ;;  %3897 = vst [vmem:[#allocation115_spill] sm:$0xff] %v2826_v57  ;;  %v3901_v32 = vmov %v3900_v1  ;;  %v1208_v33 = vmul.f32 %v3907_v29, %v653_v39 }
 0x386   :  { %v713_v41 = vpop.permute.xlu1 %712  ;;  %v717_v5 = vsel %vm703_vm6, 0.0, %v711_v37  ;;  %3899 = vst [vmem:[#allocation116_spill] sm:$0xff] %v2829_v15 }
 0x387   :  { %v714_v34 = vsel %vm703_vm6, %v711_v37, %v713_v41  ;;  %v2833_v41 = vmul.f32 %v3900_v1, %v652_v10  ;;  %v2837_v37 = vmul.f32 %v3901_v32, %v653_v39  ;;  %v2840_v49 = vmul.f32 %v2674_v4, %v717_v5 }
 0x388   :  { %v2843_v42 = vmul.f32 %v2677_v18, %v714_v34  ;;  %v3909_v1 = vstv %s3891_s15  ;;  %v3914_v34 = vmov %v3912_v44  ;;  %s3923_s15 = sld [smem:[#allocation79_spill]]  ;;  %v2878_v44 = vmul.f32 %v3922_v24, %v2829_v15 }
 0x389   :  { %3903 = vst [vmem:[#allocation117_spill] sm:$0xff] %v2840_v49  ;;  %v2851_v31 = vmul.f32 %v3909_v1, %v652_v10  ;;  %v3911_v32 = vmov %v3909_v1  ;;  %v762_v5 = vpop.permute.xlu0 %761  ;;  %v2863_v12 = vmul.f32 %v3914_v34, %v653_v39  ;;  %v2869_v1 = vmul.f32 %v3917_v47, %v652_v10 }
 0x38a   :  { %3905 = vst [vmem:[#allocation118_spill] sm:$0xff] %v2843_v42  ;;  %v2855_v25 = vmul.f32 %v3911_v32, %v653_v39  ;;  %v764_v22 = vpop.permute.xlu1 %763  ;;  %v2873_v32 = vmul.f32 %v3919_v19, %v653_v39  ;;  %v3924_v34 = vmov %v3922_v24  ;;  %v2888_v50 = vmul.f32 %v3925_v30, %v2843_v42 }
 0x38b   :  { %3910 = vst [vmem:[#allocation119_spill] sm:$0xff] %v2851_v31  ;;  %3916 = vst [vmem:[#allocation121_spill] sm:$0xff] %v2863_v12  ;;  %v768_v11 = vsel %vm754_vm7, %v764_v22, 0.0  ;;  %v765_v29 = vsel %vm754_vm7, %v762_v5, %v764_v22  ;;  %v2883_v7 = vmul.f32 %v3924_v34, %v2826_v57  ;;  %v3926_v22 = vmov %v3925_v30 }
 0x38c   :  { %3918 = vst [vmem:[#allocation122_spill] sm:$0xff] %v2869_v1  ;;  %3921 = vst [vmem:[#allocation123_spill] sm:$0xff] %v2873_v32  ;;  %v2893_v47 = vmul.f32 %v3926_v22, %v2840_v49  ;;  %v3927_v19 = vstv %s3908_s6  ;;  %v2906_v5 = vmul.f32 %v2682_v26, %v768_v11  ;;  %v2909_v30 = vmul.f32 %v2689_v27, %v765_v29  ;;  %s3934_s6 = sld [smem:[#allocation74_spill]] }
 0x38d   :  { %v2898_v10 = vmul.f32 %v3927_v19, %v2829_v15  ;;  %v3928_v24 = vmov %v3927_v19  ;;  %v628_v22 = vpop.permute.xlu0 %627  ;;  %v3932_v1 = vstv %s3915_s9  ;;  %v3935_v29 = vstv %s3920_s8  ;;  %s3945_s9 = sld [smem:[#allocation86_spill]] }
 0x38e   :  { %v2903_v39 = vmul.f32 %v3928_v24, %v2826_v57  ;;  %3930 = vst [vmem:[#allocation124_spill] sm:$0xff] %v2906_v5  ;;  %3931 = vst [vmem:[#allocation125_spill] sm:$0xff] %v2909_v30  ;;  %v630_v34 = vpop.permute.xlu1 %629  ;;  %v2914_v19 = vmul.f32 %v3932_v1, %v2843_v42  ;;  %v3933_v54 = vmov %v3932_v1  ;;  %v635_v11 = vsel %vm631_vm1, 0.0, %v628_v22  ;;  %s3955_s8 = sld [smem:[#allocation57_spill]] }
 0x38f   :  { %v2919_v0 = vmul.f32 %v3933_v54, %v2840_v49  ;;  %v632_v24 = vsel %vm631_vm1, %v628_v22, %v630_v34  ;;  %v2926_v56 = vmul.f32 %v3935_v29, %v2829_v15  ;;  %v3937_v32 = vstv %s3923_s15  ;;  %s3974_s15 = sld [smem:[#allocation61_spill]] }
 0x390   :  { %v2931_v1 = vmul.f32 %v3937_v32, %v2843_v42  ;;  %v636_v54 = vmul.f32 %v2642_v2, %v635_v11  ;;  %v2935_v14 = vmul.f32 %v2649_v9, %v632_v24  ;;  %v3939_v34 = vmov %v3935_v29 }
 0x391   :  { %v2940_v22 = vmul.f32 %v3939_v34, %v2826_v57  ;;  %v3942_v29 = vmov %v3937_v32  ;;  %v3944_v32 = vstv %s3929_s3  ;;  %v3947_v2 = vstv %s3861_s28  ;;  %v667_v45 = vpop.permute.xlu0 %666  ;;  %s3971_s28 = sld [smem:[#allocation59_spill]] }
 0x392   :  { %v2945_v17 = vmul.f32 %v3942_v29, %v2840_v49  ;;  %v2950_v16 = vmul.f32 %v3944_v32, %v2829_v15  ;;  %v2955_v9 = vmul.f32 %v3947_v2, %v2843_v42  ;;  %v3949_v24 = vmov %v3944_v32  ;;  %v669_v13 = vpop.permute.xlu1 %668  ;;  %s3981_s3 = sld [smem:[#allocation67_spill]] }
 0x393   :  { %3941 = vst [vmem:[#allocation126_spill] sm:$0xff] %v2940_v22  ;;  %v2960_v11 = vmul.f32 %v3949_v24, %v2826_v57  ;;  %v3951_v34 = vmov %v3947_v2  ;;  %v3953_v32 = vstv %s3934_s6  ;;  %v3956_v24 = vstv %s3936_s29  ;;  %s3983_s6 = sld [smem:[#allocation64_spill]] }
 0x394   :  { %3943 = vst [vmem:[#allocation127_spill] sm:$0xff] %v2945_v17  ;;  %3946 = vst [vmem:[#allocation128_spill] sm:$0xff] %v2950_v16  ;;  %v2965_v29 = vmul.f32 %v3951_v34, %v2840_v49  ;;  %v2970_v40 = vmul.f32 %v3953_v32, %v2906_v5  ;;  %v3954_v2 = vmov %v3953_v32  ;;  %v2980_v12 = vmul.f32 %v3956_v24, %v2906_v5  ;;  %s3984_s29 = sld [smem:[#allocation68_spill]] }
 0x395   :  { %3948 = vst [vmem:[#allocation129_spill] sm:$0xff] %v2955_v9  ;;  %3950 = vst [vmem:[#allocation130_spill] sm:$0xff] %v2960_v11  ;;  %v2975_v28 = vmul.f32 %v3954_v2, %v2909_v30  ;;  %v3957_v34 = vmov %v3956_v24  ;;  %v2995_v17 = vmul.f32 %v3960_v60, %v2906_v5  ;;  %v3962_v2 = vmov %v3960_v60 }
 0x396   :  { %3952 = vst [vmem:[#allocation131_spill] sm:$0xff] %v2965_v29  ;;  %v2985_v49 = vmul.f32 %v3957_v34, %v2909_v30  ;;  %v3958_v29 = vstv %s3938_s0  ;;  %v3000_v16 = vmul.f32 %v3962_v2, %v2909_v30  ;;  %v3964_v24 = vstv %s3945_s9  ;;  %s3991_s0 = sld [smem:[#allocation73_spill]] }
 0x397   :  { %v1202_v9 = vmul.f32 %v3958_v29, %v636_v54  ;;  %v3959_v11 = vmov %v3958_v29  ;;  %3961 = vst [vmem:[#allocation132_spill] sm:$0xff] %v2995_v17  ;;  %v3005_v31 = vmul.f32 %v3964_v24, %v2906_v5  ;;  %v3966_v34 = vmov %v3964_v24  ;;  %s4004_s9 = sld [smem:[#allocation82_spill]] }
 0x398   :  { %v1203_v32 = vmul.f32 %v3959_v11, %v2935_v14  ;;  %3963 = vst [vmem:[#allocation133_spill] sm:$0xff] %v3000_v16  ;;  %v3010_v20 = vmul.f32 %v3966_v34, %v2909_v30  ;;  %v3968_v29 = vstv %s3871_s20  ;;  %v3970_v11 = vstv %s3873_s11  ;;  %s3986_s20 = sld [smem:[#allocation65_spill]] }
 0x399   :  { %3965 = vst [vmem:[#allocation134_spill] sm:$0xff] %v3005_v31  ;;  %v3015_v22 = vmul.f32 %v3968_v29, %v2829_v15  ;;  %v3020_v60 = vmul.f32 %v3970_v11, %v2843_v42  ;;  %v3022_v2 = vadd.f32 %v1207_v8, %v1202_v9  ;;  %v3976_v24 = vstv %s2631_s23 }
 0x39a   :  { %3967 = vst [vmem:[#allocation135_spill] sm:$0xff] %v3010_v20  ;;  %v3024_v16 = vadd.f32 %v1208_v33, %v1203_v32  ;;  %v3029_v31 = vmul.f32 %v3976_v24, %v2906_v5  ;;  %v3978_v34 = vmov %v3968_v29  ;;  %v3980_v30 = vstv %s3955_s8  ;;  %v702_v32 = vpop.permute.xlu1 %701  ;;  %v700_v24 = vpop.permute.xlu0 %699  ;;  %s4006_s8 = sld [smem:[#allocation69_spill]] }
 0x39b   :  { %3969 = vst [vmem:[#allocation136_spill] sm:$0xff] %v3015_v22  ;;  %3972 = vst [vmem:[#allocation137_spill] sm:$0xff] %v3020_v60  ;;  %v3034_v29 = vmul.f32 %v3978_v34, %v2826_v57  ;;  %v840_v15 = vmul.f32 %v3980_v30, %v636_v54  ;;  %v3982_v11 = vmov %v3980_v30  ;;  %v671_v9 = vsel %vm670_vm4, %v667_v45, %v669_v13 }
 0x39c   :  { %3973 = vst [vmem:[#allocation138_spill] sm:$0xff] %v3022_v2  ;;  %3975 = vst [vmem:[#allocation139_spill] sm:$0xff] %v3024_v16  ;;  %v841_v8 = vmul.f32 %v3982_v11, %v2935_v14  ;;  %v674_v33 = vsel %vm670_vm4, 0.0, %v667_v45  ;;  %v3047_v34 = vmul.f32 %v2671_v63, %v671_v9  ;;  %v704_v30 = vsel %vm703_vm6, %v700_v24, %v702_v32 }
 0x39d   :  { %3977 = vst [vmem:[#allocation140_spill] sm:$0xff] %v3029_v31  ;;  %3979 = vst [vmem:[#allocation141_spill] sm:$0xff] %v3034_v29  ;;  %v3044_v2 = vmul.f32 %v2668_v62, %v674_v33  ;;  %v707_v11 = vsel %vm703_vm6, 0.0, %v700_v24  ;;  %v3985_v5 = vstv %s3971_s28  ;;  %v3988_v57 = vstv %s3974_s15  ;;  %s4008_s28 = sld [smem:[#allocation70_spill]] }
 0x39e   :  { %v961_v13 = vmul.f32 %v3985_v5, %v636_v54  ;;  %v3987_v45 = vmov %v3985_v5  ;;  %v3058_v42 = vmul.f32 %v3988_v57, %v636_v54  ;;  %v3061_v62 = vmul.f32 %v2677_v18, %v704_v30  ;;  %v797_v29 = vpop.permute.xlu1 %796  ;;  %v795_v60 = vpop.permute.xlu0 %794  ;;  %s4012_s15 = sld [smem:[#allocation87_spill]] }
 0x39f   :  { %v962_v16 = vmul.f32 %v3987_v45, %v2935_v14  ;;  %v3989_v63 = vmov %v3988_v57  ;;  %v3990_v33 = vstv %s3981_s3  ;;  %v3075_v31 = vmul.f32 %v2674_v4, %v707_v11  ;;  %s4013_s3 = sld [smem:[#allocation84_spill]] }
 0x3a0   :  { %v3066_v9 = vmul.f32 %v3989_v63, %v2935_v14  ;;  %v852_v32 = vmul.f32 %v3990_v33, %v3044_v2  ;;  %v3992_v5 = vmov %v3990_v33  ;;  %v3993_v45 = vstv %s3983_s6  ;;  %s4016_s6 = sld [smem:[#allocation88_spill]] }
 0x3a1   :  { %v853_v24 = vmul.f32 %v3992_v5, %v3047_v34  ;;  %v3079_v57 = vmul.f32 %v3993_v45, %v636_v54  ;;  %v3996_v18 = vstv %s3984_s29  ;;  %v848_v33 = vadd.f32 %v2813_v36, %v841_v8  ;;  %s4021_s29 = sld [smem:[#allocation89_spill]] }
 0x3a2   :  { %v973_v30 = vmul.f32 %v3996_v18, %v3044_v2  ;;  %v3997_v63 = vmov %v3996_v18  ;;  %v3998_v5 = vmov %v3993_v45  ;;  %v3999_v4 = vstv %s3986_s20  ;;  %s4024_s20 = sld [smem:[#allocation83_spill]] }
 0x3a3   :  { %3995 = vst [vmem:[#allocation142_spill] sm:$0xff] %v3079_v57  ;;  %v974_v20 = vmul.f32 %v3997_v63, %v3047_v34  ;;  %v3091_v22 = vmul.f32 %v3998_v5, %v2935_v14  ;;  %v3095_v11 = vmul.f32 %v3999_v4, %v636_v54  ;;  %v4001_v45 = vmov %v3999_v4 }
 0x3a4   :  { %v3100_v17 = vmul.f32 %v4001_v45, %v2935_v14  ;;  %v847_v18 = vadd.f32 %v2809_v58, %v840_v15  ;;  %v855_v63 = vadd.f32 %v853_v24, %v848_v33  ;;  %v4003_v57 = vstv %s3991_s0  ;;  %v751_v33 = vpop.permute.xlu0 %750  ;;  %s4027_s0 = sld [smem:[#allocation91_spill]] }
 0x3a5   :  { %4000 = vst [vmem:[#allocation143_spill] sm:$0xff] %v3095_v11  ;;  %v865_v53 = vmul.f32 %v4003_v57, %v3061_v62  ;;  %v969_v36 = vadd.f32 %v2823_v48, %v962_v16  ;;  %v968_v8 = vadd.f32 %v2819_v21, %v961_v13  ;;  %v4005_v5 = vstv %s3994_s26  ;;  %s4029_s26 = sld [smem:[#allocation97_spill]] }
 0x3a6   :  { %4002 = vst [vmem:[#allocation144_spill] sm:$0xff] %v3100_v17  ;;  %v3110_v4 = vmul.f32 %v4005_v5, %v636_v54  ;;  %v801_v45 = vsel %vm787_vm8, %v797_v29, 0.0  ;;  %v854_v11 = vadd.f32 %v852_v32, %v847_v18  ;;  %v4007_v58 = vmov %v4003_v57  ;;  %v753_v57 = vpop.permute.xlu1 %752 }
 0x3a7   :  { %v864_v15 = vmul.f32 %v4007_v58, %v3075_v31  ;;  %v798_v24 = vsel %vm787_vm8, %v795_v60, %v797_v29  ;;  %v860_v48 = vadd.f32 %v2878_v44, %v855_v63  ;;  %v976_v16 = vadd.f32 %v974_v20, %v969_v36 }
 0x3a8   :  { %v975_v17 = vadd.f32 %v973_v30, %v968_v8  ;;  %v758_v21 = vsel %vm754_vm7, %v753_v57, 0.0  ;;  %v755_v54 = vsel %vm754_vm7, %v751_v33, %v753_v57  ;;  %v859_v13 = vadd.f32 %v2883_v7, %v854_v11  ;;  %v784_v8 = vpop.permute.xlu0 %783 }
 0x3a9   :  { %v4009_v32 = vstv %s4004_s9  ;;  %v3127_v58 = vmul.f32 %v4005_v5, %v2935_v14  ;;  %v4010_v60 = vstv %s4006_s8  ;;  %v3135_v20 = vmul.f32 %v2682_v26, %v758_v21  ;;  %s4030_s9 = sld [smem:[#allocation93_spill]] }
 0x3aa   :  { %v986_v18 = vmul.f32 %v4009_v32, %v3061_v62  ;;  %v3132_v29 = vmul.f32 %v4010_v60, %v3047_v34  ;;  %v867_v44 = vadd.f32 %v865_v53, %v860_v48  ;;  %v4011_v30 = vstv %s4008_s28  ;;  %v786_v53 = vpop.permute.xlu1 %785 }
 0x3ab   :  { %v3140_v63 = vmul.f32 %v4011_v30, %v3044_v2  ;;  %v3143_v7 = vmul.f32 %v2689_v27, %v755_v54  ;;  %v866_v11 = vadd.f32 %v864_v15, %v859_v13  ;;  %v981_v14 = vadd.f32 %v2898_v10, %v976_v16 }
 0x3ac   :  { %v3147_v36 = vmul.f32 %v2715_v6, %v801_v45  ;;  %v3150_v26 = vmul.f32 %v2719_v59, %v798_v24  ;;  %v872_v57 = vadd.f32 %v2888_v50, %v867_v44  ;;  %v980_v33 = vadd.f32 %v2903_v39, %v975_v17 }
 0x3ad   :  { %v791_v27 = vsel %vm787_vm8, %v786_v53, 0.0  ;;  %v788_v15 = vsel %vm787_vm8, %v784_v8, %v786_v53  ;;  %v871_v10 = vadd.f32 %v2893_v47, %v866_v11  ;;  %v988_v45 = vadd.f32 %v986_v18, %v981_v14 }
 0x3ae   :  { %v3158_v48 = vmul.f32 %v2715_v6, %v791_v27  ;;  %v891_v24 = vadd.f32 %v2327_v43, %v872_v57  ;;  %v4014_v16 = vstv %s4012_s15  ;;  %v4015_v17 = vmov %v4009_v32  ;;  %v819_v32 = vpop.permute.xlu1 %818  ;;  %v817_v43 = vpop.permute.xlu0 %816  ;;  %s4034_s15 = sld [smem:[#allocation71_spill]] }
 0x3af   :  { %v913_v50 = vmul.f32 %v4014_v16, %v3135_v20  ;;  %v985_v39 = vmul.f32 %v4015_v17, %v3075_v31  ;;  %v3168_v21 = vmul.f32 %v2719_v59, %v788_v15  ;;  %v890_v54 = vadd.f32 %v2342_v55, %v871_v10 }
 0x3b0   :  { %v4017_v47 = vmov %v4014_v16  ;;  %v993_v6 = vadd.f32 %v2914_v19, %v988_v45  ;;  %v908_v18 = vadd.f32 %v2334_v51, %v891_v24  ;;  %v4018_v5 = vstv %s4013_s3  ;;  %s4036_s3 = sld [smem:[#allocation98_spill]] }
 0x3b1   :  { %v912_v13 = vmul.f32 %v4017_v47, %v3143_v7  ;;  %v930_v60 = vmul.f32 %v4018_v5, %v3147_v36  ;;  %v4019_v44 = vmov %v4018_v5  ;;  %v4020_v30 = vstv %s3867_s10 }
 0x3b2   :  { %v929_v59 = vmul.f32 %v4019_v44, %v3150_v26  ;;  %v1034_v11 = vmul.f32 %v4020_v30, %v3135_v20  ;;  %v824_v55 = vsel %vm820_vm9, %v819_v32, 0.0  ;;  %v821_v19 = vsel %vm820_vm9, %v817_v43, %v819_v32 }
 0x3b3   :  { %v907_v14 = vadd.f32 %v2347_v46, %v890_v54  ;;  %v1012_v51 = vadd.f32 %v2351_v52, %v993_v6  ;;  %v3190_v53 = vmul.f32 %v2729_v3, %v824_v55  ;;  %v915_v8 = vadd.f32 %v913_v50, %v908_v18  ;;  %v830_v46 = vpop.permute.xlu1 %829  ;;  %v828_v52 = vpop.permute.xlu0 %827 }
 0x3b4   :  { %v4022_v57 = vstv %s4016_s6  ;;  %v987_v15 = vadd.f32 %v985_v39, %v980_v33  ;;  %v3196_v10 = vmul.f32 %v2744_v61, %v821_v19  ;;  %v4025_v50 = vstv %s3865_s2  ;;  %s4041_s2 = sld [smem:[#allocation72_spill]] }
 0x3b5   :  { %v925_v27 = vmul.f32 %v4022_v57, %v3158_v48  ;;  %v914_v45 = vadd.f32 %v912_v13, %v907_v14  ;;  %v4023_v24 = vmov %v4022_v57  ;;  %v1029_v17 = vadd.f32 %v2370_v23, %v1012_v51  ;;  %s4052_s6 = sld [smem:[#allocation96_spill]] }
 0x3b6   :  { %v924_v16 = vmul.f32 %v4023_v24, %v3168_v21  ;;  %v920_v54 = vadd.f32 %v2970_v40, %v915_v8  ;;  %v937_v47 = vmul.f32 %v4025_v50, %v3190_v53  ;;  %v4026_v33 = vstv %s3869_s12 }
 0x3b7   :  { %v1046_v39 = vmul.f32 %v4026_v33, %v3158_v48  ;;  %v4028_v13 = vstv %s4021_s29  ;;  %v834_v32 = vsel %vm820_vm9, %v830_v46, 0.0  ;;  %v831_v23 = vsel %vm820_vm9, %v828_v52, %v830_v46 }
 0x3b8   :  { %v1051_v6 = vmul.f32 %v4028_v13, %v3147_v36  ;;  %v919_v43 = vadd.f32 %v2975_v28, %v914_v45  ;;  %v1036_v18 = vadd.f32 %v1034_v11, %v1029_v17  ;;  %v3216_v40 = vmul.f32 %v2729_v3, %v834_v32 }
 0x3b9   :  { %v3219_v5 = vmul.f32 %v2744_v61, %v831_v23  ;;  %v927_v44 = vadd.f32 %v925_v27, %v920_v54  ;;  %v992_v30 = vadd.f32 %v2919_v0, %v987_v15  ;;  %v4031_v19 = vmov %v4025_v50 }
 0x3ba   :  { %v926_v55 = vadd.f32 %v924_v16, %v919_v43  ;;  %v936_v14 = vmul.f32 %v4031_v19, %v3196_v10  ;;  %v1041_v51 = vadd.f32 %v2980_v12, %v1036_v18  ;;  %v4032_v28 = vstv %s4024_s20  ;;  %s4053_s20 = sld [smem:[#allocation100_spill]] }
 0x3bb   :  { %v1094_v11 = vmul.f32 %v4032_v28, %v3047_v34  ;;  %v932_v3 = vadd.f32 %v930_v60, %v927_v44  ;;  %v4033_v8 = vstv %s4027_s0  ;;  %v4035_v57 = vstv %s3867_s10  ;;  %s2029_s10 = smov 48   ;;  %s3510_s0 = sld [smem:[#allocation6 + $0x4b]] }
 0x3bc   :  { %v942_v61 = vmul.f32 %v4033_v8, %v3216_v40  ;;  %v1033_v27 = vmul.f32 %v4035_v57, %v3143_v7  ;;  %v1089_v0 = vadd.f32 %v2837_v37, %v3066_v9  ;;  %v931_v15 = vadd.f32 %v929_v59, %v926_v55 }
 0x3bd   :  { %v4037_v45 = vmov %v4033_v8  ;;  %v1048_v24 = vadd.f32 %v1046_v39, %v1041_v51  ;;  %v1011_v16 = vadd.f32 %v2374_v35, %v992_v30  ;;  %v939_v60 = vadd.f32 %v937_v47, %v932_v3 }
 0x3be   :  { %v941_v12 = vmul.f32 %v4037_v45, %v3219_v5  ;;  %v4038_v17 = vstv %s4029_s26  ;;  %v1096_v52 = vadd.f32 %v1094_v11, %v1089_v0  ;;  %v4039_v54 = vstv %s4030_s9  ;;  %s3515_s26 = sld [smem:[#allocation6 + $0x1b]] }
 0x3bf   :  { %v1058_v46 = vmul.f32 %v4038_v17, %v3190_v53  ;;  %v1106_v50 = vmul.f32 %v4039_v54, %v3061_v62  ;;  %v4040_v33 = vstv %s4008_s28  ;;  %v938_v9 = vadd.f32 %v936_v14, %v931_v15  ;;  %s4050_s28 = sld [smem:[#allocation103_spill]] }
 0x3c0   :  { %v1325_v37 = vmul.f32 %v4040_v33, %v3047_v34  ;;  %v1053_v59 = vadd.f32 %v1051_v6, %v1048_v24  ;;  %v1028_v39 = vadd.f32 %v2386_v38, %v1011_v16  ;;  %v4042_v35 = vstv %s4034_s15 }
 0x3c1   :  { %v3254_v47 = vmul.f32 %v4042_v35, %v3044_v2  ;;  %v944_v13 = vadd.f32 %v942_v61, %v939_v60  ;;  %v4043_v32 = vstv %s4036_s3  ;;  %v1101_v43 = vadd.f32 %v2926_v56, %v1096_v52 }
 0x3c2   :  { %v1063_v23 = vmul.f32 %v4043_v32, %v3216_v40  ;;  %v4044_v18 = vmov %v4042_v35  ;;  %v943_v6 = vadd.f32 %v941_v12, %v938_v9  ;;  %v1035_v30 = vadd.f32 %v1033_v27, %v1028_v39  ;;  %v4060_v9 = vld [vmem:[#allocation126_spill] sm:$0xff] }
 0x3c3   :  { %v3263_v44 = vmul.f32 %v4044_v18, %v3047_v34  ;;  %v4045_v38 = vstv %s3869_s12  ;;  %949 = vrot.lane.b32.xlu1 %v944_v13, %s2029_s10  ;;  %v1060_v19 = vadd.f32 %v1058_v46, %v1053_v59  ;;  %v1108_v14 = vadd.f32 %v1106_v50, %v1101_v43  ;;  %s4049_s12 = sld [smem:[#allocation99_spill]] }
 0x3c4   :  { %v1045_v55 = vmul.f32 %v4045_v38, %v3168_v21  ;;  %v1088_v51 = vadd.f32 %v2833_v41, %v3058_v42  ;;  %v4046_v56 = vmov %v4032_v28  ;;  %v4047_v11 = vstv %s4041_s2  ;;  %947 = vrot.lane.b32.xlu0 %v943_v6, %s2029_s10  ;;  %v4065_v38 = vld [vmem:[#allocation142_spill] sm:$0xff] }
 0x3c5   :  { %v1093_v28 = vmul.f32 %v4046_v56, %v3044_v2  ;;  %v3276_v3 = vmul.f32 %v4047_v11, %v3044_v2  ;;  %v4048_v8 = vmov %v4047_v11  ;;  %v1040_v57 = vadd.f32 %v2985_v49, %v1035_v30  ;;  %v4069_v11 = vld [vmem:[#allocation128_spill] sm:$0xff] }
 0x3c6   :  { %v3281_v61 = vmul.f32 %v4048_v8, %v3047_v34  ;;  %v4051_v27 = vstv %s4021_s29  ;;  %v1065_v41 = vadd.f32 %v1063_v23, %v1060_v19  ;;  %v1113_v42 = vadd.f32 %v2931_v1, %v1108_v14  ;;  %s2030_s29 = smov 32   ;;  %v4057_v1 = vld [vmem:[#allocation30_spill] sm:$0xff]  ;;  %v4063_v23 = vld [vmem:[#allocation31_spill] sm:$0xff] }
 0x3c7   :  { %v1050_v0 = vmul.f32 %v4051_v27, %v3150_v26  ;;  %v1095_v15 = vadd.f32 %v1093_v28, %v1088_v51  ;;  %v4054_v45 = vmov %v4039_v54  ;;  %v1047_v24 = vadd.f32 %v1045_v55, %v1040_v57  ;;  %v4066_v55 = vld [vmem:[#allocation119_spill] sm:$0xff] }
 0x3c8   :  { %v1105_v12 = vmul.f32 %v4054_v45, %v3075_v31  ;;  %v4055_v34 = vmov %v4038_v17  ;;  %v4056_v60 = vmov %v4043_v32  ;;  %v1320_v17 = vadd.f32 %v2855_v25, %v3091_v22  ;;  %1070 = vrot.lane.b32.xlu1 %v1065_v41, %s2030_s29  ;;  %v4070_v27 = vld [vmem:[#allocation127_spill] sm:$0xff] }
 0x3c9   :  { %v1057_v16 = vmul.f32 %v4055_v34, %v3196_v10  ;;  %v1062_v49 = vmul.f32 %v4056_v60, %v3219_v5  ;;  %v1132_v46 = vadd.f32 %v4057_v1, %v1113_v42  ;;  %v4058_v52 = vstv %s4049_s12 }
 0x3ca   :  { %v1154_v54 = vmul.f32 %v4058_v52, %v3135_v20  ;;  %v4059_v50 = vstv %s4050_s28  ;;  %v1100_v59 = vadd.f32 %v4060_v9, %v1095_v15  ;;  %v1052_v39 = vadd.f32 %v1050_v0, %v1047_v24 }
 0x3cb   :  { %v1166_v33 = vmul.f32 %v4059_v50, %v3158_v48  ;;  %v4061_v35 = vstv %s4052_s6  ;;  %v1327_v25 = vadd.f32 %v1325_v37, %v1320_v17  ;;  %v4062_v22 = vstv %s4053_s20  ;;  %v4074_v17 = vld [vmem:[#allocation132_spill] sm:$0xff] }
 0x3cc   :  { %v1171_v13 = vmul.f32 %v4061_v35, %v3147_v36  ;;  %v1337_v32 = vmul.f32 %v4062_v22, %v3061_v62  ;;  %v1149_v43 = vadd.f32 %v4063_v23, %v1132_v46  ;;  %v4064_v18 = vstv %s3877_s16  ;;  %v4075_v46 = vld [vmem:[#allocation32_spill] sm:$0xff]  ;;  %s4107_s16 = sld [smem:[#allocation104_spill]] }
 0x3cd   :  { %v1178_v6 = vmul.f32 %v4064_v18, %v3190_v53  ;;  %v1107_v30 = vadd.f32 %v1105_v12, %v1100_v59  ;;  %v1319_v19 = vadd.f32 %v4066_v55, %v4065_v38  ;;  %v1059_v14 = vadd.f32 %v1057_v16, %v1052_v39  ;;  %v4079_v39 = vld [vmem:[#allocation129_spill] sm:$0xff] }
 0x3ce   :  { %v4067_v51 = vstv %s2654_s24  ;;  %v4068_v37 = vmov %v4058_v52  ;;  %v1332_v8 = vadd.f32 %v4069_v11, %v1327_v25  ;;  %v1156_v57 = vadd.f32 %v1154_v54, %v1149_v43  ;;  %v4082_v23 = vld [vmem:[#allocation121_spill] sm:$0xff]  ;;  %s2032_s24 = smov 96  }
 0x3cf   :  { %v1183_v56 = vmul.f32 %v4067_v51, %v3216_v40  ;;  %v1153_v28 = vmul.f32 %v4068_v37, %v3143_v7  ;;  %v1112_v0 = vadd.f32 %v4070_v27, %v1107_v30  ;;  %v1326_v41 = vadd.f32 %v3140_v63, %v1319_v19  ;;  %v4083_v30 = vld [vmem:[#allocation33_spill] sm:$0xff] }
 0x3d0   :  { %v4071_v42 = vmov %v4062_v22  ;;  %v1064_v45 = vadd.f32 %v1062_v49, %v1059_v14  ;;  %v4072_v12 = vmov %v4059_v50  ;;  %v4073_v34 = vmov %v4061_v35  ;;  %v4077_v50 = vld [vmem:[#allocation130_spill] sm:$0xff] }
 0x3d1   :  { %v1336_v15 = vmul.f32 %v4071_v42, %v3075_v31  ;;  %v1165_v24 = vmul.f32 %v4072_v12, %v3168_v21  ;;  %v1170_v16 = vmul.f32 %v4073_v34, %v3150_v26  ;;  %v1339_v60 = vadd.f32 %v1337_v32, %v1332_v8  ;;  %v4081_v32 = vld [vmem:[#allocation144_spill] sm:$0xff]  ;;  %v4089_v12 = vld [vmem:[#allocation131_spill] sm:$0xff] }
 0x3d2   :  { %v1161_v1 = vadd.f32 %v4074_v17, %v1156_v57  ;;  %v1131_v52 = vadd.f32 %v4075_v46, %v1112_v0  ;;  %v4076_v63 = vmov %v4064_v18  ;;  %v1331_v9 = vadd.f32 %v4077_v50, %v1326_v41  ;;  %1068 = vrot.lane.b32.xlu0 %v1064_v45, %s2030_s29  ;;  %v4092_v46 = vld [vmem:[#allocation136_spill] sm:$0xff] }
 0x3d3   :  { %v1177_v54 = vmul.f32 %v4076_v63, %v3196_v10  ;;  %v4078_v49 = vmov %v4067_v51  ;;  %v1344_v35 = vadd.f32 %v4079_v39, %v1339_v60  ;;  %v4080_v25 = vstv %s3879_s5  ;;  %v4085_v51 = vld [vmem:[#allocation34_spill] sm:$0xff]  ;;  %v4094_v63 = vld [vmem:[#allocation120_spill] sm:$0xff]  ;;  %s4102_s5 = sld [smem:[#allocation111_spill]] }
 0x3d4   :  { %v1182_v59 = vmul.f32 %v4078_v49, %v3219_v5  ;;  %v1385_v22 = vmul.f32 %v4080_v25, %v3135_v20  ;;  %v1441_v43 = vadd.f32 %v4082_v23, %v4081_v32  ;;  %v1168_v18 = vadd.f32 %v1166_v33, %v1161_v1  ;;  %v4096_v49 = vld [vmem:[#allocation36_spill] sm:$0xff] }
 0x3d5   :  { %v1148_v38 = vadd.f32 %v4083_v30, %v1131_v52  ;;  %v4084_v55 = vstv %s2656_s25  ;;  %v1338_v14 = vadd.f32 %v1336_v15, %v1331_v9  ;;  %v1363_v37 = vadd.f32 %v4085_v51, %v1344_v35  ;;  %v4090_v15 = vld [vmem:[#allocation35_spill] sm:$0xff]  ;;  %v4093_v52 = vld [vmem:[#allocation143_spill] sm:$0xff] }
 0x3d6   :  { %v1397_v19 = vmul.f32 %v4084_v55, %v3158_v48  ;;  %v4086_v11 = vstv %s3874_s13  ;;  %v1448_v57 = vadd.f32 %v3263_v44, %v1441_v43  ;;  %v4087_v27 = vstv %s2646_s4  ;;  %s4106_s4 = smov 16  }
 0x3d7   :  { %v1402_v8 = vmul.f32 %v4086_v11, %v3147_v36  ;;  %v1458_v0 = vmul.f32 %v4087_v27, %v3061_v62  ;;  %v1173_v41 = vadd.f32 %v1171_v13, %v1168_v18  ;;  %v1155_v33 = vadd.f32 %v1153_v28, %v1148_v38  ;;  %v4095_v13 = vld [vmem:[#allocation133_spill] sm:$0xff]  ;;  %v4101_v11 = vld [vmem:[#allocation134_spill] sm:$0xff] }
 0x3d8   :  { %v4088_v42 = vstv %s2665_s30  ;;  %v1343_v34 = vadd.f32 %v4089_v12, %v1338_v14  ;;  %v1380_v60 = vadd.f32 %v4090_v15, %v1363_v37  ;;  %v4091_v17 = vstv %s3880_s7  ;;  %s4115_s30 = sld [smem:[#allocation107_spill]] }
 0x3d9   :  { %v1409_v45 = vmul.f32 %v4088_v42, %v3190_v53  ;;  %v1414_v1 = vmul.f32 %v4091_v17, %v3216_v40  ;;  %v1453_v44 = vadd.f32 %v4092_v46, %v1448_v57  ;;  %v1440_v50 = vadd.f32 %v4094_v63, %v4093_v52  ;;  %v4109_v17 = vld [vmem:[#allocation38_spill] sm:$0xff]  ;;  %v4110_v52 = vld [vmem:[#allocation117_spill] sm:$0xff] }
 0x3da   :  { %v1180_v9 = vadd.f32 %v1178_v6, %v1173_v41  ;;  %v1160_v28 = vadd.f32 %v4095_v13, %v1155_v33  ;;  %v1362_v39 = vadd.f32 %v4096_v49, %v1343_v34  ;;  %v4097_v35 = vmov %v4080_v25  ;;  %v4099_v6 = vld [vmem:[#allocation37_spill] sm:$0xff]  ;;  %v4112_v13 = vld [vmem:[#allocation135_spill] sm:$0xff] }
 0x3db   :  { %v1384_v25 = vmul.f32 %v4097_v35, %v3143_v7  ;;  %v1387_v32 = vadd.f32 %v1385_v22, %v1380_v60  ;;  %v1460_v23 = vadd.f32 %v1458_v0, %v1453_v44  ;;  %v1447_v43 = vadd.f32 %v3254_v47, %v1440_v50  ;;  %v4104_v0 = vld [vmem:[#allocation137_spill] sm:$0xff] }
 0x3dc   :  { %v4098_v18 = vmov %v4087_v27  ;;  %v1185_v38 = vadd.f32 %v1183_v56, %v1180_v9  ;;  %v1167_v55 = vadd.f32 %v1165_v24, %v1160_v28  ;;  %v1379_v14 = vadd.f32 %v4099_v6, %v1362_v39  ;;  %v4105_v47 = vld [vmem:[#allocation141_spill] sm:$0xff]  ;;  %v4114_v39 = vld [vmem:[#allocation123_spill] sm:$0xff] }
 0x3dd   :  { %v1457_v30 = vmul.f32 %v4098_v18, %v3075_v31  ;;  %v4100_v51 = vstv %s2656_s25  ;;  %v1392_v57 = vadd.f32 %v4101_v11, %v1387_v32  ;;  %v4103_v22 = vstv %s3874_s13  ;;  %v4121_v11 = vld [vmem:[#allocation42_spill] sm:$0xff]  ;;  %s3446_s13 = sld [smem:[#allocation6 + $0x19]] }
 0x3de   :  { %v1396_v37 = vmul.f32 %v4100_v51, %v3168_v21  ;;  %v1401_v27 = vmul.f32 %v4103_v22, %v3150_v26  ;;  %v1465_v41 = vadd.f32 %v4104_v0, %v1460_v23  ;;  %v1452_v33 = vadd.f32 %v4105_v47, %v1447_v43  ;;  %1190 = vrot.lane.b32.xlu1 %v1185_v38, %s4106_s4  ;;  %v4117_v43 = vld [vmem:[#allocation116_spill] sm:$0xff]  ;;  %s4154_s25 = sld [smem:[#allocation90_spill]] }
 0x3df   :  { %v1172_v56 = vadd.f32 %v1170_v16, %v1167_v55  ;;  %v1386_v24 = vadd.f32 %v1384_v25, %v1379_v14  ;;  %v1408_v12 = vmul.f32 %v4088_v42, %v3196_v10  ;;  %v4108_v34 = vstv %s3881_s21  ;;  %s4132_s21 = sld [smem:[#allocation52_spill]] }
 0x3e0   :  { %v1506_v15 = vmul.f32 %v4108_v34, %v3135_v20  ;;  %v1399_v60 = vadd.f32 %v1397_v19, %v1392_v57  ;;  %v1484_v46 = vadd.f32 %v4109_v17, %v1465_v41  ;;  %v1459_v44 = vadd.f32 %v1457_v30, %v1452_v33  ;;  %v4116_v19 = vld [vmem:[#allocation39_spill] sm:$0xff] }
 0x3e1   :  { %v4111_v63 = vstv %s3873_s11  ;;  %v1179_v9 = vadd.f32 %v1177_v54, %v1172_v56  ;;  %v1391_v28 = vadd.f32 %v4112_v13, %v1386_v24  ;;  %v4113_v16 = vstv %s4102_s5  ;;  %s4120_s11 = sld [smem:[#allocation109_spill]] }
 0x3e2   :  { %v1462_v50 = vmul.f32 %v4111_v63, %v4110_v52  ;;  %v1518_v49 = vmul.f32 %v4113_v16, %v3158_v48  ;;  %v1562_v35 = vadd.f32 %v4114_v39, %v3127_v58  ;;  %v1404_v25 = vadd.f32 %v1402_v8, %v1399_v60  ;;  %v4130_v63 = vld [vmem:[#allocation118_spill] sm:$0xff] }
 0x3e3   :  { %v1501_v32 = vadd.f32 %v4116_v19, %v1484_v46  ;;  %v4118_v18 = vstv %s4107_s16  ;;  %v1184_v38 = vadd.f32 %v1182_v59, %v1179_v9  ;;  %v1398_v54 = vadd.f32 %v1396_v37, %v1391_v28 }
 0x3e4   :  { %v1464_v23 = vadd.f32 %v1462_v50, %v1459_v44  ;;  %v1572_v30 = vmul.f32 %v4118_v18, %v4117_v43  ;;  %v1569_v55 = vadd.f32 %v3281_v61, %v1562_v35  ;;  %v4119_v6 = vstv %s2734_s18  ;;  %s3471_s18 = sld [smem:[#allocation6 + $0x4a]] }
 0x3e5   :  { %v1579_v14 = vmul.f32 %v4119_v6, %v3061_v62  ;;  %v1411_v51 = vadd.f32 %v1409_v45, %v1404_v25  ;;  %v1508_v58 = vadd.f32 %v1506_v15, %v1501_v32  ;;  %v4122_v57 = vmov %v4108_v34  ;;  %1188 = vrot.lane.b32.xlu0 %v1184_v38, %s4106_s4  ;;  %v4125_v45 = vld [vmem:[#allocation140_spill] sm:$0xff]  ;;  %v4127_v34 = vld [vmem:[#allocation44_spill] sm:$0xff] }
 0x3e6   :  { %v1483_v8 = vadd.f32 %v4121_v11, %v1464_v23  ;;  %v1505_v22 = vmul.f32 %v4122_v57, %v3143_v7  ;;  %v1403_v0 = vadd.f32 %v1401_v27, %v1398_v54  ;;  %v4123_v59 = vstv %s3880_s7  ;;  %v4128_v27 = vld [vmem:[#allocation125_spill] sm:$0xff]  ;;  %s2031_s7 = smov 112   ;;  %v4136_v23 = vld [vmem:[#allocation115_spill] sm:$0xff] }
 0x3e7   :  { %v1413_v37 = vmul.f32 %v4123_v59, %v3219_v5  ;;  %v4124_v61 = vstv %s4115_s30  ;;  %v1574_v47 = vadd.f32 %v1572_v30, %v1569_v55  ;;  %v1416_v33 = vadd.f32 %v1414_v1, %v1411_v51  ;;  %v4140_v11 = vld [vmem:[#allocation45_spill] sm:$0xff] }
 0x3e8   :  { %v1523_v41 = vmul.f32 %v4124_v61, %v3147_v36  ;;  %v1513_v56 = vadd.f32 %v4125_v45, %v1508_v58  ;;  %v4126_v24 = vstv %s3884_s19  ;;  %v1500_v15 = vadd.f32 %v4127_v34, %v1483_v8  ;;  %v4146_v45 = vld [vmem:[#allocation48_spill] sm:$0xff]  ;;  %s3494_s19 = sld [smem:[#allocation6 + $0x1a]] }
 0x3e9   :  { %v1530_v42 = vmul.f32 %v4126_v24, %v3190_v53  ;;  %v1410_v60 = vadd.f32 %v1408_v12, %v1403_v0  ;;  %v4129_v17 = vstv %s2631_s23  ;;  %v1581_v44 = vadd.f32 %v1579_v14, %v1574_v47  ;;  %1421 = vrot.lane.b32.xlu1 %v1416_v33, %s2031_s7  ;;  %v4134_v12 = vld [vmem:[#allocation122_spill] sm:$0xff]  ;;  %s4142_s23 = sld [smem:[#allocation112_spill]] }
 0x3ea   :  { %v1510_v46 = vmul.f32 %v4129_v17, %v4128_v27  ;;  %v4131_v50 = vstv %s4120_s11  ;;  %v1520_v1 = vadd.f32 %v1518_v49, %v1513_v56  ;;  %v1507_v13 = vadd.f32 %v1505_v22, %v1500_v15  ;;  %v4148_v17 = vld [vmem:[#allocation139_spill] sm:$0xff] }
 0x3eb   :  { %v1584_v9 = vmul.f32 %v4131_v50, %v4130_v63  ;;  %v4133_v28 = vmov %v4113_v16  ;;  %v1561_v39 = vadd.f32 %v4134_v12, %v3110_v4  ;;  %v1415_v35 = vadd.f32 %v1413_v37, %v1410_v60 }
 0x3ec   :  { %v1517_v16 = vmul.f32 %v4133_v28, %v3168_v21  ;;  %v4135_v25 = vstv %s3885_s22  ;;  %v1571_v49 = vmul.f32 %v4118_v18, %v4136_v23  ;;  %v1525_v30 = vadd.f32 %v1523_v41, %v1520_v1  ;;  %s4153_s22 = sld [smem:[#allocation114_spill]] }
 0x3ed   :  { %v1535_v19 = vmul.f32 %v4135_v25, %v3216_v40  ;;  %v1586_v32 = vadd.f32 %v1584_v9, %v1581_v44  ;;  %v1512_v38 = vadd.f32 %v1510_v46, %v1507_v13  ;;  %v1568_v54 = vadd.f32 %v3276_v3, %v1561_v39  ;;  %1419 = vrot.lane.b32.xlu0 %v1415_v35, %s2031_s7 }
 0x3ee   :  { %v4137_v4 = vmov %v4119_v6  ;;  %v4138_v6 = vstv %s4132_s21  ;;  %v4139_v51 = vmov %v4124_v61  ;;  %v4141_v57 = vstv %s2749_s14  ;;  %s3529_s14 = sld [smem:[#allocation6 + $0x4c]] }
 0x3ef   :  { %v1578_v55 = vmul.f32 %v4137_v4, %v3075_v31  ;;  %v1220_v14 = vmul.f32 %v4138_v6, %v4117_v43  ;;  %v1522_v58 = vmul.f32 %v4139_v51, %v3150_v26  ;;  %v1605_v8 = vadd.f32 %v4140_v11, %v1586_v32  ;;  %v4162_v11 = vld [vmem:[#allocation138_spill] sm:$0xff] }
 0x3f0   :  { %v1627_v22 = vmul.f32 %v4141_v57, %v3135_v20  ;;  %v1532_v0 = vadd.f32 %v1530_v42, %v1525_v30  ;;  %v1519_v3 = vadd.f32 %v1517_v16, %v1512_v38  ;;  %v4143_v59 = vmov %v4126_v24 }
 0x3f1   :  { %v1529_v37 = vmul.f32 %v4143_v59, %v3196_v10  ;;  %v1573_v61 = vadd.f32 %v1571_v49, %v1568_v54  ;;  %v4144_v43 = vstv %s4006_s8  ;;  %v4145_v47 = vmov %v4135_v25  ;;  %s4158_s8 = sld [smem:[#allocation92_spill]]  ;;  %v4159_v54 = vld [vmem:[#allocation50_spill] sm:$0xff] }
 0x3f2   :  { %v1214_v41 = vmul.f32 %v4144_v43, %v3044_v2  ;;  %v1534_v33 = vmul.f32 %v4145_v47, %v3219_v5  ;;  %v1622_v56 = vadd.f32 %v4146_v45, %v1605_v8  ;;  %v4147_v24 = vmov %v4131_v50  ;;  %v4149_v2 = vld [vmem:[#allocation124_spill] sm:$0xff] }
 0x3f3   :  { %v1583_v42 = vmul.f32 %v4147_v24, %v4110_v52  ;;  %v1537_v34 = vadd.f32 %v1535_v19, %v1532_v0  ;;  %v1524_v15 = vadd.f32 %v1522_v58, %v1519_v3  ;;  %v1580_v60 = vadd.f32 %v1578_v55, %v1573_v61  ;;  %v4164_v0 = vld [vmem:[#allocation53_spill] sm:$0xff]  ;;  %v4168_v24 = vld [vmem:[#allocation55_spill] sm:$0xff] }
 0x3f4   :  { %v1217_v46 = vadd.f32 %v3132_v29, %v4148_v17  ;;  %v1629_v44 = vadd.f32 %v1627_v22, %v1622_v56  ;;  %v4150_v50 = vstv %s4142_s23  ;;  %v4151_v1 = vstv %s2755_s17 }
 0x3f5   :  { %v1632_v9 = vmul.f32 %v4150_v50, %v4149_v2  ;;  %v1639_v13 = vmul.f32 %v4151_v1, %v3158_v48  ;;  %v4152_v28 = vstv %s2773_s1  ;;  %1542 = vrot.lane.b32.xlu1 %v1537_v34, %s2032_s24  ;;  %v1531_v12 = vadd.f32 %v1529_v37, %v1524_v15  ;;  %s2033_s1 = smov 80  }
 0x3f6   :  { %v1227_v16 = vmul.f32 %v4152_v28, %v3061_v62  ;;  %v1585_v39 = vadd.f32 %v1583_v42, %v1580_v60  ;;  %v1222_v29 = vadd.f32 %v1220_v14, %v1217_v46  ;;  %v1273_v35 = vstv %s3446_s13 }
 0x3f7   :  { %v4155_v25 = vmov %v4138_v6  ;;  %v1634_v32 = vadd.f32 %v1632_v9, %v1629_v44  ;;  %v4156_v18 = vstv %s2740_s27  ;;  %v4157_v62 = vmov %v4141_v57  ;;  %v4170_v9 = vld [vmem:[#allocation58_spill] sm:$0xff]  ;;  %s2035_s27 = smov [#allocation7]  }
 0x3f8   :  { %v1219_v19 = vmul.f32 %v4155_v25, %v4136_v23  ;;  %v1644_v49 = vmul.f32 %v4156_v18, %v3147_v36  ;;  %v1626_v30 = vmul.f32 %v4157_v62, %v3143_v7  ;;  %v1536_v38 = vadd.f32 %v1534_v33, %v1531_v12  ;;  %s1764_s17 = sshll.u32 %s2035_s27, 4  ;;  %s1765_s17 = int_to_ptr.vmem [resolvable:$true] %s1764_s17 }
 0x3f9   :  { %v1604_v4 = vadd.f32 %v4159_v54, %v1585_v39  ;;  %v1229_v55 = vadd.f32 %v1227_v16, %v1222_v29  ;;  %v4160_v6 = vstv %s4153_s22  ;;  %v1641_v23 = vadd.f32 %v1639_v13, %v1634_v32  ;;  %s1991_s9 = scalar_lea.vmem %s1765_s17, 2048  ;;  %p1996_p11 = scmp.lt.s32.totalorder %s1765_s17, %s1765_s17 }
 0x3fa   :  { %v1232_v14 = vmul.f32 %v4160_v6, %v4130_v63  ;;  %v4161_v51 = vstv %s4154_s25  ;;  %v1216_v8 = vadd.f32 %v1214_v41, %v4162_v11  ;;  %v4163_v57 = vmov %v4152_v28  ;;  %1540 = vrot.lane.b32.xlu0 %v1536_v38, %s2032_s24  ;;  %p1992_p10 = scmp.ne.s32.totalorder %s1765_s17, %s1991_s9  ;;  %p1997_p12 = scmp.lt.s32.totalorder %s1991_s9, %s1991_s9 }
 0x3fb   :  { %v1651_v58 = vmul.f32 %v4161_v51, %v3190_v53  ;;  %v1226_v22 = vmul.f32 %v4163_v57, %v3075_v31  ;;  %v1621_v3 = vadd.f32 %v4164_v0, %v1604_v4  ;;  %v1278_v59 = vstv %s3471_s18 }
 0x3fc   :  { %v1234_v63 = vadd.f32 %v1232_v14, %v1229_v55  ;;  %v1646_v37 = vadd.f32 %v1644_v49, %v1641_v23  ;;  %v4165_v61 = vstv %s4158_s8  ;;  %v4166_v47 = vmov %v4150_v50  ;;  %v4173_v49 = vld [vmem:[#allocation60_spill] sm:$0xff]  ;;  %v4175_v14 = vld [vmem:[#allocation62_spill] sm:$0xff]  ;;  %p1998_p13 = por %p1997_p12, %p1996_p11 }
 0x3fd   :  { %v1656_v43 = vmul.f32 %v4165_v61, %v3216_v40  ;;  %v1631_v33 = vmul.f32 %v4166_v47, %v4128_v27  ;;  %v1221_v41 = vadd.f32 %v1219_v19, %v1216_v8  ;;  %v1628_v45 = vadd.f32 %v1626_v30, %v1621_v3 }
 0x3fe   :  { %v4167_v31 = vmov %v4151_v1  ;;  %v1253_v42 = vadd.f32 %v4168_v24, %v1234_v63  ;;  %v1275_v34 = vmul.f32 %v1273_v35, %v3135_v20  ;;  %v1653_v15 = vadd.f32 %v1651_v58, %v1646_v37  ;;  %p1999_p0 = pnand %p1998_p13, %p1992_p10 }
 0x3ff   :  { %v1638_v56 = vmul.f32 %v4167_v31, %v3168_v21  ;;  %v1285_v60 = vstv %s3494_s19  ;;  %v1228_v17 = vadd.f32 %v1226_v22, %v1221_v41  ;;  %v4169_v46 = vmov %v4160_v6 }
 0x400   :  { %v1231_v44 = vmul.f32 %v4169_v46, %v4110_v52  ;;  %v1633_v50 = vadd.f32 %v1631_v33, %v1628_v45  ;;  %v1270_v1 = vadd.f32 %v4170_v9, %v1253_v42  ;;  %v1658_v13 = vadd.f32 %v1656_v43, %v1653_v15 }
 0x401   :  { %v4171_v28 = vmov %v4156_v18  ;;  %v4172_v12 = vmov %v4161_v51  ;;  %v1280_v19 = vmul.f32 %v1278_v59, %v4149_v2  ;;  %v1287_v32 = vmul.f32 %v1285_v60, %v3158_v48 }
 0x402   :  { %v1643_v16 = vmul.f32 %v4171_v28, %v3150_v26  ;;  %v1650_v20 = vmul.f32 %v4172_v12, %v3196_v10  ;;  %v1233_v39 = vadd.f32 %v1231_v44, %v1228_v17  ;;  %v1640_v29 = vadd.f32 %v1638_v56, %v1633_v50  ;;  %1663 = vrot.lane.b32.xlu1 %v1658_v13, %s2033_s1 }
 0x403   :  { %v1277_v25 = vadd.f32 %v1275_v34, %v1270_v1  ;;  %v1290_v52 = vstv %s3510_s0  ;;  %v1297_v18 = vstv %s3515_s26  ;;  %v1274_v30 = vmul.f32 %v1273_v35, %v3143_v7 }
 0x404   :  { %v1252_v62 = vadd.f32 %v4173_v49, %v1233_v39  ;;  %v1645_v38 = vadd.f32 %v1643_v16, %v1640_v29  ;;  %v4174_v54 = vmov %v4165_v61  ;;  %v1302_v6 = vstv %s3529_s14 }
 0x405   :  { %v1655_v4 = vmul.f32 %v4174_v54, %v3219_v5  ;;  %v1282_v55 = vadd.f32 %v1280_v19, %v1277_v25  ;;  %v1292_v48 = vmul.f32 %v1290_v52, %v3147_v36  ;;  %v1299_v58 = vmul.f32 %v1297_v18, %v3190_v53 }
 0x406   :  { %v1269_v23 = vadd.f32 %v4175_v14, %v1252_v62  ;;  %v1652_v51 = vadd.f32 %v1650_v20, %v1645_v38  ;;  %v1279_v8 = vmul.f32 %v1278_v59, %v4128_v27  ;;  %v1286_v57 = vmul.f32 %v1285_v60, %v3168_v21 }
 0x407   :  { %v1289_v2 = vadd.f32 %v1287_v32, %v1282_v55  ;;  %v1304_v22 = vmul.f32 %v1302_v6, %v3216_v40  ;;  %v1291_v37 = vmul.f32 %v1290_v52, %v3150_v26  ;;  %v1298_v61 = vmul.f32 %v1297_v18, %v3196_v10 }
 0x408   :  { %v1276_v11 = vadd.f32 %v1274_v30, %v1269_v23  ;;  %v1657_v7 = vadd.f32 %v1655_v4, %v1652_v51  ;;  %v1303_v53 = vmul.f32 %v1302_v6, %v3219_v5  ;;  %v2034_v51 = vmov 1966171168  }
 0x409   :  { %v1294_v35 = vadd.f32 %v1292_v48, %v1289_v2  ;;  %v1686_v2 = vunpack.c.l.s4 %v2034_v51 }
 0x40a   :  { %v1281_v0 = vadd.f32 %v1279_v8, %v1276_v11  ;;  %1661 = vrot.lane.b32.xlu0 %v1657_v7, %s2033_s1  ;;  %v4176_v11 = vld [vmem:[#allocation11_spill] sm:$0xff] }
 0x40b   :  { %v1301_v3 = vadd.f32 %v1299_v58, %v1294_v35  ;;  %v1687_v48 = vunpack.c.0.s8 %v1686_v2 }
 0x40c   :  { %v1288_v63 = vadd.f32 %v1286_v57, %v1281_v0 }
 0x40d   :  { %v1306_v36 = vadd.f32 %v1304_v22, %v1301_v3  ;;  %v1690_v8 = vsub.s32 %v1687_v48, %v4176_v11 }
 0x40e   :  { %v1293_v43 = vadd.f32 %v1291_v37, %v1288_v63  ;;  %v4177_v63 = vld [vmem:[#allocation12_spill] sm:$0xff] }
 0x410   :  { %v1300_v47 = vadd.f32 %v1298_v61, %v1293_v43  ;;  %v4178_v61 = vld [vmem:[#allocation13_spill] sm:$0xff] }
 0x412   :  { %v1305_v27 = vadd.f32 %v1303_v53, %v1300_v47  ;;  %v4179_v47 = vld [vmem:[#allocation15_spill] sm:$0xff] }
 0x435   :  { %v950_v59 = vpop.permute.xlu1 %949 }
 0x436   :  { %v948_v21 = vpop.permute.xlu0 %947 }
 0x437   :  { %v952_v56 = vsel %vm951_vm10, %v948_v21, %v950_v59  ;;  %v955_v5 = vsel %vm951_vm10, 0.0, %v948_v21  ;;  %v4180_v59 = vld [vmem:[#allocation17_spill] sm:$0xff] }
 0x43a   :  { %v1071_v33 = vpop.permute.xlu1 %1070 }
 0x444   :  { %v1069_v41 = vpop.permute.xlu0 %1068 }
 0x445   :  { %v1072_v31 = vsel %vm179_vm5, %v1069_v41, %v1071_v33  ;;  %v1075_v34 = vsel %vm179_vm5, 0.0, %v1069_v41  ;;  %v4181_v33 = vld [vmem:[#allocation14_spill] sm:$0xff] }
 0x446   :  { %v1077_v24 = vadd.f32 %v1072_v31, %v952_v56  ;;  %v1076_v46 = vadd.f32 %v1075_v34, %v955_v5  ;;  %v4183_v31 = vld [vmem:[#allocation18_spill] sm:$0xff] }
 0x447   :  { %v4186_v34 = vld [vmem:[#allocation22_spill] sm:$0xff] }
 0x450   :  { %v1191_v45 = vpop.permute.xlu1 %1190 }
 0x457   :  { %v1189_v40 = vpop.permute.xlu0 %1188 }
 0x458   :  { %v1193_v26 = vsel %vm1192_vm11, %v1189_v40, %v1191_v45  ;;  %v1196_v15 = vsel %vm1192_vm11, 0.0, %v1189_v40  ;;  %v4182_v45 = vld [vmem:[#allocation16_spill] sm:$0xff] }
 0x459   :  { %v1198_v42 = vadd.f32 %v1193_v26, %v1077_v24  ;;  %v1197_v9 = vadd.f32 %v1196_v15, %v1076_v46  ;;  %v4184_v26 = vld [vmem:[#allocation19_spill] sm:$0xff]  ;;  %v4187_v15 = vld [vmem:[#allocation24_spill] sm:$0xff] }
 0x45b   :  { %v1422_v10 = vpop.permute.xlu1 %1421  ;;  %v1308_v60 = vadd.f32 %v1306_v36, %v1198_v42  ;;  %v1307_v12 = vadd.f32 %v1305_v27, %v1197_v9  ;;  %v4190_v9 = vld [vmem:[#allocation23_spill] sm:$0xff] }
 0x45c   :  { %v1427_v44 = vsel %vm1423_vm12, %v1422_v10, 0.0 }
 0x45d   :  { %v1429_v13 = vadd.f32 %v1427_v44, %v1308_v60  ;;  %v4189_v44 = vld [vmem:[#allocation20_spill] sm:$0xff] }
 0x45f   :  { %v1420_v50 = vpop.permute.xlu0 %1419 }
 0x460   :  { %v1424_v29 = vsel %vm1423_vm12, %v1420_v50, %v1422_v10  ;;  %v4185_v10 = vld [vmem:[#allocation21_spill] sm:$0xff] }
 0x461   :  { %v1428_v52 = vadd.f32 %v1424_v29, %v1307_v12  ;;  %v4194_v29 = vld [vmem:[#allocation29_spill] sm:$0xff] }
 0x467   :  { %v1543_v17 = vpop.permute.xlu1 %1542 }
 0x468   :  { %v1548_v1 = vsel %vm1544_vm13, %v1543_v17, 0.0 }
 0x469   :  { %v1550_v28 = vadd.f32 %v1548_v1, %v1429_v13  ;;  %v4191_v13 = vld [vmem:[#allocation26_spill] sm:$0xff] }
 0x46c   :  { %v1541_v20 = vpop.permute.xlu0 %1540 }
 0x46d   :  { %v1545_v19 = vsel %vm1544_vm13, %v1541_v20, %v1543_v17  ;;  %v4188_v17 = vld [vmem:[#allocation25_spill] sm:$0xff]  ;;  %v4193_v20 = vld [vmem:[#allocation28_spill] sm:$0xff] }
 0x46e   :  { %v1549_v49 = vadd.f32 %v1545_v19, %v1428_v52 }
 0x474   :  { %v1664_v16 = vpop.permute.xlu1 %1663 }
 0x475   :  { %v1669_v39 = vsel %vm1665_vm14, %v1664_v16, 0.0 }
 0x476   :  { %v1671_v25 = vadd.f32 %v1669_v39, %v1550_v28 }
 0x478   :  { %v1673_v32 = vsub.f32 0.0, %v1671_v25 }
 0x47a   :  { %v1676_v18 = vmul.f32 1.442695, %v1673_v32 }
 0x47c   :  { %v1662_v62 = vpop.permute.xlu0 %1661  ;;  %1951 = vpow2.f32 %v1676_v18 }
 0x47d   :  { %v1666_v30 = vsel %vm1665_vm14, %v1662_v62, %v1664_v16  ;;  %v4192_v16 = vld [vmem:[#allocation27_spill] sm:$0xff] }
 0x47e   :  { %v1670_v38 = vadd.f32 %v1666_v30, %v1549_v49 }
 0x480   :  { %v1672_v54 = vsub.f32 0.0, %v1670_v38 }
 0x482   :  { %v1674_v4 = vmul.f32 1.442695, %v1672_v54 }
 0x484   :  { %1953 = vpow2.f32 %v1674_v4 }
 0x489   :  { %v1952_v55 = vpop.eup %1951 }
 0x48a   :  { %v1679_v6 = vadd.f32 1.0, %v1952_v55 }
 0x48c   :  { %1955 = vrcp.f32 %v1679_v6 }
 0x491   :  { %v1954_v14 = vpop.eup %1953 }
 0x492   :  { %v1678_v23 = vadd.f32 1.0, %v1954_v14 }
 0x494   :  { %1957 = vrcp.f32 %v1678_v23 }
 0x499   :  { %v1956_v58 = vpop.eup %1955 }
 0x4a1   :  { %v1958_v57 = vpop.eup %1957 }
 0x4a2   :  { %v1684_v7 = vcombine.low %v1958_v57, %v1956_v58 }
 0x4a4   :  { %v1691_v35 = vrot.slane %v1684_v7, %v1690_v8 }
 0x4a6   :  { %v1692_v22 = vcombine.high %v1691_v35, %v1691_v35  ;;  %v1699_v0 = vrot.slane %v1691_v35, %v1690_v8 }
 0x4a8   :  { %v1706_v3 = vrot.slane %v1692_v22, %v1690_v8  ;;  %v1710_v37 = vrot.slane %v1699_v0, %v4177_v63  ;;  %v1714_v36 = vrot.slane %v1699_v0, %v4178_v61 }
 0x4aa   :  { %v1718_v43 = vrot.slane %v1706_v3, %v4177_v63  ;;  %v1722_v53 = vrot.slane %v1706_v3, %v4178_v61  ;;  %v1727_v27 = vmul.f32 %v1710_v37, %v4179_v47  ;;  %v1728_v21 = vmul.f32 %v1714_v36, %v4180_v59 }
 0x4ab   :  { %v1729_v41 = vmul.f32 %v1710_v37, %v4181_v33  ;;  %v1730_v40 = vmul.f32 %v1714_v36, %v4182_v45  ;;  %v1731_v56 = vmul.f32 %v1710_v37, %v4183_v31  ;;  %v1732_v24 = vmul.f32 %v1714_v36, %v4184_v26 }
 0x4ac   :  { %v1733_v42 = vmul.f32 %v1710_v37, %v4185_v10  ;;  %v1734_v5 = vmul.f32 %v1714_v36, %v4186_v34  ;;  %v1735_v60 = vmul.f32 %v1718_v43, %v4187_v15  ;;  %v1736_v46 = vmul.f32 %v1722_v53, %v4188_v17  ;;  %1743 = vst [vmem:[#allocation7] sm:$0xff] %v1727_v27 }
 0x4ad   :  { %1744 = vst [vmem:[#allocation7 + $0x8] sm:$0xff] %v1728_v21  ;;  %v1737_v50 = vmul.f32 %v1718_v43, %v4189_v44  ;;  %v1738_v1 = vmul.f32 %v1722_v53, %v4190_v9  ;;  %v1739_v28 = vmul.f32 %v1718_v43, %v4191_v13  ;;  %v1740_v12 = vmul.f32 %v1722_v53, %v4192_v16 }
 0x4ae   :  { %1745 = vst [vmem:[#allocation7 + $0x10] sm:$0xff] %v1729_v41  ;;  %1746 = vst [vmem:[#allocation7 + $0x18] sm:$0xff] %v1730_v40  ;;  %v1741_v39 = vmul.f32 %v1718_v43, %v4193_v20  ;;  %v1742_v25 = vmul.f32 %v1722_v53, %v4194_v29 }
 0x4af   :  { %1747 = vst [vmem:[#allocation7 + $0x20] sm:$0xff] %v1731_v56  ;;  %1748 = vst [vmem:[#allocation7 + $0x28] sm:$0xff] %v1732_v24 }
 0x4b0   :  { %1749 = vst [vmem:[#allocation7 + $0x30] sm:$0xff] %v1733_v42  ;;  %1750 = vst [vmem:[#allocation7 + $0x38] sm:$0xff] %v1734_v5 }
 0x4b1   :  { %1751 = vst [vmem:[#allocation7 + $0x40] sm:$0xff] %v1735_v60  ;;  %1752 = vst [vmem:[#allocation7 + $0x48] sm:$0xff] %v1736_v46 }
 0x4b2   :  { %1753 = vst [vmem:[#allocation7 + $0x50] sm:$0xff] %v1737_v50  ;;  %1754 = vst [vmem:[#allocation7 + $0x58] sm:$0xff] %v1738_v1 }
 0x4b3   :  { %1755 = vst [vmem:[#allocation7 + $0x60] sm:$0xff] %v1739_v28  ;;  %1756 = vst [vmem:[#allocation7 + $0x68] sm:$0xff] %v1740_v12 }
 0x4b4   :  { %1757 = vst [vmem:[#allocation7 + $0x70] sm:$0xff] %v1741_v39  ;;  %1758 = vst [vmem:[#allocation7 + $0x78] sm:$0xff] %v1742_v25 }
 0x4b5   :  { %2002 = shalt.err (!%p1999_p0)
}
 0x4b6   :  { %s4195_s15 = smov 256   ;;  %s4196_s10 = sld [smem:[#allocation145_spill]] }
 0x4bc   :  { %1770 = dma.vmem_to_hbm [thread:$0]  %s1765_s17, 2048, %s4196_s10, [#allocation4], %s4195_s15, %s4195_s15, %s4106_s4  }
 0x4bd   :  { %2015 = dma.done.wait [#allocation4], 2048  }
 0x4be   :  { %2016 = vsyncadd [#allocation4], 4294965248 }
 0x4bf   :  { %1774 = vsyncpa [#allocation3], 1 }
 0x4c0   :  { %1775 = vsyncpa [#allocation4], 1 }
 0x4c1   :  { %1776 = vsyncpa [#allocation5], 1 }

</bundles_post_ra>
